<compile_context>
chip_gen: v5e
topology: v5e:2x2
jax: 0.10.0
libtpu: 0.0.40
codegen_flags: <defaults>
</compile_context>

<pallas_src>
import functools

import jax
import jax.numpy as jnp
from jax.experimental import pallas as pl
from jax.experimental.pallas import tpu as pltpu


# ----------------------------------------------------------------------------
# Small padding helpers (run once on the parameters, outside the hot path).
# ----------------------------------------------------------------------------
def _round_up(x, m):
    return ((x + m - 1) // m) * m


def _pad2(a, rows, cols):
    return jnp.pad(a, ((0, rows - a.shape[0]), (0, cols - a.shape[1])))


# PyTorch LSTM gate order is [i | f | g | o]; the kernel uses [i | f | o | g]
# so the three sigmoid gates are one contiguous lane slab.
_GATE_ORDER = (0, 1, 3, 2)


def _pad_gate_mat(w, H, Hp, rows_p):
    """w: (in, 4H) PyTorch order [i|f|g|o] -> (rows_p, 4*Hp) kernel order
    [i|f|o|g], padding each gate's column block independently so gate k lives
    in lanes [k*Hp, k*Hp+H)."""
    cols = [jnp.pad(w[:, k * H:(k + 1) * H], ((0, 0), (0, Hp - H)))
            for k in _GATE_ORDER]
    w4 = jnp.concatenate(cols, axis=1)
    return jnp.pad(w4, ((0, rows_p - w.shape[0]), (0, 0)))


def _pad_gate_vec(b, H, Hp):
    segs = [jnp.pad(b[k * H:(k + 1) * H], (0, Hp - H)) for k in _GATE_ORDER]
    return jnp.concatenate(segs, axis=0)


# ----------------------------------------------------------------------------
# Fused kernel: embedding gather + L-layer LSTM + final linear on h_T.
# Kernel gate order: i, f, o, g.  All shapes are pre-padded to (8,128) tiles.
# ----------------------------------------------------------------------------
def _fused_rnn_kernel(ids_ref, emb_ref, h0_ref, c0_ref, wih_ref, whh_ref,
                      b_ref, wout_ref, bout_ref,
                      out_ref, hn_ref, cn_ref,
                      hseq_sc, gx_sc, *, T, B_pad, H_pad, num_layers):
    TB = T * B_pad
    Vp = emb_ref.shape[0]
    Hp = H_pad

    # ---- Embedding gather as a one-hot bf16 matmul on the MXU (no dynamic
    #      indexing, no XLA gather).  Rows are time-major: r = t*B_pad + b.
    # TODO(synk): for realistic vocab sizes keep the table in HBM
    # (memory_space=pl.ANY) and DMA-gather rows via scalar-prefetched ids
    # instead of the one-hot matmul.
    ids = ids_ref[...]                                           # (TB, 1) i32
    onehot = (jax.lax.broadcasted_iota(jnp.int32, (TB, Vp), 1)
              == ids).astype(jnp.bfloat16)                       # (TB, Vp)
    layer_in = jnp.dot(onehot, emb_ref[...],
                       preferred_element_type=jnp.float32)       # (TB, P) f32

    h = None
    for l in range(num_layers):
        # Same RHS for every per-step matmul of this layer, issued strictly
        # consecutively -> Mosaic keeps W_hh staged in the MXU across steps.
        w_hh = whh_ref[l]                                        # (P, 4P) bf16

        # Hoisted input projection for the whole sequence (no serial dep):
        # one bf16 (TB, P) @ (P, 4P) matmul, bias folded in, staged in VMEM.
        # TODO(synk): for large T, chunk this over T-tiles reusing one
        # fixed-size scratch slab to bound VMEM on v7x (64 MiB).
        gx_sc[...] = (jnp.dot(layer_in.astype(jnp.bfloat16), wih_ref[l],
                              preferred_element_type=jnp.float32)
                      + b_ref[l])                                # (TB, 4P) f32

        h = h0_ref[l]                                            # (Bp, P) f32
        c = c0_ref[l]                                            # (Bp, P) f32
        for t in range(T):                    # T=8: keep fully unrolled
            gates = (gx_sc[pl.ds(t * B_pad, B_pad), :]
                     + jnp.dot(h.astype(jnp.bfloat16), w_hh,
                               preferred_element_type=jnp.float32))  # (Bp,4P)
            # Kernel gate order: [i | f | o | g].  One wide EUP tanh for the
            # three sigmoid gates (sigmoid(x) = 0.5*tanh(0.5*x) + 0.5), one
            # tanh for g -> 2 transcendental pushes/step instead of 4.
            sig = 0.5 * jnp.tanh(0.5 * gates[:, 0:3 * Hp]) + 0.5
            i_g = sig[:, 0 * Hp:1 * Hp]
            f_g = sig[:, 1 * Hp:2 * Hp]
            o_g = sig[:, 2 * Hp:3 * Hp]
            g_g = jnp.tanh(gates[:, 3 * Hp:4 * Hp])
            c = f_g * c + i_g * g_g                              # f32
            h = o_g * jnp.tanh(c)                                # f32
            if l + 1 < num_layers:
                # Inter-layer sequence stays in VMEM scratch (no HBM trip).
                hseq_sc[pl.ds(t * B_pad, B_pad), :] = h

        hn_ref[l] = h
        cn_ref[l] = c
        if l + 1 < num_layers:
            layer_in = hseq_sc[...]                              # (TB, P) f32

    # Final linear on the last timestep's top-layer hidden state only
    # (equivalent to PyTorch's full (B*T) linear followed by [:, -1]).
    out_ref[...] = (jnp.dot(h.astype(jnp.bfloat16), wout_ref[...],
                            preferred_element_type=jnp.float32)
                    + bout_ref[...])


def _fused_call(ids, emb, h0, c0, wih, whh, b, wout, bout,
                *, T, B_pad, H_pad, num_layers):
    Op = wout.shape[1]
    kernel = functools.partial(_fused_rnn_kernel, T=T, B_pad=B_pad,
                               H_pad=H_pad, num_layers=num_layers)
    return pl.pallas_call(
        kernel,
        out_shape=(
            jax.ShapeDtypeStruct((B_pad, Op), jnp.float32),
            jax.ShapeDtypeStruct((num_layers, B_pad, H_pad), jnp.float32),
            jax.ShapeDtypeStruct((num_layers, B_pad, H_pad), jnp.float32),
        ),
        scratch_shapes=[
            pltpu.VMEM((T * B_pad, H_pad), jnp.float32),       # inter-layer h_seq
            pltpu.VMEM((T * B_pad, 4 * H_pad), jnp.float32),   # hoisted x-projection
        ],
        compiler_params=pltpu.CompilerParams(
            vmem_limit_bytes=32 * 1024 * 1024),
    )(ids, emb, h0, c0, wih, whh, b, wout, bout)


# ----------------------------------------------------------------------------
# Parameter init (logical shapes; weights stored transposed vs. PyTorch so
# the kernel does x @ W directly, biases combined b_ih + b_hh).
# ----------------------------------------------------------------------------
def init_params(key, num_layers, vocab_size, hidden_dim, embedding_dim,
                output_dim):
    keys = iter(jax.random.split(key, 2 + 4 * num_layers))
    params = {
        "embedding": 0.1 * jax.random.normal(
            next(keys), (vocab_size, embedding_dim), jnp.float32),
        "lstm": [],
    }
    for layer in range(num_layers):
        e_in = embedding_dim if layer == 0 else hidden_dim
        w_ih = 0.1 * jax.random.normal(
            next(keys), (e_in, 4 * hidden_dim), jnp.float32)
        w_hh = 0.1 * jax.random.normal(
            next(keys), (hidden_dim, 4 * hidden_dim), jnp.float32)
        b_ih = 0.1 * jax.random.normal(
            next(keys), (4 * hidden_dim,), jnp.float32)
        b_hh = 0.1 * jax.random.normal(
            next(keys), (4 * hidden_dim,), jnp.float32)
        params["lstm"].append({"w_ih": w_ih, "w_hh": w_hh, "b": b_ih + b_hh})
    params["w_out"] = 0.1 * jax.random.normal(
        next(keys), (hidden_dim, output_dim), jnp.float32)
    params["b_out"] = jnp.zeros((output_dim,), jnp.float32)
    return params


def pad_params(params, num_layers, vocab_size, hidden_dim, embedding_dim,
               output_dim):
    """One-time pre-padding of all weights to (8,128)-tiled shapes.
    Matmul operands (emb / W_ih / W_hh / W_out) are stored in bf16 for the
    MXU; biases stay f32 (added after the f32 accumulate)."""
    P = max(_round_up(embedding_dim, 128), _round_up(hidden_dim, 128))
    Vp = _round_up(vocab_size, 128)
    Op = _round_up(output_dim, 128)

    wih_l, whh_l, b_l = [], [], []
    for lp in params["lstm"]:
        wih_l.append(_pad_gate_mat(lp["w_ih"], hidden_dim, P, P))
        whh_l.append(_pad_gate_mat(lp["w_hh"], hidden_dim, P, P))
        b_l.append(_pad_gate_vec(lp["b"], hidden_dim, P).reshape(1, 4 * P))
    return {
        "emb": _pad2(params["embedding"], Vp, P).astype(jnp.bfloat16),
        "wih": jnp.stack(wih_l).astype(jnp.bfloat16),      # (L, P, 4P)
        "whh": jnp.stack(whh_l).astype(jnp.bfloat16),      # (L, P, 4P)
        "b": jnp.stack(b_l),                               # (L, 1, 4P) f32
        "wout": _pad2(params["w_out"], P, Op).astype(jnp.bfloat16),  # (P, Op)
        "bout": _pad2(params["b_out"].reshape(1, -1), 1, Op),        # f32
    }


# ----------------------------------------------------------------------------
# Forward pass (matches ClassifierRNN.forward; self.sig is defined but never
# applied in forward, so no sigmoid here either).
# ----------------------------------------------------------------------------
def classifier_rnn_forward(pp, x_tokens, hidden, *, output_dim):
    h0, c0 = hidden                              # (L, B, H) each
    L, B, H = h0.shape
    T = x_tokens.shape[1]
    P = pp["whh"].shape[1]                       # padded hidden/feature width
    Bp = _round_up(B, 8)

    # Time-major, batch-padded token ids as a (T*Bp, 1) column (tiny glue).
    ids = jnp.transpose(x_tokens.astype(jnp.int32), (1, 0))   # (T, B)
    ids = jnp.pad(ids, ((0, 0), (0, Bp - B))).reshape(T * Bp, 1)

    h0p = jnp.pad(h0, ((0, 0), (0, Bp - B), (0, P - H)))
    c0p = jnp.pad(c0, ((0, 0), (0, Bp - B), (0, P - H)))

    out_p, hn_p, cn_p = _fused_call(
        ids, pp["emb"], h0p, c0p, pp["wih"], pp["whh"], pp["b"],
        pp["wout"], pp["bout"], T=T, B_pad=Bp, H_pad=P, num_layers=L)

    # PyTorch: linear(lstm_out.view(-1,H)).view(B,-1)[:, -1]
    #        == linear(h_{T-1})[:, output_dim-1]
    sig_out = out_p[:B, output_dim - 1]
    return sig_out, (hn_p[:, :B, :H], cn_p[:, :B, :H])


# ----------------------------------------------------------------------------
# Pure-JAX f32 reference (follows the PyTorch forward literally) for self-check.
# ----------------------------------------------------------------------------
def _reference_forward(params, x_tokens, hidden):
    h0, c0 = hidden
    B, T = x_tokens.shape
    layer_in = params["embedding"][x_tokens]          # (B, T, E)
    h_fin, c_fin = [], []
    for l, lp in enumerate(params["lstm"]):
        H = lp["w_hh"].shape[0]
        h, c = h0[l], c0[l]
        outs = []
        for t in range(T):
            gates = layer_in[:, t, :] @ lp["w_ih"] + h @ lp["w_hh"] + lp["b"]
            i = jax.nn.sigmoid(gates[:, 0 * H:1 * H])
            f = jax.nn.sigmoid(gates[:, 1 * H:2 * H])
            g = jnp.tanh(gates[:, 2 * H:3 * H])
            o = jax.nn.sigmoid(gates[:, 3 * H:4 * H])
            c = f * c + i * g
            h = o * jnp.tanh(c)
            outs.append(h)
        layer_in = jnp.stack(outs, axis=1)            # (B, T, H)
        h_fin.append(h)
        c_fin.append(c)
    H = layer_in.shape[-1]
    out = layer_in.reshape(-1, H) @ params["w_out"] + params["b_out"]
    sig_out = out.reshape(B, -1)[:, -1]
    return sig_out, (jnp.stack(h_fin), jnp.stack(c_fin))


if __name__ == "__main__":
    NUM_LAYERS = 2
    VOCAB_SIZE = 50
    HIDDEN_DIM = 32
    EMBEDDING_DIM = 32
    OUTPUT_DIM = 1
    B, T = 2, 8

    key = jax.random.PRNGKey(0)
    pkey, xkey = jax.random.split(key)
    params = init_params(pkey, NUM_LAYERS, VOCAB_SIZE, HIDDEN_DIM,
                         EMBEDDING_DIM, OUTPUT_DIM)
    padded = pad_params(params, NUM_LAYERS, VOCAB_SIZE, HIDDEN_DIM,
                        EMBEDDING_DIM, OUTPUT_DIM)

    x_tokens = jax.random.randint(xkey, (B, T), 0, VOCAB_SIZE, dtype=jnp.int32)
    h0 = jnp.zeros((NUM_LAYERS, B, HIDDEN_DIM), jnp.float32)
    c0 = jnp.zeros((NUM_LAYERS, B, HIDDEN_DIM), jnp.float32)

    fwd = jax.jit(functools.partial(classifier_rnn_forward,
                                    output_dim=OUTPUT_DIM))
    sig_out, (h_n, c_n) = fwd(padded, x_tokens, (h0, c0))
    jax.block_until_ready((sig_out, h_n, c_n))

    assert sig_out.shape == (B,)
    assert h_n.shape == (NUM_LAYERS, B, HIDDEN_DIM)
    assert c_n.shape == (NUM_LAYERS, B, HIDDEN_DIM)

    # Numerical self-check against the pure-JAX f32 reference (tolerances
    # cover bf16 matmul operands; gate math / cell state stay f32 in-kernel).
    ref_sig, (ref_h, ref_c) = _reference_forward(params, x_tokens, (h0, c0))
    assert jnp.allclose(sig_out, ref_sig, rtol=2e-2, atol=2e-3)
    assert jnp.allclose(h_n, ref_h, rtol=2e-2, atol=2e-3)
    assert jnp.allclose(c_n, ref_c, rtol=2e-2, atol=2e-3)

    print("KERNEL_OK")
</pallas_src>

<mosaic_0001>
module attributes {stable_mosaic.version = 11 : i64} {
  func.func @_fused_rnn_kernel(%arg0: memref<64x1xi32, #tpu.memory_space<vmem>>, %arg1: memref<128x128xbf16, #tpu.memory_space<vmem>>, %arg2: memref<2x8x128xf32, #tpu.memory_space<vmem>>, %arg3: memref<2x8x128xf32, #tpu.memory_space<vmem>>, %arg4: memref<2x128x512xbf16, #tpu.memory_space<vmem>>, %arg5: memref<2x128x512xbf16, #tpu.memory_space<vmem>>, %arg6: memref<2x1x512xf32, #tpu.memory_space<vmem>>, %arg7: memref<128x128xbf16, #tpu.memory_space<vmem>>, %arg8: memref<1x128xf32, #tpu.memory_space<vmem>>, %arg9: memref<8x128xf32, #tpu.memory_space<vmem>>, %arg10: memref<2x8x128xf32, #tpu.memory_space<vmem>>, %arg11: memref<2x8x128xf32, #tpu.memory_space<vmem>>, %arg12: memref<64x128xf32, #tpu.memory_space<vmem>>, %arg13: memref<64x512xf32, #tpu.memory_space<vmem>>) attributes {dimension_semantics = [], scalar_prefetch = 0 : i64, scratch_operands = 2 : i64, tpu.core_type = #tpu.core_type<tc>} {
    %c0 = arith.constant 0 : index
    %c0_0 = arith.constant 0 : index
    %0 = vector.load %arg0[%c0, %c0_0] : memref<64x1xi32, #tpu.memory_space<vmem>>, vector<64x1xi32>
    %1 = tpu.iota {dimensions = array<i32: 1>} : vector<64x128xi32>
    %2 = vector.broadcast %0 : vector<64x1xi32> to vector<64x128xi32>
    %3 = arith.cmpi eq, %1, %2 : vector<64x128xi32>
    %4 = arith.extui %3 : vector<64x128xi1> to vector<64x128xi32>
    %5 = arith.sitofp %4 : vector<64x128xi32> to vector<64x128xf32>
    %6 = arith.truncf %5 : vector<64x128xf32> to vector<64x128xbf16>
    %c0_1 = arith.constant 0 : index
    %c0_2 = arith.constant 0 : index
    %7 = vector.load %arg1[%c0_1, %c0_2] : memref<128x128xbf16, #tpu.memory_space<vmem>>, vector<128x128xbf16>
    %cst = arith.constant dense<0.000000e+00> : vector<64x128xf32>
    %8 = tpu.matmul %6, %7, %cst {dimension_numbers = #tpu.dot_dimension_numbers<[1], [0], [0], [1], [0, 0, 1, 1], [], []>} : vector<64x128xbf16>, vector<128x128xbf16>, vector<64x128xf32> -> vector<64x128xf32>
    %c0_3 = arith.constant 0 : index
    %c0_4 = arith.constant 0 : index
    %c0_5 = arith.constant 0 : index
    %9 = vector.load %arg5[%c0_3, %c0_4, %c0_5] : memref<2x128x512xbf16, #tpu.memory_space<vmem>>, vector<1x128x512xbf16>
    %10 = vector.shape_cast %9 : vector<1x128x512xbf16> to vector<128x512xbf16>
    %11 = arith.truncf %8 : vector<64x128xf32> to vector<64x128xbf16>
    %c0_6 = arith.constant 0 : index
    %c0_7 = arith.constant 0 : index
    %c0_8 = arith.constant 0 : index
    %12 = vector.load %arg4[%c0_6, %c0_7, %c0_8] : memref<2x128x512xbf16, #tpu.memory_space<vmem>>, vector<1x128x512xbf16>
    %13 = vector.shape_cast %12 : vector<1x128x512xbf16> to vector<128x512xbf16>
    %cst_9 = arith.constant dense<0.000000e+00> : vector<64x512xf32>
    %14 = tpu.matmul %11, %13, %cst_9 {dimension_numbers = #tpu.dot_dimension_numbers<[1], [0], [0], [1], [0, 0, 1, 1], [], []>} : vector<64x128xbf16>, vector<128x512xbf16>, vector<64x512xf32> -> vector<64x512xf32>
    %c0_10 = arith.constant 0 : index
    %c0_11 = arith.constant 0 : index
    %c0_12 = arith.constant 0 : index
    %15 = vector.load %arg6[%c0_10, %c0_11, %c0_12] : memref<2x1x512xf32, #tpu.memory_space<vmem>>, vector<1x1x512xf32>
    %16 = vector.shape_cast %15 : vector<1x1x512xf32> to vector<1x512xf32>
    %17 = vector.broadcast %16 : vector<1x512xf32> to vector<64x512xf32>
    %18 = arith.addf %14, %17 : vector<64x512xf32>
    %c0_13 = arith.constant 0 : index
    %c0_14 = arith.constant 0 : index
    %19 = vector.load %arg13[%c0_13, %c0_14] : memref<64x512xf32, #tpu.memory_space<vmem>>, vector<64x512xf32>
    tpu.vector_store %arg13[%c0_13, %c0_14], %18 {strides = array<i32>} : memref<64x512xf32, #tpu.memory_space<vmem>>, vector<64x512xf32>,
    %c0_15 = arith.constant 0 : index
    %c0_16 = arith.constant 0 : index
    %c0_17 = arith.constant 0 : index
    %20 = vector.load %arg2[%c0_15, %c0_16, %c0_17] : memref<2x8x128xf32, #tpu.memory_space<vmem>>, vector<1x8x128xf32>
    %21 = vector.shape_cast %20 : vector<1x8x128xf32> to vector<8x128xf32>
    %c0_18 = arith.constant 0 : index
    %c0_19 = arith.constant 0 : index
    %c0_20 = arith.constant 0 : index
    %22 = vector.load %arg3[%c0_18, %c0_19, %c0_20] : memref<2x8x128xf32, #tpu.memory_space<vmem>>, vector<1x8x128xf32>
    %23 = vector.shape_cast %22 : vector<1x8x128xf32> to vector<8x128xf32>
    %c0_21 = arith.constant 0 : index
    %c0_22 = arith.constant 0 : index
    %24 = vector.load %arg13[%c0_21, %c0_22] : memref<64x512xf32, #tpu.memory_space<vmem>>, vector<8x512xf32>
    %25 = arith.truncf %21 : vector<8x128xf32> to vector<8x128xbf16>
    %cst_23 = arith.constant dense<0.000000e+00> : vector<8x512xf32>
    %26 = tpu.matmul %25, %10, %cst_23 {dimension_numbers = #tpu.dot_dimension_numbers<[1], [0], [0], [1], [0, 0, 1, 1], [], []>} : vector<8x128xbf16>, vector<128x512xbf16>, vector<8x512xf32> -> vector<8x512xf32>
    %27 = arith.addf %24, %26 : vector<8x512xf32>
    %28 = vector.extract_strided_slice %27 {offsets = [0, 0], sizes = [8, 384], strides = [1, 1]} : vector<8x512xf32> to vector<8x384xf32>
    %cst_24 = arith.constant 5.000000e-01 : f32
    %29 = vector.broadcast %cst_24 : f32 to vector<8x384xf32>
    %30 = arith.mulf %29, %28 : vector<8x384xf32>
    %31 = math.tanh %30 : vector<8x384xf32>
    %cst_25 = arith.constant 5.000000e-01 : f32
    %32 = vector.broadcast %cst_25 : f32 to vector<8x384xf32>
    %33 = arith.mulf %32, %31 : vector<8x384xf32>
    %cst_26 = arith.constant 5.000000e-01 : f32
    %34 = vector.broadcast %cst_26 : f32 to vector<8x384xf32>
    %35 = arith.addf %33, %34 : vector<8x384xf32>
    %36 = vector.extract_strided_slice %35 {offsets = [0, 0], sizes = [8, 128], strides = [1, 1]} : vector<8x384xf32> to vector<8x128xf32>
    %37 = vector.extract_strided_slice %35 {offsets = [0, 128], sizes = [8, 128], strides = [1, 1]} : vector<8x384xf32> to vector<8x128xf32>
    %38 = vector.extract_strided_slice %35 {offsets = [0, 256], sizes = [8, 128], strides = [1, 1]} : vector<8x384xf32> to vector<8x128xf32>
    %39 = vector.extract_strided_slice %27 {offsets = [0, 384], sizes = [8, 128], strides = [1, 1]} : vector<8x512xf32> to vector<8x128xf32>
    %40 = math.tanh %39 : vector<8x128xf32>
    %41 = arith.mulf %37, %23 : vector<8x128xf32>
    %42 = arith.mulf %36, %40 : vector<8x128xf32>
    %43 = arith.addf %41, %42 : vector<8x128xf32>
    %44 = math.tanh %43 : vector<8x128xf32>
    %45 = arith.mulf %38, %44 : vector<8x128xf32>
    %c0_27 = arith.constant 0 : index
    %c0_28 = arith.constant 0 : index
    %46 = vector.load %arg12[%c0_27, %c0_28] : memref<64x128xf32, #tpu.memory_space<vmem>>, vector<8x128xf32>
    tpu.vector_store %arg12[%c0_27, %c0_28], %45 {strides = array<i32>} : memref<64x128xf32, #tpu.memory_space<vmem>>, vector<8x128xf32>,
    %c8 = arith.constant 8 : index
    %c0_29 = arith.constant 0 : index
    %47 = vector.load %arg13[%c8, %c0_29] : memref<64x512xf32, #tpu.memory_space<vmem>>, vector<8x512xf32>
    %48 = arith.truncf %45 : vector<8x128xf32> to vector<8x128xbf16>
    %cst_30 = arith.constant dense<0.000000e+00> : vector<8x512xf32>
    %49 = tpu.matmul %48, %10, %cst_30 {dimension_numbers = #tpu.dot_dimension_numbers<[1], [0], [0], [1], [0, 0, 1, 1], [], []>} : vector<8x128xbf16>, vector<128x512xbf16>, vector<8x512xf32> -> vector<8x512xf32>
    %50 = arith.addf %47, %49 : vector<8x512xf32>
    %51 = vector.extract_strided_slice %50 {offsets = [0, 0], sizes = [8, 384], strides = [1, 1]} : vector<8x512xf32> to vector<8x384xf32>
    %cst_31 = arith.constant 5.000000e-01 : f32
    %52 = vector.broadcast %cst_31 : f32 to vector<8x384xf32>
    %53 = arith.mulf %52, %51 : vector<8x384xf32>
    %54 = math.tanh %53 : vector<8x384xf32>
    %cst_32 = arith.constant 5.000000e-01 : f32
    %55 = vector.broadcast %cst_32 : f32 to vector<8x384xf32>
    %56 = arith.mulf %55, %54 : vector<8x384xf32>
    %cst_33 = arith.constant 5.000000e-01 : f32
    %57 = vector.broadcast %cst_33 : f32 to vector<8x384xf32>
    %58 = arith.addf %56, %57 : vector<8x384xf32>
    %59 = vector.extract_strided_slice %58 {offsets = [0, 0], sizes = [8, 128], strides = [1, 1]} : vector<8x384xf32> to vector<8x128xf32>
    %60 = vector.extract_strided_slice %58 {offsets = [0, 128], sizes = [8, 128], strides = [1, 1]} : vector<8x384xf32> to vector<8x128xf32>
    %61 = vector.extract_strided_slice %58 {offsets = [0, 256], sizes = [8, 128], strides = [1, 1]} : vector<8x384xf32> to vector<8x128xf32>
    %62 = vector.extract_strided_slice %50 {offsets = [0, 384], sizes = [8, 128], strides = [1, 1]} : vector<8x512xf32> to vector<8x128xf32>
    %63 = math.tanh %62 : vector<8x128xf32>
    %64 = arith.mulf %60, %43 : vector<8x128xf32>
    %65 = arith.mulf %59, %63 : vector<8x128xf32>
    %66 = arith.addf %64, %65 : vector<8x128xf32>
    %67 = math.tanh %66 : vector<8x128xf32>
    %68 = arith.mulf %61, %67 : vector<8x128xf32>
    %c8_34 = arith.constant 8 : index
    %c0_35 = arith.constant 0 : index
    %69 = vector.load %arg12[%c8_34, %c0_35] : memref<64x128xf32, #tpu.memory_space<vmem>>, vector<8x128xf32>
    tpu.vector_store %arg12[%c8_34, %c0_35], %68 {strides = array<i32>} : memref<64x128xf32, #tpu.memory_space<vmem>>, vector<8x128xf32>,
    %c16 = arith.constant 16 : index
    %c0_36 = arith.constant 0 : index
    %70 = vector.load %arg13[%c16, %c0_36] : memref<64x512xf32, #tpu.memory_space<vmem>>, vector<8x512xf32>
    %71 = arith.truncf %68 : vector<8x128xf32> to vector<8x128xbf16>
    %cst_37 = arith.constant dense<0.000000e+00> : vector<8x512xf32>
    %72 = tpu.matmul %71, %10, %cst_37 {dimension_numbers = #tpu.dot_dimension_numbers<[1], [0], [0], [1], [0, 0, 1, 1], [], []>} : vector<8x128xbf16>, vector<128x512xbf16>, vector<8x512xf32> -> vector<8x512xf32>
    %73 = arith.addf %70, %72 : vector<8x512xf32>
    %74 = vector.extract_strided_slice %73 {offsets = [0, 0], sizes = [8, 384], strides = [1, 1]} : vector<8x512xf32> to vector<8x384xf32>
    %cst_38 = arith.constant 5.000000e-01 : f32
    %75 = vector.broadcast %cst_38 : f32 to vector<8x384xf32>
    %76 = arith.mulf %75, %74 : vector<8x384xf32>
    %77 = math.tanh %76 : vector<8x384xf32>
    %cst_39 = arith.constant 5.000000e-01 : f32
    %78 = vector.broadcast %cst_39 : f32 to vector<8x384xf32>
    %79 = arith.mulf %78, %77 : vector<8x384xf32>
    %cst_40 = arith.constant 5.000000e-01 : f32
    %80 = vector.broadcast %cst_40 : f32 to vector<8x384xf32>
    %81 = arith.addf %79, %80 : vector<8x384xf32>
    %82 = vector.extract_strided_slice %81 {offsets = [0, 0], sizes = [8, 128], strides = [1, 1]} : vector<8x384xf32> to vector<8x128xf32>
    %83 = vector.extract_strided_slice %81 {offsets = [0, 128], sizes = [8, 128], strides = [1, 1]} : vector<8x384xf32> to vector<8x128xf32>
    %84 = vector.extract_strided_slice %81 {offsets = [0, 256], sizes = [8, 128], strides = [1, 1]} : vector<8x384xf32> to vector<8x128xf32>
    %85 = vector.extract_strided_slice %73 {offsets = [0, 384], sizes = [8, 128], strides = [1, 1]} : vector<8x512xf32> to vector<8x128xf32>
    %86 = math.tanh %85 : vector<8x128xf32>
    %87 = arith.mulf %83, %66 : vector<8x128xf32>
    %88 = arith.mulf %82, %86 : vector<8x128xf32>
    %89 = arith.addf %87, %88 : vector<8x128xf32>
    %90 = math.tanh %89 : vector<8x128xf32>
    %91 = arith.mulf %84, %90 : vector<8x128xf32>
    %c16_41 = arith.constant 16 : index
    %c0_42 = arith.constant 0 : index
    %92 = vector.load %arg12[%c16_41, %c0_42] : memref<64x128xf32, #tpu.memory_space<vmem>>, vector<8x128xf32>
    tpu.vector_store %arg12[%c16_41, %c0_42], %91 {strides = array<i32>} : memref<64x128xf32, #tpu.memory_space<vmem>>, vector<8x128xf32>,
    %c24 = arith.constant 24 : index
    %c0_43 = arith.constant 0 : index
    %93 = vector.load %arg13[%c24, %c0_43] : memref<64x512xf32, #tpu.memory_space<vmem>>, vector<8x512xf32>
    %94 = arith.truncf %91 : vector<8x128xf32> to vector<8x128xbf16>
    %cst_44 = arith.constant dense<0.000000e+00> : vector<8x512xf32>
    %95 = tpu.matmul %94, %10, %cst_44 {dimension_numbers = #tpu.dot_dimension_numbers<[1], [0], [0], [1], [0, 0, 1, 1], [], []>} : vector<8x128xbf16>, vector<128x512xbf16>, vector<8x512xf32> -> vector<8x512xf32>
    %96 = arith.addf %93, %95 : vector<8x512xf32>
    %97 = vector.extract_strided_slice %96 {offsets = [0, 0], sizes = [8, 384], strides = [1, 1]} : vector<8x512xf32> to vector<8x384xf32>
    %cst_45 = arith.constant 5.000000e-01 : f32
    %98 = vector.broadcast %cst_45 : f32 to vector<8x384xf32>
    %99 = arith.mulf %98, %97 : vector<8x384xf32>
    %100 = math.tanh %99 : vector<8x384xf32>
    %cst_46 = arith.constant 5.000000e-01 : f32
    %101 = vector.broadcast %cst_46 : f32 to vector<8x384xf32>
    %102 = arith.mulf %101, %100 : vector<8x384xf32>
    %cst_47 = arith.constant 5.000000e-01 : f32
    %103 = vector.broadcast %cst_47 : f32 to vector<8x384xf32>
    %104 = arith.addf %102, %103 : vector<8x384xf32>
    %105 = vector.extract_strided_slice %104 {offsets = [0, 0], sizes = [8, 128], strides = [1, 1]} : vector<8x384xf32> to vector<8x128xf32>
    %106 = vector.extract_strided_slice %104 {offsets = [0, 128], sizes = [8, 128], strides = [1, 1]} : vector<8x384xf32> to vector<8x128xf32>
    %107 = vector.extract_strided_slice %104 {offsets = [0, 256], sizes = [8, 128], strides = [1, 1]} : vector<8x384xf32> to vector<8x128xf32>
    %108 = vector.extract_strided_slice %96 {offsets = [0, 384], sizes = [8, 128], strides = [1, 1]} : vector<8x512xf32> to vector<8x128xf32>
    %109 = math.tanh %108 : vector<8x128xf32>
    %110 = arith.mulf %106, %89 : vector<8x128xf32>
    %111 = arith.mulf %105, %109 : vector<8x128xf32>
    %112 = arith.addf %110, %111 : vector<8x128xf32>
    %113 = math.tanh %112 : vector<8x128xf32>
    %114 = arith.mulf %107, %113 : vector<8x128xf32>
    %c24_48 = arith.constant 24 : index
    %c0_49 = arith.constant 0 : index
    %115 = vector.load %arg12[%c24_48, %c0_49] : memref<64x128xf32, #tpu.memory_space<vmem>>, vector<8x128xf32>
    tpu.vector_store %arg12[%c24_48, %c0_49], %114 {strides = array<i32>} : memref<64x128xf32, #tpu.memory_space<vmem>>, vector<8x128xf32>,
    %c32 = arith.constant 32 : index
    %c0_50 = arith.constant 0 : index
    %116 = vector.load %arg13[%c32, %c0_50] : memref<64x512xf32, #tpu.memory_space<vmem>>, vector<8x512xf32>
    %117 = arith.truncf %114 : vector<8x128xf32> to vector<8x128xbf16>
    %cst_51 = arith.constant dense<0.000000e+00> : vector<8x512xf32>
    %118 = tpu.matmul %117, %10, %cst_51 {dimension_numbers = #tpu.dot_dimension_numbers<[1], [0], [0], [1], [0, 0, 1, 1], [], []>} : vector<8x128xbf16>, vector<128x512xbf16>, vector<8x512xf32> -> vector<8x512xf32>
    %119 = arith.addf %116, %118 : vector<8x512xf32>
    %120 = vector.extract_strided_slice %119 {offsets = [0, 0], sizes = [8, 384], strides = [1, 1]} : vector<8x512xf32> to vector<8x384xf32>
    %cst_52 = arith.constant 5.000000e-01 : f32
    %121 = vector.broadcast %cst_52 : f32 to vector<8x384xf32>
    %122 = arith.mulf %121, %120 : vector<8x384xf32>
    %123 = math.tanh %122 : vector<8x384xf32>
    %cst_53 = arith.constant 5.000000e-01 : f32
    %124 = vector.broadcast %cst_53 : f32 to vector<8x384xf32>
    %125 = arith.mulf %124, %123 : vector<8x384xf32>
    %cst_54 = arith.constant 5.000000e-01 : f32
    %126 = vector.broadcast %cst_54 : f32 to vector<8x384xf32>
    %127 = arith.addf %125, %126 : vector<8x384xf32>
    %128 = vector.extract_strided_slice %127 {offsets = [0, 0], sizes = [8, 128], strides = [1, 1]} : vector<8x384xf32> to vector<8x128xf32>
    %129 = vector.extract_strided_slice %127 {offsets = [0, 128], sizes = [8, 128], strides = [1, 1]} : vector<8x384xf32> to vector<8x128xf32>
    %130 = vector.extract_strided_slice %127 {offsets = [0, 256], sizes = [8, 128], strides = [1, 1]} : vector<8x384xf32> to vector<8x128xf32>
    %131 = vector.extract_strided_slice %119 {offsets = [0, 384], sizes = [8, 128], strides = [1, 1]} : vector<8x512xf32> to vector<8x128xf32>
    %132 = math.tanh %131 : vector<8x128xf32>
    %133 = arith.mulf %129, %112 : vector<8x128xf32>
    %134 = arith.mulf %128, %132 : vector<8x128xf32>
    %135 = arith.addf %133, %134 : vector<8x128xf32>
    %136 = math.tanh %135 : vector<8x128xf32>
    %137 = arith.mulf %130, %136 : vector<8x128xf32>
    %c32_55 = arith.constant 32 : index
    %c0_56 = arith.constant 0 : index
    %138 = vector.load %arg12[%c32_55, %c0_56] : memref<64x128xf32, #tpu.memory_space<vmem>>, vector<8x128xf32>
    tpu.vector_store %arg12[%c32_55, %c0_56], %137 {strides = array<i32>} : memref<64x128xf32, #tpu.memory_space<vmem>>, vector<8x128xf32>,
    %c40 = arith.constant 40 : index
    %c0_57 = arith.constant 0 : index
    %139 = vector.load %arg13[%c40, %c0_57] : memref<64x512xf32, #tpu.memory_space<vmem>>, vector<8x512xf32>
    %140 = arith.truncf %137 : vector<8x128xf32> to vector<8x128xbf16>
    %cst_58 = arith.constant dense<0.000000e+00> : vector<8x512xf32>
    %141 = tpu.matmul %140, %10, %cst_58 {dimension_numbers = #tpu.dot_dimension_numbers<[1], [0], [0], [1], [0, 0, 1, 1], [], []>} : vector<8x128xbf16>, vector<128x512xbf16>, vector<8x512xf32> -> vector<8x512xf32>
    %142 = arith.addf %139, %141 : vector<8x512xf32>
    %143 = vector.extract_strided_slice %142 {offsets = [0, 0], sizes = [8, 384], strides = [1, 1]} : vector<8x512xf32> to vector<8x384xf32>
    %cst_59 = arith.constant 5.000000e-01 : f32
    %144 = vector.broadcast %cst_59 : f32 to vector<8x384xf32>
    %145 = arith.mulf %144, %143 : vector<8x384xf32>
    %146 = math.tanh %145 : vector<8x384xf32>
    %cst_60 = arith.constant 5.000000e-01 : f32
    %147 = vector.broadcast %cst_60 : f32 to vector<8x384xf32>
    %148 = arith.mulf %147, %146 : vector<8x384xf32>
    %cst_61 = arith.constant 5.000000e-01 : f32
    %149 = vector.broadcast %cst_61 : f32 to vector<8x384xf32>
    %150 = arith.addf %148, %149 : vector<8x384xf32>
    %151 = vector.extract_strided_slice %150 {offsets = [0, 0], sizes = [8, 128], strides = [1, 1]} : vector<8x384xf32> to vector<8x128xf32>
    %152 = vector.extract_strided_slice %150 {offsets = [0, 128], sizes = [8, 128], strides = [1, 1]} : vector<8x384xf32> to vector<8x128xf32>
    %153 = vector.extract_strided_slice %150 {offsets = [0, 256], sizes = [8, 128], strides = [1, 1]} : vector<8x384xf32> to vector<8x128xf32>
    %154 = vector.extract_strided_slice %142 {offsets = [0, 384], sizes = [8, 128], strides = [1, 1]} : vector<8x512xf32> to vector<8x128xf32>
    %155 = math.tanh %154 : vector<8x128xf32>
    %156 = arith.mulf %152, %135 : vector<8x128xf32>
    %157 = arith.mulf %151, %155 : vector<8x128xf32>
    %158 = arith.addf %156, %157 : vector<8x128xf32>
    %159 = math.tanh %158 : vector<8x128xf32>
    %160 = arith.mulf %153, %159 : vector<8x128xf32>
    %c40_62 = arith.constant 40 : index
    %c0_63 = arith.constant 0 : index
    %161 = vector.load %arg12[%c40_62, %c0_63] : memref<64x128xf32, #tpu.memory_space<vmem>>, vector<8x128xf32>
    tpu.vector_store %arg12[%c40_62, %c0_63], %160 {strides = array<i32>} : memref<64x128xf32, #tpu.memory_space<vmem>>, vector<8x128xf32>,
    %c48 = arith.constant 48 : index
    %c0_64 = arith.constant 0 : index
    %162 = vector.load %arg13[%c48, %c0_64] : memref<64x512xf32, #tpu.memory_space<vmem>>, vector<8x512xf32>
    %163 = arith.truncf %160 : vector<8x128xf32> to vector<8x128xbf16>
    %cst_65 = arith.constant dense<0.000000e+00> : vector<8x512xf32>
    %164 = tpu.matmul %163, %10, %cst_65 {dimension_numbers = #tpu.dot_dimension_numbers<[1], [0], [0], [1], [0, 0, 1, 1], [], []>} : vector<8x128xbf16>, vector<128x512xbf16>, vector<8x512xf32> -> vector<8x512xf32>
    %165 = arith.addf %162, %164 : vector<8x512xf32>
    %166 = vector.extract_strided_slice %165 {offsets = [0, 0], sizes = [8, 384], strides = [1, 1]} : vector<8x512xf32> to vector<8x384xf32>
    %cst_66 = arith.constant 5.000000e-01 : f32
    %167 = vector.broadcast %cst_66 : f32 to vector<8x384xf32>
    %168 = arith.mulf %167, %166 : vector<8x384xf32>
    %169 = math.tanh %168 : vector<8x384xf32>
    %cst_67 = arith.constant 5.000000e-01 : f32
    %170 = vector.broadcast %cst_67 : f32 to vector<8x384xf32>
    %171 = arith.mulf %170, %169 : vector<8x384xf32>
    %cst_68 = arith.constant 5.000000e-01 : f32
    %172 = vector.broadcast %cst_68 : f32 to vector<8x384xf32>
    %173 = arith.addf %171, %172 : vector<8x384xf32>
    %174 = vector.extract_strided_slice %173 {offsets = [0, 0], sizes = [8, 128], strides = [1, 1]} : vector<8x384xf32> to vector<8x128xf32>
    %175 = vector.extract_strided_slice %173 {offsets = [0, 128], sizes = [8, 128], strides = [1, 1]} : vector<8x384xf32> to vector<8x128xf32>
    %176 = vector.extract_strided_slice %173 {offsets = [0, 256], sizes = [8, 128], strides = [1, 1]} : vector<8x384xf32> to vector<8x128xf32>
    %177 = vector.extract_strided_slice %165 {offsets = [0, 384], sizes = [8, 128], strides = [1, 1]} : vector<8x512xf32> to vector<8x128xf32>
    %178 = math.tanh %177 : vector<8x128xf32>
    %179 = arith.mulf %175, %158 : vector<8x128xf32>
    %180 = arith.mulf %174, %178 : vector<8x128xf32>
    %181 = arith.addf %179, %180 : vector<8x128xf32>
    %182 = math.tanh %181 : vector<8x128xf32>
    %183 = arith.mulf %176, %182 : vector<8x128xf32>
    %c48_69 = arith.constant 48 : index
    %c0_70 = arith.constant 0 : index
    %184 = vector.load %arg12[%c48_69, %c0_70] : memref<64x128xf32, #tpu.memory_space<vmem>>, vector<8x128xf32>
    tpu.vector_store %arg12[%c48_69, %c0_70], %183 {strides = array<i32>} : memref<64x128xf32, #tpu.memory_space<vmem>>, vector<8x128xf32>,
    %c56 = arith.constant 56 : index
    %c0_71 = arith.constant 0 : index
    %185 = vector.load %arg13[%c56, %c0_71] : memref<64x512xf32, #tpu.memory_space<vmem>>, vector<8x512xf32>
    %186 = arith.truncf %183 : vector<8x128xf32> to vector<8x128xbf16>
    %cst_72 = arith.constant dense<0.000000e+00> : vector<8x512xf32>
    %187 = tpu.matmul %186, %10, %cst_72 {dimension_numbers = #tpu.dot_dimension_numbers<[1], [0], [0], [1], [0, 0, 1, 1], [], []>} : vector<8x128xbf16>, vector<128x512xbf16>, vector<8x512xf32> -> vector<8x512xf32>
    %188 = arith.addf %185, %187 : vector<8x512xf32>
    %189 = vector.extract_strided_slice %188 {offsets = [0, 0], sizes = [8, 384], strides = [1, 1]} : vector<8x512xf32> to vector<8x384xf32>
    %cst_73 = arith.constant 5.000000e-01 : f32
    %190 = vector.broadcast %cst_73 : f32 to vector<8x384xf32>
    %191 = arith.mulf %190, %189 : vector<8x384xf32>
    %192 = math.tanh %191 : vector<8x384xf32>
    %cst_74 = arith.constant 5.000000e-01 : f32
    %193 = vector.broadcast %cst_74 : f32 to vector<8x384xf32>
    %194 = arith.mulf %193, %192 : vector<8x384xf32>
    %cst_75 = arith.constant 5.000000e-01 : f32
    %195 = vector.broadcast %cst_75 : f32 to vector<8x384xf32>
    %196 = arith.addf %194, %195 : vector<8x384xf32>
    %197 = vector.extract_strided_slice %196 {offsets = [0, 0], sizes = [8, 128], strides = [1, 1]} : vector<8x384xf32> to vector<8x128xf32>
    %198 = vector.extract_strided_slice %196 {offsets = [0, 128], sizes = [8, 128], strides = [1, 1]} : vector<8x384xf32> to vector<8x128xf32>
    %199 = vector.extract_strided_slice %196 {offsets = [0, 256], sizes = [8, 128], strides = [1, 1]} : vector<8x384xf32> to vector<8x128xf32>
    %200 = vector.extract_strided_slice %188 {offsets = [0, 384], sizes = [8, 128], strides = [1, 1]} : vector<8x512xf32> to vector<8x128xf32>
    %201 = math.tanh %200 : vector<8x128xf32>
    %202 = arith.mulf %198, %181 : vector<8x128xf32>
    %203 = arith.mulf %197, %201 : vector<8x128xf32>
    %204 = arith.addf %202, %203 : vector<8x128xf32>
    %205 = math.tanh %204 : vector<8x128xf32>
    %206 = arith.mulf %199, %205 : vector<8x128xf32>
    %c56_76 = arith.constant 56 : index
    %c0_77 = arith.constant 0 : index
    %207 = vector.load %arg12[%c56_76, %c0_77] : memref<64x128xf32, #tpu.memory_space<vmem>>, vector<8x128xf32>
    tpu.vector_store %arg12[%c56_76, %c0_77], %206 {strides = array<i32>} : memref<64x128xf32, #tpu.memory_space<vmem>>, vector<8x128xf32>,
    %c0_78 = arith.constant 0 : index
    %c0_79 = arith.constant 0 : index
    %c0_80 = arith.constant 0 : index
    %208 = vector.load %arg10[%c0_78, %c0_79, %c0_80] : memref<2x8x128xf32, #tpu.memory_space<vmem>>, vector<1x8x128xf32>
    %209 = vector.shape_cast %208 : vector<1x8x128xf32> to vector<8x128xf32>
    %210 = vector.shape_cast %206 : vector<8x128xf32> to vector<1x8x128xf32>
    tpu.vector_store %arg10[%c0_78, %c0_79, %c0_80], %210 {strides = array<i32>} : memref<2x8x128xf32, #tpu.memory_space<vmem>>, vector<1x8x128xf32>,
    %c0_81 = arith.constant 0 : index
    %c0_82 = arith.constant 0 : index
    %c0_83 = arith.constant 0 : index
    %211 = vector.load %arg11[%c0_81, %c0_82, %c0_83] : memref<2x8x128xf32, #tpu.memory_space<vmem>>, vector<1x8x128xf32>
    %212 = vector.shape_cast %211 : vector<1x8x128xf32> to vector<8x128xf32>
    %213 = vector.shape_cast %204 : vector<8x128xf32> to vector<1x8x128xf32>
    tpu.vector_store %arg11[%c0_81, %c0_82, %c0_83], %213 {strides = array<i32>} : memref<2x8x128xf32, #tpu.memory_space<vmem>>, vector<1x8x128xf32>,
    %c0_84 = arith.constant 0 : index
    %c0_85 = arith.constant 0 : index
    %214 = vector.load %arg12[%c0_84, %c0_85] : memref<64x128xf32, #tpu.memory_space<vmem>>, vector<64x128xf32>
    %c1 = arith.constant 1 : index
    %c0_86 = arith.constant 0 : index
    %c0_87 = arith.constant 0 : index
    %215 = vector.load %arg5[%c1, %c0_86, %c0_87] : memref<2x128x512xbf16, #tpu.memory_space<vmem>>, vector<1x128x512xbf16>
    %216 = vector.shape_cast %215 : vector<1x128x512xbf16> to vector<128x512xbf16>
    %217 = arith.truncf %214 : vector<64x128xf32> to vector<64x128xbf16>
    %c1_88 = arith.constant 1 : index
    %c0_89 = arith.constant 0 : index
    %c0_90 = arith.constant 0 : index
    %218 = vector.load %arg4[%c1_88, %c0_89, %c0_90] : memref<2x128x512xbf16, #tpu.memory_space<vmem>>, vector<1x128x512xbf16>
    %219 = vector.shape_cast %218 : vector<1x128x512xbf16> to vector<128x512xbf16>
    %cst_91 = arith.constant dense<0.000000e+00> : vector<64x512xf32>
    %220 = tpu.matmul %217, %219, %cst_91 {dimension_numbers = #tpu.dot_dimension_numbers<[1], [0], [0], [1], [0, 0, 1, 1], [], []>} : vector<64x128xbf16>, vector<128x512xbf16>, vector<64x512xf32> -> vector<64x512xf32>
    %c1_92 = arith.constant 1 : index
    %c0_93 = arith.constant 0 : index
    %c0_94 = arith.constant 0 : index
    %221 = vector.load %arg6[%c1_92, %c0_93, %c0_94] : memref<2x1x512xf32, #tpu.memory_space<vmem>>, vector<1x1x512xf32>
    %222 = vector.shape_cast %221 : vector<1x1x512xf32> to vector<1x512xf32>
    %223 = vector.broadcast %222 : vector<1x512xf32> to vector<64x512xf32>
    %224 = arith.addf %220, %223 : vector<64x512xf32>
    %c0_95 = arith.constant 0 : index
    %c0_96 = arith.constant 0 : index
    %225 = vector.load %arg13[%c0_95, %c0_96] : memref<64x512xf32, #tpu.memory_space<vmem>>, vector<64x512xf32>
    tpu.vector_store %arg13[%c0_95, %c0_96], %224 {strides = array<i32>} : memref<64x512xf32, #tpu.memory_space<vmem>>, vector<64x512xf32>,
    %c1_97 = arith.constant 1 : index
    %c0_98 = arith.constant 0 : index
    %c0_99 = arith.constant 0 : index
    %226 = vector.load %arg2[%c1_97, %c0_98, %c0_99] : memref<2x8x128xf32, #tpu.memory_space<vmem>>, vector<1x8x128xf32>
    %227 = vector.shape_cast %226 : vector<1x8x128xf32> to vector<8x128xf32>
    %c1_100 = arith.constant 1 : index
    %c0_101 = arith.constant 0 : index
    %c0_102 = arith.constant 0 : index
    %228 = vector.load %arg3[%c1_100, %c0_101, %c0_102] : memref<2x8x128xf32, #tpu.memory_space<vmem>>, vector<1x8x128xf32>
    %229 = vector.shape_cast %228 : vector<1x8x128xf32> to vector<8x128xf32>
    %c0_103 = arith.constant 0 : index
    %c0_104 = arith.constant 0 : index
    %230 = vector.load %arg13[%c0_103, %c0_104] : memref<64x512xf32, #tpu.memory_space<vmem>>, vector<8x512xf32>
    %231 = arith.truncf %227 : vector<8x128xf32> to vector<8x128xbf16>
    %cst_105 = arith.constant dense<0.000000e+00> : vector<8x512xf32>
    %232 = tpu.matmul %231, %216, %cst_105 {dimension_numbers = #tpu.dot_dimension_numbers<[1], [0], [0], [1], [0, 0, 1, 1], [], []>} : vector<8x128xbf16>, vector<128x512xbf16>, vector<8x512xf32> -> vector<8x512xf32>
    %233 = arith.addf %230, %232 : vector<8x512xf32>
    %234 = vector.extract_strided_slice %233 {offsets = [0, 0], sizes = [8, 384], strides = [1, 1]} : vector<8x512xf32> to vector<8x384xf32>
    %cst_106 = arith.constant 5.000000e-01 : f32
    %235 = vector.broadcast %cst_106 : f32 to vector<8x384xf32>
    %236 = arith.mulf %235, %234 : vector<8x384xf32>
    %237 = math.tanh %236 : vector<8x384xf32>
    %cst_107 = arith.constant 5.000000e-01 : f32
    %238 = vector.broadcast %cst_107 : f32 to vector<8x384xf32>
    %239 = arith.mulf %238, %237 : vector<8x384xf32>
    %cst_108 = arith.constant 5.000000e-01 : f32
    %240 = vector.broadcast %cst_108 : f32 to vector<8x384xf32>
    %241 = arith.addf %239, %240 : vector<8x384xf32>
    %242 = vector.extract_strided_slice %241 {offsets = [0, 0], sizes = [8, 128], strides = [1, 1]} : vector<8x384xf32> to vector<8x128xf32>
    %243 = vector.extract_strided_slice %241 {offsets = [0, 128], sizes = [8, 128], strides = [1, 1]} : vector<8x384xf32> to vector<8x128xf32>
    %244 = vector.extract_strided_slice %241 {offsets = [0, 256], sizes = [8, 128], strides = [1, 1]} : vector<8x384xf32> to vector<8x128xf32>
    %245 = vector.extract_strided_slice %233 {offsets = [0, 384], sizes = [8, 128], strides = [1, 1]} : vector<8x512xf32> to vector<8x128xf32>
    %246 = math.tanh %245 : vector<8x128xf32>
    %247 = arith.mulf %243, %229 : vector<8x128xf32>
    %248 = arith.mulf %242, %246 : vector<8x128xf32>
    %249 = arith.addf %247, %248 : vector<8x128xf32>
    %250 = math.tanh %249 : vector<8x128xf32>
    %251 = arith.mulf %244, %250 : vector<8x128xf32>
    %c8_109 = arith.constant 8 : index
    %c0_110 = arith.constant 0 : index
    %252 = vector.load %arg13[%c8_109, %c0_110] : memref<64x512xf32, #tpu.memory_space<vmem>>, vector<8x512xf32>
    %253 = arith.truncf %251 : vector<8x128xf32> to vector<8x128xbf16>
    %cst_111 = arith.constant dense<0.000000e+00> : vector<8x512xf32>
    %254 = tpu.matmul %253, %216, %cst_111 {dimension_numbers = #tpu.dot_dimension_numbers<[1], [0], [0], [1], [0, 0, 1, 1], [], []>} : vector<8x128xbf16>, vector<128x512xbf16>, vector<8x512xf32> -> vector<8x512xf32>
    %255 = arith.addf %252, %254 : vector<8x512xf32>
    %256 = vector.extract_strided_slice %255 {offsets = [0, 0], sizes = [8, 384], strides = [1, 1]} : vector<8x512xf32> to vector<8x384xf32>
    %cst_112 = arith.constant 5.000000e-01 : f32
    %257 = vector.broadcast %cst_112 : f32 to vector<8x384xf32>
    %258 = arith.mulf %257, %256 : vector<8x384xf32>
    %259 = math.tanh %258 : vector<8x384xf32>
    %cst_113 = arith.constant 5.000000e-01 : f32
    %260 = vector.broadcast %cst_113 : f32 to vector<8x384xf32>
    %261 = arith.mulf %260, %259 : vector<8x384xf32>
    %cst_114 = arith.constant 5.000000e-01 : f32
    %262 = vector.broadcast %cst_114 : f32 to vector<8x384xf32>
    %263 = arith.addf %261, %262 : vector<8x384xf32>
    %264 = vector.extract_strided_slice %263 {offsets = [0, 0], sizes = [8, 128], strides = [1, 1]} : vector<8x384xf32> to vector<8x128xf32>
    %265 = vector.extract_strided_slice %263 {offsets = [0, 128], sizes = [8, 128], strides = [1, 1]} : vector<8x384xf32> to vector<8x128xf32>
    %266 = vector.extract_strided_slice %263 {offsets = [0, 256], sizes = [8, 128], strides = [1, 1]} : vector<8x384xf32> to vector<8x128xf32>
    %267 = vector.extract_strided_slice %255 {offsets = [0, 384], sizes = [8, 128], strides = [1, 1]} : vector<8x512xf32> to vector<8x128xf32>
    %268 = math.tanh %267 : vector<8x128xf32>
    %269 = arith.mulf %265, %249 : vector<8x128xf32>
    %270 = arith.mulf %264, %268 : vector<8x128xf32>
    %271 = arith.addf %269, %270 : vector<8x128xf32>
    %272 = math.tanh %271 : vector<8x128xf32>
    %273 = arith.mulf %266, %272 : vector<8x128xf32>
    %c16_115 = arith.constant 16 : index
    %c0_116 = arith.constant 0 : index
    %274 = vector.load %arg13[%c16_115, %c0_116] : memref<64x512xf32, #tpu.memory_space<vmem>>, vector<8x512xf32>
    %275 = arith.truncf %273 : vector<8x128xf32> to vector<8x128xbf16>
    %cst_117 = arith.constant dense<0.000000e+00> : vector<8x512xf32>
    %276 = tpu.matmul %275, %216, %cst_117 {dimension_numbers = #tpu.dot_dimension_numbers<[1], [0], [0], [1], [0, 0, 1, 1], [], []>} : vector<8x128xbf16>, vector<128x512xbf16>, vector<8x512xf32> -> vector<8x512xf32>
    %277 = arith.addf %274, %276 : vector<8x512xf32>
    %278 = vector.extract_strided_slice %277 {offsets = [0, 0], sizes = [8, 384], strides = [1, 1]} : vector<8x512xf32> to vector<8x384xf32>
    %cst_118 = arith.constant 5.000000e-01 : f32
    %279 = vector.broadcast %cst_118 : f32 to vector<8x384xf32>
    %280 = arith.mulf %279, %278 : vector<8x384xf32>
    %281 = math.tanh %280 : vector<8x384xf32>
    %cst_119 = arith.constant 5.000000e-01 : f32
    %282 = vector.broadcast %cst_119 : f32 to vector<8x384xf32>
    %283 = arith.mulf %282, %281 : vector<8x384xf32>
    %cst_120 = arith.constant 5.000000e-01 : f32
    %284 = vector.broadcast %cst_120 : f32 to vector<8x384xf32>
    %285 = arith.addf %283, %284 : vector<8x384xf32>
    %286 = vector.extract_strided_slice %285 {offsets = [0, 0], sizes = [8, 128], strides = [1, 1]} : vector<8x384xf32> to vector<8x128xf32>
    %287 = vector.extract_strided_slice %285 {offsets = [0, 128], sizes = [8, 128], strides = [1, 1]} : vector<8x384xf32> to vector<8x128xf32>
    %288 = vector.extract_strided_slice %285 {offsets = [0, 256], sizes = [8, 128], strides = [1, 1]} : vector<8x384xf32> to vector<8x128xf32>
    %289 = vector.extract_strided_slice %277 {offsets = [0, 384], sizes = [8, 128], strides = [1, 1]} : vector<8x512xf32> to vector<8x128xf32>
    %290 = math.tanh %289 : vector<8x128xf32>
    %291 = arith.mulf %287, %271 : vector<8x128xf32>
    %292 = arith.mulf %286, %290 : vector<8x128xf32>
    %293 = arith.addf %291, %292 : vector<8x128xf32>
    %294 = math.tanh %293 : vector<8x128xf32>
    %295 = arith.mulf %288, %294 : vector<8x128xf32>
    %c24_121 = arith.constant 24 : index
    %c0_122 = arith.constant 0 : index
    %296 = vector.load %arg13[%c24_121, %c0_122] : memref<64x512xf32, #tpu.memory_space<vmem>>, vector<8x512xf32>
    %297 = arith.truncf %295 : vector<8x128xf32> to vector<8x128xbf16>
    %cst_123 = arith.constant dense<0.000000e+00> : vector<8x512xf32>
    %298 = tpu.matmul %297, %216, %cst_123 {dimension_numbers = #tpu.dot_dimension_numbers<[1], [0], [0], [1], [0, 0, 1, 1], [], []>} : vector<8x128xbf16>, vector<128x512xbf16>, vector<8x512xf32> -> vector<8x512xf32>
    %299 = arith.addf %296, %298 : vector<8x512xf32>
    %300 = vector.extract_strided_slice %299 {offsets = [0, 0], sizes = [8, 384], strides = [1, 1]} : vector<8x512xf32> to vector<8x384xf32>
    %cst_124 = arith.constant 5.000000e-01 : f32
    %301 = vector.broadcast %cst_124 : f32 to vector<8x384xf32>
    %302 = arith.mulf %301, %300 : vector<8x384xf32>
    %303 = math.tanh %302 : vector<8x384xf32>
    %cst_125 = arith.constant 5.000000e-01 : f32
    %304 = vector.broadcast %cst_125 : f32 to vector<8x384xf32>
    %305 = arith.mulf %304, %303 : vector<8x384xf32>
    %cst_126 = arith.constant 5.000000e-01 : f32
    %306 = vector.broadcast %cst_126 : f32 to vector<8x384xf32>
    %307 = arith.addf %305, %306 : vector<8x384xf32>
    %308 = vector.extract_strided_slice %307 {offsets = [0, 0], sizes = [8, 128], strides = [1, 1]} : vector<8x384xf32> to vector<8x128xf32>
    %309 = vector.extract_strided_slice %307 {offsets = [0, 128], sizes = [8, 128], strides = [1, 1]} : vector<8x384xf32> to vector<8x128xf32>
    %310 = vector.extract_strided_slice %307 {offsets = [0, 256], sizes = [8, 128], strides = [1, 1]} : vector<8x384xf32> to vector<8x128xf32>
    %311 = vector.extract_strided_slice %299 {offsets = [0, 384], sizes = [8, 128], strides = [1, 1]} : vector<8x512xf32> to vector<8x128xf32>
    %312 = math.tanh %311 : vector<8x128xf32>
    %313 = arith.mulf %309, %293 : vector<8x128xf32>
    %314 = arith.mulf %308, %312 : vector<8x128xf32>
    %315 = arith.addf %313, %314 : vector<8x128xf32>
    %316 = math.tanh %315 : vector<8x128xf32>
    %317 = arith.mulf %310, %316 : vector<8x128xf32>
    %c32_127 = arith.constant 32 : index
    %c0_128 = arith.constant 0 : index
    %318 = vector.load %arg13[%c32_127, %c0_128] : memref<64x512xf32, #tpu.memory_space<vmem>>, vector<8x512xf32>
    %319 = arith.truncf %317 : vector<8x128xf32> to vector<8x128xbf16>
    %cst_129 = arith.constant dense<0.000000e+00> : vector<8x512xf32>
    %320 = tpu.matmul %319, %216, %cst_129 {dimension_numbers = #tpu.dot_dimension_numbers<[1], [0], [0], [1], [0, 0, 1, 1], [], []>} : vector<8x128xbf16>, vector<128x512xbf16>, vector<8x512xf32> -> vector<8x512xf32>
    %321 = arith.addf %318, %320 : vector<8x512xf32>
    %322 = vector.extract_strided_slice %321 {offsets = [0, 0], sizes = [8, 384], strides = [1, 1]} : vector<8x512xf32> to vector<8x384xf32>
    %cst_130 = arith.constant 5.000000e-01 : f32
    %323 = vector.broadcast %cst_130 : f32 to vector<8x384xf32>
    %324 = arith.mulf %323, %322 : vector<8x384xf32>
    %325 = math.tanh %324 : vector<8x384xf32>
    %cst_131 = arith.constant 5.000000e-01 : f32
    %326 = vector.broadcast %cst_131 : f32 to vector<8x384xf32>
    %327 = arith.mulf %326, %325 : vector<8x384xf32>
    %cst_132 = arith.constant 5.000000e-01 : f32
    %328 = vector.broadcast %cst_132 : f32 to vector<8x384xf32>
    %329 = arith.addf %327, %328 : vector<8x384xf32>
    %330 = vector.extract_strided_slice %329 {offsets = [0, 0], sizes = [8, 128], strides = [1, 1]} : vector<8x384xf32> to vector<8x128xf32>
    %331 = vector.extract_strided_slice %329 {offsets = [0, 128], sizes = [8, 128], strides = [1, 1]} : vector<8x384xf32> to vector<8x128xf32>
    %332 = vector.extract_strided_slice %329 {offsets = [0, 256], sizes = [8, 128], strides = [1, 1]} : vector<8x384xf32> to vector<8x128xf32>
    %333 = vector.extract_strided_slice %321 {offsets = [0, 384], sizes = [8, 128], strides = [1, 1]} : vector<8x512xf32> to vector<8x128xf32>
    %334 = math.tanh %333 : vector<8x128xf32>
    %335 = arith.mulf %331, %315 : vector<8x128xf32>
    %336 = arith.mulf %330, %334 : vector<8x128xf32>
    %337 = arith.addf %335, %336 : vector<8x128xf32>
    %338 = math.tanh %337 : vector<8x128xf32>
    %339 = arith.mulf %332, %338 : vector<8x128xf32>
    %c40_133 = arith.constant 40 : index
    %c0_134 = arith.constant 0 : index
    %340 = vector.load %arg13[%c40_133, %c0_134] : memref<64x512xf32, #tpu.memory_space<vmem>>, vector<8x512xf32>
    %341 = arith.truncf %339 : vector<8x128xf32> to vector<8x128xbf16>
    %cst_135 = arith.constant dense<0.000000e+00> : vector<8x512xf32>
    %342 = tpu.matmul %341, %216, %cst_135 {dimension_numbers = #tpu.dot_dimension_numbers<[1], [0], [0], [1], [0, 0, 1, 1], [], []>} : vector<8x128xbf16>, vector<128x512xbf16>, vector<8x512xf32> -> vector<8x512xf32>
    %343 = arith.addf %340, %342 : vector<8x512xf32>
    %344 = vector.extract_strided_slice %343 {offsets = [0, 0], sizes = [8, 384], strides = [1, 1]} : vector<8x512xf32> to vector<8x384xf32>
    %cst_136 = arith.constant 5.000000e-01 : f32
    %345 = vector.broadcast %cst_136 : f32 to vector<8x384xf32>
    %346 = arith.mulf %345, %344 : vector<8x384xf32>
    %347 = math.tanh %346 : vector<8x384xf32>
    %cst_137 = arith.constant 5.000000e-01 : f32
    %348 = vector.broadcast %cst_137 : f32 to vector<8x384xf32>
    %349 = arith.mulf %348, %347 : vector<8x384xf32>
    %cst_138 = arith.constant 5.000000e-01 : f32
    %350 = vector.broadcast %cst_138 : f32 to vector<8x384xf32>
    %351 = arith.addf %349, %350 : vector<8x384xf32>
    %352 = vector.extract_strided_slice %351 {offsets = [0, 0], sizes = [8, 128], strides = [1, 1]} : vector<8x384xf32> to vector<8x128xf32>
    %353 = vector.extract_strided_slice %351 {offsets = [0, 128], sizes = [8, 128], strides = [1, 1]} : vector<8x384xf32> to vector<8x128xf32>
    %354 = vector.extract_strided_slice %351 {offsets = [0, 256], sizes = [8, 128], strides = [1, 1]} : vector<8x384xf32> to vector<8x128xf32>
    %355 = vector.extract_strided_slice %343 {offsets = [0, 384], sizes = [8, 128], strides = [1, 1]} : vector<8x512xf32> to vector<8x128xf32>
    %356 = math.tanh %355 : vector<8x128xf32>
    %357 = arith.mulf %353, %337 : vector<8x128xf32>
    %358 = arith.mulf %352, %356 : vector<8x128xf32>
    %359 = arith.addf %357, %358 : vector<8x128xf32>
    %360 = math.tanh %359 : vector<8x128xf32>
    %361 = arith.mulf %354, %360 : vector<8x128xf32>
    %c48_139 = arith.constant 48 : index
    %c0_140 = arith.constant 0 : index
    %362 = vector.load %arg13[%c48_139, %c0_140] : memref<64x512xf32, #tpu.memory_space<vmem>>, vector<8x512xf32>
    %363 = arith.truncf %361 : vector<8x128xf32> to vector<8x128xbf16>
    %cst_141 = arith.constant dense<0.000000e+00> : vector<8x512xf32>
    %364 = tpu.matmul %363, %216, %cst_141 {dimension_numbers = #tpu.dot_dimension_numbers<[1], [0], [0], [1], [0, 0, 1, 1], [], []>} : vector<8x128xbf16>, vector<128x512xbf16>, vector<8x512xf32> -> vector<8x512xf32>
    %365 = arith.addf %362, %364 : vector<8x512xf32>
    %366 = vector.extract_strided_slice %365 {offsets = [0, 0], sizes = [8, 384], strides = [1, 1]} : vector<8x512xf32> to vector<8x384xf32>
    %cst_142 = arith.constant 5.000000e-01 : f32
    %367 = vector.broadcast %cst_142 : f32 to vector<8x384xf32>
    %368 = arith.mulf %367, %366 : vector<8x384xf32>
    %369 = math.tanh %368 : vector<8x384xf32>
    %cst_143 = arith.constant 5.000000e-01 : f32
    %370 = vector.broadcast %cst_143 : f32 to vector<8x384xf32>
    %371 = arith.mulf %370, %369 : vector<8x384xf32>
    %cst_144 = arith.constant 5.000000e-01 : f32
    %372 = vector.broadcast %cst_144 : f32 to vector<8x384xf32>
    %373 = arith.addf %371, %372 : vector<8x384xf32>
    %374 = vector.extract_strided_slice %373 {offsets = [0, 0], sizes = [8, 128], strides = [1, 1]} : vector<8x384xf32> to vector<8x128xf32>
    %375 = vector.extract_strided_slice %373 {offsets = [0, 128], sizes = [8, 128], strides = [1, 1]} : vector<8x384xf32> to vector<8x128xf32>
    %376 = vector.extract_strided_slice %373 {offsets = [0, 256], sizes = [8, 128], strides = [1, 1]} : vector<8x384xf32> to vector<8x128xf32>
    %377 = vector.extract_strided_slice %365 {offsets = [0, 384], sizes = [8, 128], strides = [1, 1]} : vector<8x512xf32> to vector<8x128xf32>
    %378 = math.tanh %377 : vector<8x128xf32>
    %379 = arith.mulf %375, %359 : vector<8x128xf32>
    %380 = arith.mulf %374, %378 : vector<8x128xf32>
    %381 = arith.addf %379, %380 : vector<8x128xf32>
    %382 = math.tanh %381 : vector<8x128xf32>
    %383 = arith.mulf %376, %382 : vector<8x128xf32>
    %c56_145 = arith.constant 56 : index
    %c0_146 = arith.constant 0 : index
    %384 = vector.load %arg13[%c56_145, %c0_146] : memref<64x512xf32, #tpu.memory_space<vmem>>, vector<8x512xf32>
    %385 = arith.truncf %383 : vector<8x128xf32> to vector<8x128xbf16>
    %cst_147 = arith.constant dense<0.000000e+00> : vector<8x512xf32>
    %386 = tpu.matmul %385, %216, %cst_147 {dimension_numbers = #tpu.dot_dimension_numbers<[1], [0], [0], [1], [0, 0, 1, 1], [], []>} : vector<8x128xbf16>, vector<128x512xbf16>, vector<8x512xf32> -> vector<8x512xf32>
    %387 = arith.addf %384, %386 : vector<8x512xf32>
    %388 = vector.extract_strided_slice %387 {offsets = [0, 0], sizes = [8, 384], strides = [1, 1]} : vector<8x512xf32> to vector<8x384xf32>
    %cst_148 = arith.constant 5.000000e-01 : f32
    %389 = vector.broadcast %cst_148 : f32 to vector<8x384xf32>
    %390 = arith.mulf %389, %388 : vector<8x384xf32>
    %391 = math.tanh %390 : vector<8x384xf32>
    %cst_149 = arith.constant 5.000000e-01 : f32
    %392 = vector.broadcast %cst_149 : f32 to vector<8x384xf32>
    %393 = arith.mulf %392, %391 : vector<8x384xf32>
    %cst_150 = arith.constant 5.000000e-01 : f32
    %394 = vector.broadcast %cst_150 : f32 to vector<8x384xf32>
    %395 = arith.addf %393, %394 : vector<8x384xf32>
    %396 = vector.extract_strided_slice %395 {offsets = [0, 0], sizes = [8, 128], strides = [1, 1]} : vector<8x384xf32> to vector<8x128xf32>
    %397 = vector.extract_strided_slice %395 {offsets = [0, 128], sizes = [8, 128], strides = [1, 1]} : vector<8x384xf32> to vector<8x128xf32>
    %398 = vector.extract_strided_slice %395 {offsets = [0, 256], sizes = [8, 128], strides = [1, 1]} : vector<8x384xf32> to vector<8x128xf32>
    %399 = vector.extract_strided_slice %387 {offsets = [0, 384], sizes = [8, 128], strides = [1, 1]} : vector<8x512xf32> to vector<8x128xf32>
    %400 = math.tanh %399 : vector<8x128xf32>
    %401 = arith.mulf %397, %381 : vector<8x128xf32>
    %402 = arith.mulf %396, %400 : vector<8x128xf32>
    %403 = arith.addf %401, %402 : vector<8x128xf32>
    %404 = math.tanh %403 : vector<8x128xf32>
    %405 = arith.mulf %398, %404 : vector<8x128xf32>
    %c1_151 = arith.constant 1 : index
    %c0_152 = arith.constant 0 : index
    %c0_153 = arith.constant 0 : index
    %406 = vector.load %arg10[%c1_151, %c0_152, %c0_153] : memref<2x8x128xf32, #tpu.memory_space<vmem>>, vector<1x8x128xf32>
    %407 = vector.shape_cast %406 : vector<1x8x128xf32> to vector<8x128xf32>
    %408 = vector.shape_cast %405 : vector<8x128xf32> to vector<1x8x128xf32>
    tpu.vector_store %arg10[%c1_151, %c0_152, %c0_153], %408 {strides = array<i32>} : memref<2x8x128xf32, #tpu.memory_space<vmem>>, vector<1x8x128xf32>,
    %c1_154 = arith.constant 1 : index
    %c0_155 = arith.constant 0 : index
    %c0_156 = arith.constant 0 : index
    %409 = vector.load %arg11[%c1_154, %c0_155, %c0_156] : memref<2x8x128xf32, #tpu.memory_space<vmem>>, vector<1x8x128xf32>
    %410 = vector.shape_cast %409 : vector<1x8x128xf32> to vector<8x128xf32>
    %411 = vector.shape_cast %403 : vector<8x128xf32> to vector<1x8x128xf32>
    tpu.vector_store %arg11[%c1_154, %c0_155, %c0_156], %411 {strides = array<i32>} : memref<2x8x128xf32, #tpu.memory_space<vmem>>, vector<1x8x128xf32>,
    %412 = arith.truncf %405 : vector<8x128xf32> to vector<8x128xbf16>
    %c0_157 = arith.constant 0 : index
    %c0_158 = arith.constant 0 : index
    %413 = vector.load %arg7[%c0_157, %c0_158] : memref<128x128xbf16, #tpu.memory_space<vmem>>, vector<128x128xbf16>
    %cst_159 = arith.constant dense<0.000000e+00> : vector<8x128xf32>
    %414 = tpu.matmul %412, %413, %cst_159 {dimension_numbers = #tpu.dot_dimension_numbers<[1], [0], [0], [1], [0, 0, 1, 1], [], []>} : vector<8x128xbf16>, vector<128x128xbf16>, vector<8x128xf32> -> vector<8x128xf32>
    %c0_160 = arith.constant 0 : index
    %c0_161 = arith.constant 0 : index
    %415 = vector.load %arg8[%c0_160, %c0_161] : memref<1x128xf32, #tpu.memory_space<vmem>>, vector<1x128xf32>
    %416 = vector.broadcast %415 : vector<1x128xf32> to vector<8x128xf32>
    %417 = arith.addf %414, %416 : vector<8x128xf32>
    %c0_162 = arith.constant 0 : index
    %c0_163 = arith.constant 0 : index
    %418 = vector.load %arg9[%c0_162, %c0_163] : memref<8x128xf32, #tpu.memory_space<vmem>>, vector<8x128xf32>
    tpu.vector_store %arg9[%c0_162, %c0_163], %417 {strides = array<i32>} : memref<8x128xf32, #tpu.memory_space<vmem>>, vector<8x128xf32>,
    return
  }
}

</mosaic_0001>

<bundles_post_ra>
// kernel: classifier_rnn_forward.1
= control target key start
LH: loop header
LB: loop body
LE: loop exit
PB: predicated region body
PF: predicated region fallthrough
CT: control target
= control target key end

     0   :  { %17 = vsyncpa [#allocation5], 0  ;;  %s4866_s0 = inlined_call_operand.vmem [shape: s32[64,1], index: 0, kind: input, shape index: {}]   ;;  %s4867_s1 = inlined_call_operand.vmem [shape: bf16[128,128], index: 1, kind: input, shape index: {}]   ;;  %s4868_s2 = inlined_call_operand.vmem [shape: f32[2,8,128], index: 2, kind: input, shape index: {}]   ;;  %s4869_s3 = inlined_call_operand.vmem [shape: f32[2,8,128], index: 3, kind: input, shape index: {}]   ;;  %s4870_s4 = inlined_call_operand.hbm [shape: bf16[2,128,512], index: 4, kind: input, shape index: {}]   ;;  %s4871_s5 = inlined_call_operand.hbm [shape: bf16[2,128,512], index: 5, kind: input, shape index: {}]   ;;  %s4872_s6 = inlined_call_operand.vmem [shape: f32[2,1,512], index: 6, kind: input, shape index: {}]   ;;  %s4873_s7 = inlined_call_operand.hbm [shape: bf16[128,128], index: 7, kind: input, shape index: {}]   ;;  %s4874_s8 = inlined_call_operand.vmem [shape: f32[1,128], index: 8, kind: input, shape index: {}]   ;;  %s4875_s9 = inlined_call_operand.vmem [shape: f32[8,128], index: 9, kind: output, shape index: {0}]   ;;  %s4876_s10 = inlined_call_operand.vmem [shape: f32[2,8,128], index: 10, kind: output, shape index: {1}]   ;;  %s4877_s11 = inlined_call_operand.vmem [shape: f32[2,8,128], index: 11, kind: output, shape index: {2}]  }
   0x1   :  { %18 = vsyncpa [#allocation7], 0  ;;  %s44_s19 = sshll.u32 %s4871_s5, 4  ;;  %s3711_s20 = smov [#allocation6]   ;;  %s45_s19 = int_to_ptr.hbm [resolvable:$true] %s44_s19 }
   0x2   :  { %s46_s21 = sshll.u32 %s3711_s20, 4  ;;  %s31_s24 = sshll.u32 %s4870_s4, 4  ;;  %s47_s21 = int_to_ptr.vmem [resolvable:$true] %s46_s21  ;;  %s32_s24 = int_to_ptr.hbm [resolvable:$true] %s31_s24 }
   0x3   :  { %s3712_s25 = smov 256   ;;  %s3713_s26 = smov 16  }
   0x4   :  { %52 = dma.hbm_to_vmem [thread:$0]  %s45_s19, 8192, %s47_s21, [#allocation7], %s3712_s25, %s3712_s25, %s3713_s26  }
   0x5   :  { %s3714_s27 = smov [#allocation4]   ;;  %s59_s12 = sshll.u32 %s4873_s7, 4  ;;  %s60_s12 = int_to_ptr.hbm [resolvable:$true] %s59_s12 }
   0x6   :  { %s33_s28 = sshll.u32 %s3714_s27, 4  ;;  %s3715_s5 = smov [#allocation8]   ;;  %s34_s28 = int_to_ptr.vmem [resolvable:$true] %s33_s28 }
   0x7   :  { %39 = dma.hbm_to_vmem [thread:$0]  %s32_s24, 8192, %s34_s28, [#allocation5], %s3712_s25, %s3712_s25, %s3713_s26  }
   0x8   :  { %s61_s13 = sshll.u32 %s3715_s5, 4  ;;  %s3716_s14 = smov 64   ;;  %s62_s13 = int_to_ptr.vmem [resolvable:$true] %s61_s13 }
   0x9   :  { %s3717_s15 = smov 4  }
   0xa   :  { %67 = dma.hbm_to_vmem [thread:$0]  %s60_s12, 1024, %s62_s13, [#allocation7], %s3716_s14, %s3716_s14, %s3717_s15  }
   0xb   :  { %3707 = dma.done.wait [#allocation5], 8192  }
   0xc   :  { %3708 = vsyncadd [#allocation5], 4294959104 }
   0xd   :  { %3709 = dma.done.wait [#allocation7], 9216  }
   0xe   :  { %3710 = vsyncadd [#allocation7], 4294958080  ;;  %v3718_v0 = vmov 0   ;;  %v84_v1 = vld [vmem:[%s4866_s0 + $0x10] sm:$0xff]  ;;  %v82_v2 = vld [vmem:[%s4866_s0] sm:$0xff]  ;;  %v90_v18 = vlaneseq }
   0xf   :  { %3472 = vset.pattern.permute.xlu1 %v3718_v0  ;;  %3471 = vset.pattern.permute.xlu0 %v3718_v0  ;;  %v86_v3 = vld [vmem:[%s4866_s0 + $0x20] sm:$0xff]  ;;  %v3325_v4 = vld [vmem:[%s4867_s1 + $0x38] sm:$0xff]  ;;  %v3324_v5 = vld [vmem:[%s4867_s1 + $0x30] sm:$0xff]  ;;  %v3719_v21 = vmov 1.0|1.0  }
  0x10   :  { %3473 = vset.pattern.permute.xlu2 %v3718_v0  ;;  %99 = vperm.xlu1 %3472, %v84_v1   ;;  %v85_v6 = vld [vmem:[%s4866_s0 + $0x18] sm:$0xff]  ;;  %v83_v7 = vld [vmem:[%s4866_s0 + $0x8] sm:$0xff]  ;;  %v3322_v10 = vld [vmem:[%s4867_s1 + $0x20] sm:$0xff]  ;;  %v3837_v19 = vand.u32 127, %v90_v18 }
  0x11   :  { %93 = vperm.xlu0 %3471, %v82_v2   ;;  %105 = vperm.xlu2 %3473, %v86_v3   ;;  %v87_v8 = vld [vmem:[%s4866_s0 + $0x28] sm:$0xff]  ;;  %v89_v11 = vld [vmem:[%s4866_s0 + $0x38] sm:$0xff]  ;;  %v88_v12 = vld [vmem:[%s4866_s0 + $0x30] sm:$0xff] }
  0x12   :  { %208 = vmatpush.bf16.msra.mxu0 %v3325_v4  ;;  %v3323_v9 = vld [vmem:[%s4867_s1 + $0x28] sm:$0xff]  ;;  %v3321_v13 = vld [vmem:[%s4867_s1 + $0x18] sm:$0xff]  ;;  %v3320_v14 = vld [vmem:[%s4867_s1 + $0x10] sm:$0xff] }
  0x13   :  { %v3319_v15 = vld [vmem:[%s4867_s1 + $0x8] sm:$0xff]  ;;  %v3318_v16 = vld [vmem:[%s4867_s1] sm:$0xff]  ;;  %v3388_v26 = vld [vmem:[#allocation4 + $0xec] sm:$0xf0] }
  0x14   :  { %v2883_v25 = vld [vmem:[#allocation4 + $0xe0] sm:$0xf]  ;;  %v3386_v27 = vld [vmem:[#allocation4 + $0xe4] sm:$0xf]  ;;  %v2885_v29 = vld [vmem:[#allocation4 + $0xf0] sm:$0xf0] }
  0x15   :  { %v2884_v28 = vor.u32 %v3388_v26, %v2883_v25  ;;  %v2891_v30 = vld [vmem:[#allocation4 + $0xe8] sm:$0xf]  ;;  %v3389_v31 = vld [vmem:[#allocation4 + $0xf4] sm:$0xf0]  ;;  %v2888_v32 = vor.u32 %v3386_v27, %v2885_v29  ;;  %v3387_v34 = vld [vmem:[#allocation4 + $0xec] sm:$0xf] }
  0x16   :  { %209 = vmatpush.bf16.msra.mxu0 %v3324_v5  ;;  %v2892_v33 = vor.u32 %v3389_v31, %v2891_v30  ;;  %v2893_v35 = vld [vmem:[#allocation4 + $0xf8] sm:$0xf0]  ;;  %v2867_v36 = vld [vmem:[#allocation4 + $0xc0] sm:$0xf]  ;;  %v3384_v38 = vld [vmem:[#allocation4 + $0xcc] sm:$0xf0] }
  0x17   :  { %475 = vmatpush.bf16.msra.mxu1 %v2884_v28  ;;  %v2896_v37 = vor.u32 %v3387_v34, %v2893_v35  ;;  %v3382_v39 = vld [vmem:[#allocation4 + $0xc4] sm:$0xf]  ;;  %v2869_v40 = vld [vmem:[#allocation4 + $0xd0] sm:$0xf0]  ;;  %504 = vmatpush.bf16.msra.mxu2 %v2888_v32  ;;  %v2868_v41 = vor.u32 %v3384_v38, %v2867_v36  ;;  %v2875_v43 = vld [vmem:[#allocation4 + $0xc8] sm:$0xf] }
  0x18   :  { %102 = vperm.xlu1 %3472, %v85_v6   ;;  %533 = vmatpush.bf16.msra.mxu3 %v2892_v33  ;;  %v2872_v42 = vor.u32 %v3382_v39, %v2869_v40  ;;  %v3385_v44 = vld [vmem:[#allocation4 + $0xd4] sm:$0xf0]  ;;  %v3383_v45 = vld [vmem:[#allocation4 + $0xcc] sm:$0xf]  ;;  %v2877_v47 = vld [vmem:[#allocation4 + $0xd8] sm:$0xf0] }
  0x19   :  { %96 = vperm.xlu0 %3471, %v83_v7   ;;  %108 = vperm.xlu2 %3473, %v87_v8   ;;  %v2876_v46 = vor.u32 %v3385_v44, %v2875_v43  ;;  %v2851_v48 = vld [vmem:[#allocation4 + $0xa0] sm:$0xf]  ;;  %v3380_v49 = vld [vmem:[#allocation4 + $0xac] sm:$0xf0]  ;;  %v2880_v50 = vor.u32 %v3383_v45, %v2877_v47  ;;  %v3378_v51 = vld [vmem:[#allocation4 + $0xa4] sm:$0xf] }
  0x1a   :  { %210 = vmatpush.bf16.msra.mxu0 %v3323_v9  ;;  %v2853_v52 = vld [vmem:[#allocation4 + $0xb0] sm:$0xf0]  ;;  %v2859_v53 = vld [vmem:[#allocation4 + $0xa8] sm:$0xf]  ;;  %v2852_v54 = vor.u32 %v3380_v49, %v2851_v48  ;;  %v3381_v55 = vld [vmem:[#allocation4 + $0xb4] sm:$0xf0] }
  0x1b   :  { %476 = vmatpush.bf16.msra.mxu1 %v2868_v41  ;;  %v3379_v56 = vld [vmem:[#allocation4 + $0xac] sm:$0xf]  ;;  %v2861_v57 = vld [vmem:[#allocation4 + $0xb8] sm:$0xf0]  ;;  %505 = vmatpush.bf16.msra.mxu2 %v2872_v42  ;;  %v2856_v58 = vor.u32 %v3378_v51, %v2853_v52  ;;  %v2860_v59 = vor.u32 %v3381_v55, %v2859_v53  ;;  %v2835_v60 = vld [vmem:[#allocation4 + $0x80] sm:$0xf] }
  0x1c   :  { %534 = vmatpush.bf16.msra.mxu3 %v2876_v46  ;;  %v3376_v61 = vld [vmem:[#allocation4 + $0x8c] sm:$0xf0]  ;;  %v2864_v63 = vor.u32 %v3379_v56, %v2861_v57  ;;  %v3374_v0 = vld [vmem:[#allocation4 + $0x84] sm:$0xf]  ;;  %v2837_v1 = vld [vmem:[#allocation4 + $0x90] sm:$0xf0] }
  0x1d   :  { %v2843_v2 = vld [vmem:[#allocation4 + $0x88] sm:$0xf]  ;;  %v3377_v3 = vld [vmem:[#allocation4 + $0x94] sm:$0xf0]  ;;  %v3375_v4 = vld [vmem:[#allocation4 + $0x8c] sm:$0xf]  ;;  %v2836_v6 = vor.u32 %v3376_v61, %v2835_v60  ;;  %v2840_v7 = vor.u32 %v3374_v0, %v2837_v1 }
  0x1e   :  { %211 = vmatpush.bf16.msra.mxu0 %v3322_v10  ;;  %v2845_v5 = vld [vmem:[#allocation4 + $0x98] sm:$0xf0]  ;;  %v2819_v8 = vld [vmem:[#allocation4 + $0x60] sm:$0xf]  ;;  %v3372_v9 = vld [vmem:[#allocation4 + $0x6c] sm:$0xf0]  ;;  %v2844_v10 = vor.u32 %v3377_v3, %v2843_v2 }
  0x1f   :  { %477 = vmatpush.bf16.msra.mxu1 %v2852_v54  ;;  %506 = vmatpush.bf16.msra.mxu2 %v2856_v58  ;;  %v2820_v18 = vor.u32 %v3372_v9, %v2819_v8  ;;  %v3368_v27 = vld [vmem:[#allocation4 + $0x4c] sm:$0xf0]  ;;  %v3366_v28 = vld [vmem:[#allocation4 + $0x44] sm:$0xf]  ;;  %v2805_v30 = vld [vmem:[#allocation4 + $0x50] sm:$0xf0] }
  0x20   :  { %114 = vperm.xlu1 %3472, %v89_v11   ;;  %535 = vmatpush.bf16.msra.mxu3 %v2860_v59  ;;  %v2848_v11 = vor.u32 %v3375_v4, %v2845_v5  ;;  %v2811_v31 = vld [vmem:[#allocation4 + $0x48] sm:$0xf]  ;;  %v3369_v32 = vld [vmem:[#allocation4 + $0x54] sm:$0xf0]  ;;  %v2808_v33 = vor.u32 %v3366_v28, %v2805_v30  ;;  %v3367_v35 = vld [vmem:[#allocation4 + $0x4c] sm:$0xf] }
  0x21   :  { %111 = vperm.xlu0 %3471, %v88_v12   ;;  %v3370_v12 = vld [vmem:[#allocation4 + $0x64] sm:$0xf]  ;;  %v2812_v34 = vor.u32 %v3369_v32, %v2811_v31  ;;  %v2813_v36 = vld [vmem:[#allocation4 + $0x58] sm:$0xf0]  ;;  %v2787_v38 = vld [vmem:[#allocation4 + $0x20] sm:$0xf] }
  0x22   :  { %212 = vmatpush.bf16.msra.mxu0 %v3321_v13  ;;  %v2821_v13 = vld [vmem:[#allocation4 + $0x70] sm:$0xf0]  ;;  %v3364_v39 = vld [vmem:[#allocation4 + $0x2c] sm:$0xf0]  ;;  %v3362_v40 = vld [vmem:[#allocation4 + $0x24] sm:$0xf] }
  0x23   :  { %478 = vmatpush.bf16.msra.mxu1 %v2836_v6  ;;  %507 = vmatpush.bf16.msra.mxu2 %v2840_v7  ;;  %v2795_v41 = vld [vmem:[#allocation4 + $0x28] sm:$0xf]  ;;  %v3365_v42 = vld [vmem:[#allocation4 + $0x34] sm:$0xf0]  ;;  %v3363_v45 = vld [vmem:[#allocation4 + $0x2c] sm:$0xf] }
  0x24   :  { %536 = vmatpush.bf16.msra.mxu3 %v2844_v10  ;;  %v2796_v44 = vor.u32 %v3365_v42, %v2795_v41  ;;  %v2797_v46 = vld [vmem:[#allocation4 + $0x38] sm:$0xf0]  ;;  %v2771_v48 = vld [vmem:[#allocation4] sm:$0xf]  ;;  %v3360_v49 = vld [vmem:[#allocation4 + $0xc] sm:$0xf0] }
  0x25   :  { %v2800_v47 = vor.u32 %v3363_v45, %v2797_v46  ;;  %v2772_v51 = vor.u32 %v3360_v49, %v2771_v48  ;;  %v2773_v52 = vld [vmem:[#allocation4 + $0x10] sm:$0xf0]  ;;  %v2779_v53 = vld [vmem:[#allocation4 + $0x8] sm:$0xf]  ;;  %v3361_v54 = vld [vmem:[#allocation4 + $0x14] sm:$0xf0] }
  0x26   :  { %213 = vmatpush.bf16.msra.mxu0 %v3320_v14  ;;  %v2827_v14 = vld [vmem:[#allocation4 + $0x68] sm:$0xf]  ;;  %v2780_v56 = vor.u32 %v3361_v54, %v2779_v53  ;;  %v3359_v57 = vld [vmem:[#allocation4 + $0xc] sm:$0xf]  ;;  %v2781_v58 = vld [vmem:[#allocation4 + $0x18] sm:$0xf0] }
  0x27   :  { %479 = vmatpush.bf16.msra.mxu1 %v2820_v18  ;;  %v2784_v59 = vor.u32 %v3359_v57, %v2781_v58  ;;  %v3011_v60 = vld [vmem:[#allocation6 + $0xe0] sm:$0xf]  ;;  %v3356_v61 = vld [vmem:[#allocation6 + $0xec] sm:$0xf0]  ;;  %v3013_v0 = vld [vmem:[#allocation6 + $0xf0] sm:$0xf0] }
  0x28   :  { %v2995_v2 = vld [vmem:[#allocation6 + $0xc0] sm:$0xf]  ;;  %v3352_v3 = vld [vmem:[#allocation6 + $0xcc] sm:$0xf0]  ;;  %v3350_v4 = vld [vmem:[#allocation6 + $0xc4] sm:$0xf] }
  0x29   :  { %v3865_v5 = vor.u32 %v3352_v3, %v2995_v2  ;;  %v2997_v6 = vld [vmem:[#allocation6 + $0xd0] sm:$0xf0]  ;;  %v3019_v8 = vld [vmem:[#allocation6 + $0xe8] sm:$0xf]  ;;  %v3357_v9 = vld [vmem:[#allocation6 + $0xf4] sm:$0xf0] }
  0x2a   :  { %214 = vmatpush.bf16.msra.mxu0 %v3319_v15  ;;  %v3373_v15 = vld [vmem:[#allocation4 + $0x74] sm:$0xf0]  ;;  %v3867_v7 = vor.u32 %v3350_v4, %v2997_v6  ;;  %v3871_v10 = vor.u32 %v3357_v9, %v3019_v8  ;;  %v3003_v18 = vld [vmem:[#allocation6 + $0xc8] sm:$0xf]  ;;  %v2931_v41 = vld [vmem:[#allocation6 + $0x40] sm:$0xf] }
  0x2b   :  { %v2987_v31 = vld [vmem:[#allocation6 + $0xa8] sm:$0xf]  ;;  %v3349_v32 = vld [vmem:[#allocation6 + $0xb4] sm:$0xf0]  ;;  %v3332_v45 = vld [vmem:[#allocation6 + $0x2c] sm:$0xf0] }
  0x2c   :  { %v2933_v48 = vld [vmem:[#allocation6 + $0x50] sm:$0xf0]  ;;  %v2955_v53 = vld [vmem:[#allocation6 + $0x68] sm:$0xf]  ;;  %v3341_v54 = vld [vmem:[#allocation6 + $0x74] sm:$0xf0] }
  0x2d   :  { %v3328_v57 = vld [vmem:[#allocation6 + $0xc] sm:$0xf0]  ;;  %v3355_v58 = vld [vmem:[#allocation6 + $0xec] sm:$0xf]  ;;  %v2939_v2 = vld [vmem:[#allocation6 + $0x48] sm:$0xf] }
  0x2e   :  { %215 = vmatpush.bf16.msra.mxu0 %v3318_v16  ;;  %v3371_v16 = vld [vmem:[#allocation4 + $0x6c] sm:$0xf]  ;;  %v3337_v4 = vld [vmem:[#allocation6 + $0x54] sm:$0xf0]  ;;  %v3005_v8 = vld [vmem:[#allocation6 + $0xd8] sm:$0xf0] }
  0x2f   :  { %v3351_v6 = vld [vmem:[#allocation6 + $0xcc] sm:$0xf]  ;;  %v3925_v9 = vor.u32 %v3337_v4, %v2939_v2 }
  0x32   :  { %562 = vmatpush.bf16.msrb.mxu0 %v2896_v37  ;;  %v2816_v37 = vor.u32 %v3367_v35, %v2813_v36  ;;  %v3340_v35 = vld [vmem:[#allocation6 + $0x6c] sm:$0xf0]  ;;  %v3338_v36 = vld [vmem:[#allocation6 + $0x64] sm:$0xf] }
  0x36   :  { %563 = vmatpush.bf16.msrb.mxu0 %v2880_v50  ;;  %v3358_v50 = vld [vmem:[#allocation4 + $0x4] sm:$0xf] }
  0x37   :  { %v2776_v55 = vor.u32 %v3358_v50, %v2773_v52 }
  0x3a   :  { %564 = vmatpush.bf16.msrb.mxu0 %v2864_v63  ;;  %v3859_v63 = vor.u32 %v3356_v61, %v3011_v60 }
  0x3e   :  { %565 = vmatpush.bf16.msrb.mxu0 %v2848_v11  ;;  %v2979_v11 = vld [vmem:[#allocation6 + $0xa0] sm:$0xf] }
  0x6b   :  { %v3844_v24 = vpop.permute.xlu2 %105 }
  0x6c   :  { %vm120_vm6 = vcmp.eq.s32.totalorder %v3837_v19, %v3844_v24  ;;  %v2803_v24 = vld [vmem:[#allocation4 + $0x40] sm:$0xf] }
  0x6d   :  { %v2804_v29 = vor.u32 %v3368_v27, %v2803_v24  ;;  %v2965_v24 = vld [vmem:[#allocation6 + $0x90] sm:$0xf0] }
  0x6f   :  { %480 = vmatpush.bf16.msra.mxu1 %v2804_v29 }
  0x73   :  { %v109_v62 = vpop.permute.xlu2 %108 }
  0x74   :  { %vm121_vm7 = vcmp.eq.s32.totalorder %v3837_v19, %v109_v62  ;;  %v3354_v62 = vld [vmem:[#allocation6 + $0xe4] sm:$0xf] }
  0x75   :  { %vm2765_vm8 = vmpackc.low %vm121_vm7, %vm120_vm6  ;;  %v3861_v1 = vor.u32 %v3354_v62, %v3013_v0  ;;  %v3330_v62 = vld [vmem:[#allocation6 + $0x24] sm:$0xf]  ;;  %v2917_v0 = vld [vmem:[#allocation6 + $0x30] sm:$0xf0] }
  0x76   :  { %v3922_v3 = vor.u32 %v3330_v62, %v2917_v0 }
  0x82   :  { %v100_v22 = vpop.permute.xlu1 %99 }
  0x83   :  { %v94_v17 = vpop.permute.xlu0 %93  ;;  %vm118_vm3 = vcmp.eq.s32.totalorder %v3837_v19, %v100_v22  ;;  %v2828_v22 = vor.u32 %v3373_v15, %v2827_v14  ;;  %v2981_v15 = vld [vmem:[#allocation6 + $0xb0] sm:$0xf0] }
  0x84   :  { %vm116_vm1 = vcmp.eq.s32.totalorder %v3837_v19, %v94_v17  ;;  %v2829_v17 = vld [vmem:[#allocation4 + $0x78] sm:$0xf0] }
  0x85   :  { %537 = vmatpush.bf16.msra.mxu3 %v2828_v22  ;;  %v2963_v22 = vld [vmem:[#allocation6 + $0x80] sm:$0xf] }
  0x89   :  { %538 = vmatpush.bf16.msra.mxu3 %v2812_v34  ;;  %v2947_v34 = vld [vmem:[#allocation6 + $0x60] sm:$0xf] }
  0x8a   :  { %v103_v23 = vpop.permute.xlu1 %102 }
  0x8b   :  { %v97_v20 = vpop.permute.xlu0 %96  ;;  %vm119_vm4 = vcmp.eq.s32.totalorder %v3837_v19, %v103_v23  ;;  %v2832_v23 = vor.u32 %v3371_v16, %v2829_v17 }
  0x8c   :  { %vm117_vm0 = vcmp.eq.s32.totalorder %v3837_v19, %v97_v20  ;;  %vm2763_vm5 = vmpackc.low %vm119_vm4, %vm118_vm3  ;;  %v2824_v20 = vor.u32 %v3370_v12, %v2821_v13  ;;  %v3348_v12 = vld [vmem:[#allocation6 + $0xac] sm:$0xf0]  ;;  %v3346_v13 = vld [vmem:[#allocation6 + $0xa4] sm:$0xf] }
  0x8d   :  { %vm2761_vm2 = vmpackc.low %vm117_vm0, %vm116_vm1  ;;  %566 = vmatpush.bf16.msrb.mxu0 %v2832_v23  ;;  %539 = vmatpush.bf16.msra.mxu3 %v2796_v44  ;;  %v3875_v14 = vor.u32 %v3348_v12, %v2979_v11  ;;  %v3877_v16 = vor.u32 %v3346_v13, %v2981_v15  ;;  %v2915_v44 = vld [vmem:[#allocation6 + $0x20] sm:$0xf]  ;;  %v3927_v11 = vor.u32 %v3351_v6, %v3005_v8  ;;  %v2923_v12 = vld [vmem:[#allocation6 + $0x28] sm:$0xf] }
  0x8e   :  { %2762 = vmatmul.msk.bf16.vlgmr.msra.gmra.mxu0 %vm2761_vm2, %v3719_v21  ;;  %508 = vmatpush.bf16.msra.mxu2 %v2824_v20  ;;  %v3353_v20 = vld [vmem:[#allocation6 + $0xd4] sm:$0xf0]  ;;  %v3910_v50 = vor.u32 %v3332_v45, %v2915_v44  ;;  %v3347_v15 = vld [vmem:[#allocation6 + $0xac] sm:$0xf] }
  0x8f   :  { %v3881_v23 = vor.u32 %v3353_v20, %v3003_v18  ;;  %v3333_v13 = vld [vmem:[#allocation6 + $0x34] sm:$0xf0]  ;;  %v3326_v18 = vld [vmem:[#allocation6 + $0x4] sm:$0xf]  ;;  %v2901_v20 = vld [vmem:[#allocation6 + $0x10] sm:$0xf0] }
  0x90   :  { %v3331_v45 = vld [vmem:[#allocation6 + $0x2c] sm:$0xf] }
  0x91   :  { %567 = vmatpush.bf16.msrb.mxu0 %v2816_v37  ;;  %540 = vmatpush.bf16.msra.mxu3 %v2780_v56  ;;  %v3894_v37 = vor.u32 %v3340_v35, %v2947_v34  ;;  %v3914_v56 = vor.u32 %v3341_v54, %v2955_v53  ;;  %v2909_v53 = vld [vmem:[#allocation6 + $0x18] sm:$0xf0] }
  0x92   :  { %v115_v25 = vpop.permute.xlu1 %114  ;;  %509 = vmatpush.bf16.msra.mxu2 %v2808_v33  ;;  %v3891_v33 = vor.u32 %v3349_v32, %v2987_v31  ;;  %v3343_v31 = vld [vmem:[#allocation6 + $0x8c] sm:$0xf]  ;;  %v2973_v32 = vld [vmem:[#allocation6 + $0x98] sm:$0xf0] }
  0x93   :  { %v112_v26 = vpop.permute.xlu0 %111  ;;  %vm123_vm9 = vcmp.eq.s32.totalorder %v3837_v19, %v115_v25  ;;  %v3344_v25 = vld [vmem:[#allocation6 + $0x8c] sm:$0xf0]  ;;  %v3946_v35 = vor.u32 %v3343_v31, %v2973_v32 }
  0x94   :  { %vm122_vm10 = vcmp.eq.s32.totalorder %v3837_v19, %v112_v26  ;;  %v2788_v19 = vor.u32 %v3364_v39, %v2787_v38  ;;  %v3342_v26 = vld [vmem:[#allocation6 + $0x84] sm:$0xf]  ;;  %v3883_v27 = vor.u32 %v3344_v25, %v2963_v22  ;;  %v2949_v38 = vld [vmem:[#allocation6 + $0x70] sm:$0xf0]  ;;  %v3931_v25 = vor.u32 %v3326_v18, %v2901_v20 }
  0x95   :  { %vm2767_vm11 = vmpackc.low %vm123_vm9, %vm122_vm10  ;;  %568 = vmatpush.bf16.msrb.mxu0 %v2800_v47  ;;  %816 = vmatpush.bf16.msrb.mxu3 %v3871_v10  ;;  %v3885_v28 = vor.u32 %v3342_v26, %v2965_v24  ;;  %v3897_v39 = vor.u32 %v3338_v36, %v2949_v38  ;;  %v3334_v47 = vld [vmem:[#allocation6 + $0x44] sm:$0xf]  ;;  %v3934_v26 = vor.u32 %v3333_v13, %v2923_v12  ;;  %v305_v12 = vld [vmem:[%s4872_s6] sm:$0xf] }
  0x96   :  { %481 = vmatpush.bf16.msra.mxu1 %v2788_v19  ;;  %v2971_v19 = vld [vmem:[#allocation6 + $0x88] sm:$0xf]  ;;  %v3906_v49 = vor.u32 %v3334_v47, %v2933_v48  ;;  %v2925_v47 = vld [vmem:[#allocation6 + $0x38] sm:$0xf0]  ;;  %v4035_v18 = vperm.slane %v305_v12, 3  ;;  %v4043_v31 = vperm.slane %v305_v12, 1 }
  0x97   :  { %v4045_v32 = vperm.slane %v305_v12, 2 }
  0x99   :  { %569 = vmatpush.bf16.msrb.mxu0 %v2784_v59  ;;  %817 = vmatpush.bf16.msrb.mxu3 %v3881_v23  ;;  %v3021_v59 = vld [vmem:[#allocation6 + $0xf8] sm:$0xf0] }
  0x9a   :  { %482 = vmatpush.bf16.msra.mxu1 %v2772_v51  ;;  %v3918_v61 = vor.u32 %v3355_v58, %v3021_v59  ;;  %v623_v58 = vld [vmem:[%s4868_s2] sm:$0xff] }
  0x9b   :  { %v629_v59 = vpack.c.bf16 %v623_v58, %v623_v58 }
  0x9d   :  { %896 = vmatpush.bf16.msra.mxu0 %v3871_v10  ;;  %818 = vmatpush.bf16.msrb.mxu3 %v3891_v33 }
  0x9e   :  { %2764 = vmatmul.msk.bf16.gmra.mxu0 %vm2763_vm5, %v3719_v21  ;;  %790 = vmatpush.bf16.msrb.mxu1 %v3859_v63 }
  0xa1   :  { %897 = vmatpush.bf16.msra.mxu0 %v3881_v23 }
  0xa2   :  { %791 = vmatpush.bf16.msrb.mxu1 %v3865_v5 }
  0xa5   :  { %898 = vmatpush.bf16.msra.mxu0 %v3891_v33 }
  0xa6   :  { %792 = vmatpush.bf16.msrb.mxu1 %v3875_v14 }
  0xaa   :  { %793 = vmatpush.bf16.msrb.mxu1 %v3883_v27 }
  0xae   :  { %2766 = vmatmul.msk.bf16.gmra.mxu0 %vm2765_vm8, %v3719_v21  ;;  %794 = vmatpush.bf16.msrb.mxu1 %v3894_v37 }
  0xbe   :  { %2768 = vmatmul.msk.bf16.gmra.mxu0 %vm2767_vm11, %v3719_v21  ;;  %v2789_v21 = vld [vmem:[#allocation4 + $0x30] sm:$0xf0] }
  0xbf   :  { %v2792_v43 = vor.u32 %v3362_v40, %v2789_v21  ;;  %v3345_v21 = vld [vmem:[#allocation6 + $0x94] sm:$0xf0] }
  0xc0   :  { %v3901_v42 = vor.u32 %v3345_v21, %v2971_v19  ;;  %v2957_v19 = vld [vmem:[#allocation6 + $0x78] sm:$0xf0] }
  0xc1   :  { %510 = vmatpush.bf16.msra.mxu2 %v2792_v43  ;;  %v3336_v43 = vld [vmem:[#allocation6 + $0x4c] sm:$0xf0] }
  0xc2   :  { %v3903_v46 = vor.u32 %v3336_v43, %v2931_v41  ;;  %819 = vmatpush.bf16.msrb.mxu3 %v3901_v42  ;;  %899 = vmatpush.bf16.msra.mxu0 %v3901_v42  ;;  %v3335_v41 = vld [vmem:[#allocation6 + $0x4c] sm:$0xf]  ;;  %v2941_v43 = vld [vmem:[#allocation6 + $0x58] sm:$0xf0] }
  0xc3   :  { %v3958_v44 = vor.u32 %v3335_v41, %v2941_v43 }
  0xc4   :  { %795 = vmatpush.bf16.msrb.mxu1 %v3903_v46 }
  0xc5   :  { %511 = vmatpush.bf16.msra.mxu2 %v2776_v55  ;;  %v2899_v55 = vld [vmem:[#allocation6] sm:$0xf] }
  0xc6   :  { %v3916_v60 = vor.u32 %v3328_v57, %v2899_v55  ;;  %820 = vmatpush.bf16.msrb.mxu3 %v3914_v56  ;;  %900 = vmatpush.bf16.msra.mxu0 %v3914_v56 }
  0xc8   :  { %796 = vmatpush.bf16.msrb.mxu1 %v3910_v50 }
  0xc9   :  { %803 = vmatpush.bf16.msrb.mxu2 %v3861_v1 }
  0xca   :  { %821 = vmatpush.bf16.msrb.mxu3 %v3925_v9  ;;  %901 = vmatpush.bf16.msra.mxu0 %v3925_v9 }
  0xcc   :  { %797 = vmatpush.bf16.msrb.mxu1 %v3916_v60 }
  0xcd   :  { %804 = vmatpush.bf16.msrb.mxu2 %v3867_v7 }
  0xce   :  { %822 = vmatpush.bf16.msrb.mxu3 %v3934_v26  ;;  %902 = vmatpush.bf16.msra.mxu0 %v3934_v26 }
  0xd1   :  { %805 = vmatpush.bf16.msrb.mxu2 %v3877_v16 }
  0xd5   :  { %806 = vmatpush.bf16.msrb.mxu2 %v3885_v28 }
  0xd9   :  { %807 = vmatpush.bf16.msrb.mxu2 %v3897_v39 }
  0xdd   :  { %808 = vmatpush.bf16.msrb.mxu2 %v3906_v49 }
  0xe1   :  { %809 = vmatpush.bf16.msrb.mxu2 %v3922_v3 }
  0xe5   :  { %810 = vmatpush.bf16.msrb.mxu2 %v3931_v25 }
 0x10b   :  { %v217_v17 = vpop.f32.mrf.mxu0 }
 0x113   :  { %v219_v29 = vpop.f32.mrf.mxu0 }
 0x114   :  { %v269_v30 = vpack.c.bf16 %v219_v29, %v217_v17  ;;  %v2989_v17 = vld [vmem:[#allocation6 + $0xb8] sm:$0xf0]  ;;  %v2907_v29 = vld [vmem:[#allocation6 + $0x8] sm:$0xf] }
 0x115   :  { %v3937_v24 = vor.u32 %v3347_v15, %v2989_v17  ;;  %v4031_v15 = vperm.slane %v305_v12, 0 }
 0x116   :  { %483 = vmatmul.bf16.vlgmr.msra.gmra.mxu1 %v269_v30  ;;  %512 = vmatmul.bf16.vlgmr.msra.gmra.mxu2 %v269_v30 }
 0x117   :  { %541 = vmatmul.bf16.vlgmr.msra.gmra.mxu3 %v269_v30  ;;  %570 = vmatmul.bf16.vlgmr.msrb.gmra.mxu0 %v269_v30  ;;  %v3329_v30 = vld [vmem:[#allocation6 + $0x14] sm:$0xf0] }
 0x118   :  { %829 = vmatpush.bf16.msra.mxu1 %v3918_v61  ;;  %870 = vmatpush.bf16.msra.mxu2 %v3859_v63  ;;  %v3943_v34 = vor.u32 %v3329_v30, %v2907_v29 }
 0x11a   :  { %823 = vmatpush.bf16.msrb.mxu3 %v3943_v34  ;;  %903 = vmatpush.bf16.msra.mxu0 %v3943_v34 }
 0x11b   :  { %v222_v40 = vpop.f32.mrf.mxu0 }
 0x11c   :  { %830 = vmatpush.bf16.msra.mxu1 %v3927_v11  ;;  %871 = vmatpush.bf16.msra.mxu2 %v3865_v5 }
 0x11e   :  { %883 = vmatpush.bf16.msra.mxu3 %v3861_v1  ;;  %976 = vmatpush.bf16.msrb.mxu0 %v3871_v10 }
 0x120   :  { %831 = vmatpush.bf16.msra.mxu1 %v3937_v24  ;;  %872 = vmatpush.bf16.msra.mxu2 %v3875_v14 }
 0x122   :  { %884 = vmatpush.bf16.msra.mxu3 %v3867_v7  ;;  %977 = vmatpush.bf16.msrb.mxu0 %v3881_v23 }
 0x123   :  { %v224_v51 = vpop.f32.mrf.mxu0 }
 0x124   :  { %v270_v52 = vpack.c.bf16 %v224_v51, %v222_v40  ;;  %832 = vmatpush.bf16.msra.mxu1 %v3946_v35  ;;  %v3339_v40 = vld [vmem:[#allocation6 + $0x6c] sm:$0xf]  ;;  %873 = vmatpush.bf16.msra.mxu2 %v3883_v27  ;;  %v3964_v51 = vor.u32 %v3331_v45, %v2925_v47 }
 0x125   :  { %v3953_v21 = vor.u32 %v3339_v40, %v2957_v19 }
 0x126   :  { %488 = vmatmul.bf16.gmra.mxu1 %v270_v52  ;;  %517 = vmatmul.bf16.gmra.mxu2 %v270_v52 }
 0x127   :  { %546 = vmatmul.bf16.gmra.mxu3 %v270_v52  ;;  %575 = vmatmul.bf16.gmra.mxu0 %v270_v52  ;;  %v3327_v52 = vld [vmem:[#allocation6 + $0xc] sm:$0xf] }
 0x128   :  { %833 = vmatpush.bf16.msra.mxu1 %v3953_v21  ;;  %885 = vmatpush.bf16.msra.mxu3 %v3877_v16  ;;  %v3970_v54 = vor.u32 %v3327_v52, %v2909_v53 }
 0x129   :  { %874 = vmatpush.bf16.msra.mxu2 %v3894_v37  ;;  %978 = vmatpush.bf16.msrb.mxu0 %v3891_v33 }
 0x12b   :  { %v227_v22 = vpop.f32.mrf.mxu0 }
 0x12c   :  { %834 = vmatpush.bf16.msra.mxu1 %v3958_v44  ;;  %886 = vmatpush.bf16.msra.mxu3 %v3885_v28 }
 0x12d   :  { %875 = vmatpush.bf16.msra.mxu2 %v3903_v46  ;;  %979 = vmatpush.bf16.msrb.mxu0 %v3901_v42 }
 0x130   :  { %835 = vmatpush.bf16.msra.mxu1 %v3964_v51  ;;  %887 = vmatpush.bf16.msra.mxu3 %v3897_v39 }
 0x131   :  { %876 = vmatpush.bf16.msra.mxu2 %v3910_v50  ;;  %980 = vmatpush.bf16.msrb.mxu0 %v3914_v56 }
 0x133   :  { %v229_v36 = vpop.f32.mrf.mxu0 }
 0x134   :  { %v271_v38 = vpack.c.bf16 %v229_v36, %v227_v22  ;;  %836 = vmatpush.bf16.msra.mxu1 %v3970_v54  ;;  %888 = vmatpush.bf16.msra.mxu3 %v3906_v49 }
 0x135   :  { %877 = vmatpush.bf16.msra.mxu2 %v3916_v60  ;;  %981 = vmatpush.bf16.msrb.mxu0 %v3925_v9 }
 0x136   :  { %493 = vmatmul.bf16.gmra.mxu1 %v271_v38  ;;  %522 = vmatmul.bf16.gmra.mxu2 %v271_v38 }
 0x137   :  { %551 = vmatmul.bf16.gmra.mxu3 %v271_v38  ;;  %580 = vmatmul.bf16.gmra.mxu0 %v271_v38 }
 0x138   :  { %889 = vmatpush.bf16.msra.mxu3 %v3922_v3 }
 0x139   :  { %982 = vmatpush.bf16.msrb.mxu0 %v3934_v26 }
 0x13b   :  { %v232_v48 = vpop.f32.mrf.mxu0 }
 0x13c   :  { %890 = vmatpush.bf16.msra.mxu3 %v3931_v25 }
 0x13d   :  { %983 = vmatpush.bf16.msrb.mxu0 %v3943_v34 }
 0x143   :  { %v234_v55 = vpop.f32.mrf.mxu0 }
 0x144   :  { %v272_v57 = vpack.c.bf16 %v234_v55, %v232_v48 }
 0x146   :  { %498 = vmatmul.bf16.gmra.mxu1 %v272_v57  ;;  %527 = vmatmul.bf16.gmra.mxu2 %v272_v57 }
 0x147   :  { %556 = vmatmul.bf16.gmra.mxu3 %v272_v57  ;;  %585 = vmatmul.bf16.gmra.mxu0 %v272_v57 }
 0x156   :  { %798 = vmatmul.bf16.vlgmr.msrb.gmra.mxu1 %v629_v59  ;;  %811 = vmatmul.bf16.vlgmr.msrb.gmra.mxu2 %v629_v59 }
 0x157   :  { %824 = vmatmul.bf16.vlgmr.msrb.gmra.mxu3 %v629_v59  ;;  %909 = vmatpush.bf16.msrb.mxu1 %v3918_v61 }
 0x158   :  { %950 = vmatpush.bf16.msrb.mxu2 %v3859_v63  ;;  %963 = vmatpush.bf16.msrb.mxu3 %v3861_v1 }
 0x15b   :  { %910 = vmatpush.bf16.msrb.mxu1 %v3927_v11 }
 0x15c   :  { %951 = vmatpush.bf16.msrb.mxu2 %v3865_v5  ;;  %964 = vmatpush.bf16.msrb.mxu3 %v3867_v7 }
 0x15f   :  { %911 = vmatpush.bf16.msrb.mxu1 %v3937_v24 }
 0x160   :  { %952 = vmatpush.bf16.msrb.mxu2 %v3875_v14  ;;  %965 = vmatpush.bf16.msrb.mxu3 %v3877_v16 }
 0x163   :  { %912 = vmatpush.bf16.msrb.mxu1 %v3946_v35 }
 0x164   :  { %953 = vmatpush.bf16.msrb.mxu2 %v3883_v27  ;;  %966 = vmatpush.bf16.msrb.mxu3 %v3885_v28 }
 0x166   :  { %837 = vmatmul.bf16.vlgmr.msra.gmra.mxu1 %v629_v59 }
 0x167   :  { %913 = vmatpush.bf16.msrb.mxu1 %v3953_v21 }
 0x168   :  { %954 = vmatpush.bf16.msrb.mxu2 %v3894_v37  ;;  %967 = vmatpush.bf16.msrb.mxu3 %v3897_v39 }
 0x16b   :  { %914 = vmatpush.bf16.msrb.mxu1 %v3958_v44 }
 0x16c   :  { %955 = vmatpush.bf16.msrb.mxu2 %v3903_v46  ;;  %968 = vmatpush.bf16.msrb.mxu3 %v3906_v49 }
 0x16f   :  { %915 = vmatpush.bf16.msrb.mxu1 %v3964_v51 }
 0x170   :  { %956 = vmatpush.bf16.msrb.mxu2 %v3910_v50  ;;  %969 = vmatpush.bf16.msrb.mxu3 %v3922_v3 }
 0x173   :  { %916 = vmatpush.bf16.msrb.mxu1 %v3970_v54 }
 0x174   :  { %957 = vmatpush.bf16.msrb.mxu2 %v3916_v60  ;;  %970 = vmatpush.bf16.msrb.mxu3 %v3931_v25 }
 0x177   :  { %989 = vmatpush.bf16.msra.mxu1 %v3918_v61 }
 0x17b   :  { %990 = vmatpush.bf16.msra.mxu1 %v3927_v11 }
 0x17f   :  { %991 = vmatpush.bf16.msra.mxu1 %v3937_v24 }
 0x183   :  { %992 = vmatpush.bf16.msra.mxu1 %v3946_v35 }
 0x187   :  { %993 = vmatpush.bf16.msra.mxu1 %v3953_v21 }
 0x18b   :  { %994 = vmatpush.bf16.msra.mxu1 %v3958_v44 }
 0x18f   :  { %995 = vmatpush.bf16.msra.mxu1 %v3964_v51 }
 0x193   :  { %996 = vmatpush.bf16.msra.mxu1 %v3970_v54  ;;  %v484_v62 = vpop.f32.mrf.mxu1 }
 0x194   :  { %v571_v0 = vpop.f32.mrf.mxu0 }
 0x199   :  { %v513_v2 = vpop.f32.mrf.mxu2 }
 0x19a   :  { %v542_v4 = vpop.f32.mrf.mxu3 }
 0x19b   :  { %v4022_v6 = vpop.f32.mrf.mxu1 }
 0x19c   :  { %v4024_v8 = vpop.f32.mrf.mxu0 }
 0x1a1   :  { %v4029_v13 = vpop.f32.mrf.mxu2 }
 0x1a2   :  { %v4033_v17 = vpop.f32.mrf.mxu3 }
 0x1a3   :  { %v489_v20 = vpop.f32.mrf.mxu1 }
 0x1a4   :  { %v4038_v22 = vadd.f32 %v489_v20, %v4031_v15  ;;  %v576_v29 = vpop.f32.mrf.mxu0 }
 0x1a5   :  { %v4041_v30 = vadd.f32 %v576_v29, %v4035_v18 }
 0x1a9   :  { %v518_v36 = vpop.f32.mrf.mxu2 }
 0x1aa   :  { %v4048_v38 = vadd.f32 %v518_v36, %v4043_v31  ;;  %v547_v40 = vpop.f32.mrf.mxu3 }
 0x1ab   :  { %v4051_v19 = vadd.f32 %v547_v40, %v4045_v32  ;;  %v4053_v41 = vpop.f32.mrf.mxu1 }
 0x1ac   :  { %4878 = vst [vmem:[#allocation11_spill] sm:$0xff] %v4053_v41  ;;  %v4055_v43 = vpop.f32.mrf.mxu0 }
 0x1ad   :  { %4879 = vst [vmem:[#allocation12_spill] sm:$0xff] %v4055_v43 }
 0x1b1   :  { %v4057_v45 = vpop.f32.mrf.mxu2 }
 0x1b2   :  { %4880 = vst [vmem:[#allocation13_spill] sm:$0xff] %v4057_v45  ;;  %v4059_v47 = vpop.f32.mrf.mxu3 }
 0x1b3   :  { %4881 = vst [vmem:[#allocation14_spill] sm:$0xff] %v4059_v47  ;;  %v494_v48 = vpop.f32.mrf.mxu1 }
 0x1b4   :  { %v4062_v52 = vadd.f32 %v494_v48, %v4031_v15  ;;  %v581_v53 = vpop.f32.mrf.mxu0 }
 0x1b5   :  { %v4065_v55 = vadd.f32 %v581_v53, %v4035_v18 }
 0x1b6   :  { %4882 = vst [vmem:[#allocation15_spill] sm:$0xff] %v4062_v52 }
 0x1b7   :  { %4883 = vst [vmem:[#allocation16_spill] sm:$0xff] %v4065_v55 }
 0x1b9   :  { %v523_v57 = vpop.f32.mrf.mxu2 }
 0x1ba   :  { %v4068_v58 = vadd.f32 %v523_v57, %v4043_v31  ;;  %v552_v59 = vpop.f32.mrf.mxu3 }
 0x1bb   :  { %v4071_v12 = vadd.f32 %v552_v59, %v4045_v32  ;;  %v4073_v20 = vpop.f32.mrf.mxu1 }
 0x1bc   :  { %4884 = vst [vmem:[#allocation17_spill] sm:$0xff] %v4068_v58  ;;  %v4075_v29 = vpop.f32.mrf.mxu0 }
 0x1bd   :  { %4885 = vst [vmem:[#allocation18_spill] sm:$0xff] %v4071_v12 }
 0x1be   :  { %4886 = vst [vmem:[#allocation19_spill] sm:$0xff] %v4073_v20 }
 0x1bf   :  { %4887 = vst [vmem:[#allocation20_spill] sm:$0xff] %v4075_v29 }
 0x1c1   :  { %v4077_v36 = vpop.f32.mrf.mxu2 }
 0x1c2   :  { %4888 = vst [vmem:[#allocation21_spill] sm:$0xff] %v4077_v36  ;;  %v4079_v40 = vpop.f32.mrf.mxu3 }
 0x1c3   :  { %4889 = vst [vmem:[#allocation22_spill] sm:$0xff] %v4079_v40  ;;  %v499_v48 = vpop.f32.mrf.mxu1 }
 0x1c4   :  { %v4082_v53 = vadd.f32 %v499_v48, %v4031_v15  ;;  %v586_v55 = vpop.f32.mrf.mxu0  ;;  %v485_v48 = vadd.f32 %v484_v62, %v4031_v15 }
 0x1c5   :  { %v4085_v57 = vadd.f32 %v586_v55, %v4035_v18  ;;  %v514_v55 = vadd.f32 %v513_v2, %v4043_v31 }
 0x1c6   :  { %4890 = vst [vmem:[#allocation23_spill] sm:$0xff] %v4082_v53 }
 0x1c7   :  { %4891 = vst [vmem:[#allocation24_spill] sm:$0xff] %v4085_v57 }
 0x1c9   :  { %v528_v58 = vpop.f32.mrf.mxu2 }
 0x1ca   :  { %v4088_v59 = vadd.f32 %v528_v58, %v4043_v31  ;;  %v557_v12 = vpop.f32.mrf.mxu3 }
 0x1cb   :  { %v4091_v20 = vadd.f32 %v557_v12, %v4045_v32  ;;  %v4093_v29 = vpop.f32.mrf.mxu1  ;;  %v543_v12 = vadd.f32 %v542_v4, %v4045_v32 }
 0x1cc   :  { %4892 = vst [vmem:[#allocation25_spill] sm:$0xff] %v4088_v59 }
 0x1cd   :  { %4893 = vst [vmem:[#allocation26_spill] sm:$0xff] %v4091_v20 }
 0x1ce   :  { %4894 = vst [vmem:[#allocation27_spill] sm:$0xff] %v4093_v29 }
 0x1d1   :  { %v4095_v36 = vpop.f32.mrf.mxu2 }
 0x1d2   :  { %4895 = vst [vmem:[#allocation28_spill] sm:$0xff] %v4095_v36  ;;  %v4097_v40 = vpop.f32.mrf.mxu3 }
 0x1d3   :  { %4896 = vst [vmem:[#allocation29_spill] sm:$0xff] %v4097_v40  ;;  %v799_v53 = vpop.f32.mrf.mxu1  ;;  %v572_v40 = vadd.f32 %v571_v0, %v4035_v18 }
 0x1d4   :  { %v842_v52 = vadd.f32 %v799_v53, %v485_v48 }
 0x1d6   :  { %v846_v57 = vmul.f32 0.5, %v842_v52 }
 0x1d8   :  { %3475 = vtanh.f32 %v846_v57 }
 0x1d9   :  { %v812_v47 = vpop.f32.mrf.mxu2 }
 0x1da   :  { %v843_v58 = vadd.f32 %v812_v47, %v514_v55  ;;  %v825_v59 = vpop.f32.mrf.mxu3 }
 0x1db   :  { %v801_v43 = vpop.f32.mrf.mxu1  ;;  %v844_v29 = vadd.f32 %v825_v59, %v543_v12 }
 0x1dc   :  { %v847_v45 = vmul.f32 0.5, %v843_v58  ;;  %v624_v43 = vld [vmem:[%s4869_s3] sm:$0xff] }
 0x1dd   :  { %v848_v52 = vmul.f32 0.5, %v844_v29 }
 0x1de   :  { %3477 = vtanh.f32 %v847_v45  ;;  %v3476_v62 = vpop.eup %3475 }
 0x1df   :  { %v852_v47 = vmul.f32 0.5, %v3476_v62  ;;  %v4145_v62 = vpop.f32.mrf.mxu0 }
 0x1e0   :  { %4897 = vst [vmem:[#allocation30_spill] sm:$0xff] %v4145_v62 }
 0x1e1   :  { %v814_v36 = vpop.f32.mrf.mxu2  ;;  %v855_v4 = vadd.f32 0.5, %v852_v47 }
 0x1e2   :  { %v827_v20 = vpop.f32.mrf.mxu3 }
 0x1e3   :  { %v838_v41 = vpop.f32.mrf.mxu1 }
 0x1e4   :  { %v3478_v53 = vpop.eup %3477  ;;  %v845_v48 = vadd.f32 %v838_v41, %v572_v40 }
 0x1e5   :  { %v853_v2 = vmul.f32 0.5, %v3478_v53 }
 0x1e6   :  { %3479 = vtanh.f32 %v845_v48 }
 0x1e7   :  { %v856_v55 = vadd.f32 0.5, %v853_v2  ;;  %3481 = vtanh.f32 %v848_v52  ;;  %v487_v2 = vadd.f32 %v4022_v6, %v4031_v15  ;;  %v516_v52 = vadd.f32 %v4029_v13, %v4043_v31 }
 0x1e9   :  { %v859_v57 = vmul.f32 %v856_v55, %v624_v43 }
 0x1eb   :  { %v840_v45 = vpop.f32.mrf.mxu1 }
 0x1ec   :  { %v3480_v36 = vpop.eup %3479  ;;  %v574_v45 = vadd.f32 %v4024_v8, %v4035_v18 }
 0x1ed   :  { %v860_v0 = vmul.f32 %v3480_v36, %v855_v4  ;;  %v3482_v20 = vpop.eup %3481  ;;  %v545_v36 = vadd.f32 %v4033_v17, %v4045_v32 }
 0x1ee   :  { %v854_v41 = vmul.f32 0.5, %v3482_v20 }
 0x1ef   :  { %v4106_v59 = vadd.f32 %v860_v0, %v859_v57 }
 0x1f0   :  { %v857_v29 = vadd.f32 0.5, %v854_v41 }
 0x1f1   :  { %3483 = vtanh.f32 %v4106_v59 }
 0x1f7   :  { %v3484_v40 = vpop.eup %3483 }
 0x1f8   :  { %v4109_v58 = vmul.f32 %v3484_v40, %v857_v29 }
 0x1fa   :  { %v869_v12 = vpack.c.bf16 %v4109_v58, %v4109_v58 }
 0x1fc   :  { %878 = vmatmul.bf16.vlgmr.msra.gmra.mxu2 %v869_v12  ;;  %891 = vmatmul.bf16.vlgmr.msra.gmra.mxu3 %v869_v12 }
 0x1fd   :  { %904 = vmatmul.bf16.vlgmr.msra.gmra.mxu0 %v869_v12  ;;  %917 = vmatmul.bf16.vlgmr.msrb.gmra.mxu1 %v869_v12 }
 0x1fe   :  { %1030 = vmatpush.bf16.msra.mxu2 %v3859_v63  ;;  %1043 = vmatpush.bf16.msra.mxu3 %v3861_v1 }
 0x1ff   :  { %1056 = vmatpush.bf16.msra.mxu0 %v3871_v10  ;;  %1069 = vmatpush.bf16.msrb.mxu1 %v3918_v61 }
 0x202   :  { %1031 = vmatpush.bf16.msra.mxu2 %v3865_v5  ;;  %1044 = vmatpush.bf16.msra.mxu3 %v3867_v7 }
 0x203   :  { %1057 = vmatpush.bf16.msra.mxu0 %v3881_v23  ;;  %1070 = vmatpush.bf16.msrb.mxu1 %v3927_v11 }
 0x206   :  { %1032 = vmatpush.bf16.msra.mxu2 %v3875_v14  ;;  %1045 = vmatpush.bf16.msra.mxu3 %v3877_v16 }
 0x207   :  { %1058 = vmatpush.bf16.msra.mxu0 %v3891_v33  ;;  %1071 = vmatpush.bf16.msrb.mxu1 %v3937_v24 }
 0x20a   :  { %1033 = vmatpush.bf16.msra.mxu2 %v3883_v27  ;;  %1046 = vmatpush.bf16.msra.mxu3 %v3885_v28 }
 0x20b   :  { %1059 = vmatpush.bf16.msra.mxu0 %v3901_v42  ;;  %1072 = vmatpush.bf16.msrb.mxu1 %v3946_v35 }
 0x20e   :  { %1034 = vmatpush.bf16.msra.mxu2 %v3894_v37  ;;  %1047 = vmatpush.bf16.msra.mxu3 %v3897_v39 }
 0x20f   :  { %1060 = vmatpush.bf16.msra.mxu0 %v3914_v56  ;;  %1073 = vmatpush.bf16.msrb.mxu1 %v3953_v21 }
 0x212   :  { %1035 = vmatpush.bf16.msra.mxu2 %v3903_v46  ;;  %1048 = vmatpush.bf16.msra.mxu3 %v3906_v49 }
 0x213   :  { %1061 = vmatpush.bf16.msra.mxu0 %v3925_v9  ;;  %1074 = vmatpush.bf16.msrb.mxu1 %v3958_v44 }
 0x216   :  { %1036 = vmatpush.bf16.msra.mxu2 %v3910_v50  ;;  %1049 = vmatpush.bf16.msra.mxu3 %v3922_v3 }
 0x217   :  { %1062 = vmatpush.bf16.msra.mxu0 %v3934_v26  ;;  %1075 = vmatpush.bf16.msrb.mxu1 %v3964_v51 }
 0x21a   :  { %1037 = vmatpush.bf16.msra.mxu2 %v3916_v60  ;;  %1050 = vmatpush.bf16.msra.mxu3 %v3931_v25 }
 0x21b   :  { %1063 = vmatpush.bf16.msra.mxu0 %v3943_v34  ;;  %1076 = vmatpush.bf16.msrb.mxu1 %v3970_v54 }
 0x27a   :  { %v905_v53 = vpop.f32.mrf.mxu0  ;;  %v918_v48 = vpop.f32.mrf.mxu1 }
 0x27b   :  { %v924_v29 = vadd.f32 %v905_v53, %v545_v36  ;;  %v925_v40 = vadd.f32 %v918_v48, %v574_v45 }
 0x27d   :  { %v928_v12 = vmul.f32 0.5, %v924_v29 }
 0x27f   :  { %v879_v47 = vpop.f32.mrf.mxu2  ;;  %v892_v55 = vpop.f32.mrf.mxu3 }
 0x280   :  { %v922_v43 = vadd.f32 %v879_v47, %v487_v2  ;;  %v923_v4 = vadd.f32 %v892_v55, %v516_v52 }
 0x282   :  { %v926_v57 = vmul.f32 0.5, %v922_v43  ;;  %v927_v0 = vmul.f32 0.5, %v923_v4  ;;  %v907_v20 = vpop.f32.mrf.mxu0  ;;  %v920_v41 = vpop.f32.mrf.mxu1 }
 0x284   :  { %3485 = vtanh.f32 %v926_v57 }
 0x285   :  { %3487 = vtanh.f32 %v927_v0 }
 0x286   :  { %3489 = vtanh.f32 %v925_v40 }
 0x287   :  { %v881_v6 = vpop.f32.mrf.mxu2  ;;  %v894_v13 = vpop.f32.mrf.mxu3  ;;  %3491 = vtanh.f32 %v928_v12 }
 0x28a   :  { %v3486_v2 = vpop.eup %3485 }
 0x28b   :  { %v3488_v52 = vpop.eup %3487  ;;  %v932_v47 = vmul.f32 0.5, %v3486_v2 }
 0x28c   :  { %v933_v8 = vmul.f32 0.5, %v3488_v52  ;;  %v3490_v62 = vpop.eup %3489 }
 0x28d   :  { %v935_v55 = vadd.f32 0.5, %v932_v47  ;;  %v3492_v20 = vpop.eup %3491 }
 0x28e   :  { %v936_v17 = vadd.f32 0.5, %v933_v8  ;;  %v934_v48 = vmul.f32 0.5, %v3492_v20 }
 0x28f   :  { %v940_v43 = vmul.f32 %v3490_v62, %v935_v55 }
 0x290   :  { %v939_v4 = vmul.f32 %v936_v17, %v4106_v59  ;;  %v937_v45 = vadd.f32 0.5, %v934_v48 }
 0x292   :  { %v4156_v53 = vadd.f32 %v940_v43, %v939_v4 }
 0x294   :  { %3493 = vtanh.f32 %v4156_v53 }
 0x29a   :  { %v3494_v36 = vpop.eup %3493 }
 0x29b   :  { %v4159_v57 = vmul.f32 %v3494_v36, %v937_v45 }
 0x29d   :  { %v949_v0 = vpack.c.bf16 %v4159_v57, %v4159_v57 }
 0x29f   :  { %958 = vmatmul.bf16.vlgmr.msrb.gmra.mxu2 %v949_v0  ;;  %971 = vmatmul.bf16.vlgmr.msrb.gmra.mxu3 %v949_v0 }
 0x2a0   :  { %984 = vmatmul.bf16.vlgmr.msrb.gmra.mxu0 %v949_v0  ;;  %997 = vmatmul.bf16.vlgmr.msra.gmra.mxu1 %v949_v0 }
 0x2a1   :  { %1110 = vmatpush.bf16.msrb.mxu2 %v3859_v63  ;;  %1123 = vmatpush.bf16.msrb.mxu3 %v3861_v1 }
 0x2a2   :  { %1136 = vmatpush.bf16.msrb.mxu0 %v3871_v10  ;;  %1149 = vmatpush.bf16.msra.mxu1 %v3918_v61 }
 0x2a5   :  { %1111 = vmatpush.bf16.msrb.mxu2 %v3865_v5  ;;  %1124 = vmatpush.bf16.msrb.mxu3 %v3867_v7 }
 0x2a6   :  { %1137 = vmatpush.bf16.msrb.mxu0 %v3881_v23  ;;  %1150 = vmatpush.bf16.msra.mxu1 %v3927_v11 }
 0x2a9   :  { %1112 = vmatpush.bf16.msrb.mxu2 %v3875_v14  ;;  %1125 = vmatpush.bf16.msrb.mxu3 %v3877_v16 }
 0x2aa   :  { %1138 = vmatpush.bf16.msrb.mxu0 %v3891_v33  ;;  %1151 = vmatpush.bf16.msra.mxu1 %v3937_v24 }
 0x2ad   :  { %1113 = vmatpush.bf16.msrb.mxu2 %v3883_v27  ;;  %1126 = vmatpush.bf16.msrb.mxu3 %v3885_v28 }
 0x2ae   :  { %1139 = vmatpush.bf16.msrb.mxu0 %v3901_v42  ;;  %1152 = vmatpush.bf16.msra.mxu1 %v3946_v35 }
 0x2b1   :  { %1114 = vmatpush.bf16.msrb.mxu2 %v3894_v37  ;;  %1127 = vmatpush.bf16.msrb.mxu3 %v3897_v39 }
 0x2b2   :  { %1140 = vmatpush.bf16.msrb.mxu0 %v3914_v56  ;;  %1153 = vmatpush.bf16.msra.mxu1 %v3953_v21 }
 0x2b5   :  { %1115 = vmatpush.bf16.msrb.mxu2 %v3903_v46  ;;  %1128 = vmatpush.bf16.msrb.mxu3 %v3906_v49 }
 0x2b6   :  { %1141 = vmatpush.bf16.msrb.mxu0 %v3925_v9  ;;  %1154 = vmatpush.bf16.msra.mxu1 %v3958_v44 }
 0x2b9   :  { %1116 = vmatpush.bf16.msrb.mxu2 %v3910_v50  ;;  %1129 = vmatpush.bf16.msrb.mxu3 %v3922_v3 }
 0x2ba   :  { %1142 = vmatpush.bf16.msrb.mxu0 %v3934_v26  ;;  %1155 = vmatpush.bf16.msra.mxu1 %v3964_v51 }
 0x2bd   :  { %1117 = vmatpush.bf16.msrb.mxu2 %v3916_v60  ;;  %1130 = vmatpush.bf16.msrb.mxu3 %v3931_v25 }
 0x2be   :  { %1143 = vmatpush.bf16.msrb.mxu0 %v3943_v34  ;;  %1156 = vmatpush.bf16.msra.mxu1 %v3970_v54 }
 0x31d   :  { %v985_v59 = vpop.f32.mrf.mxu0  ;;  %v998_v62 = vpop.f32.mrf.mxu1 }
 0x31e   :  { %v1004_v47 = vadd.f32 %v985_v59, %v4051_v19  ;;  %v1005_v8 = vadd.f32 %v998_v62, %v4041_v30 }
 0x320   :  { %v1008_v43 = vmul.f32 0.5, %v1004_v47 }
 0x322   :  { %v959_v41 = vpop.f32.mrf.mxu2  ;;  %v972_v29 = vpop.f32.mrf.mxu3 }
 0x323   :  { %v1002_v40 = vadd.f32 %v959_v41, %v4038_v22  ;;  %v1003_v6 = vadd.f32 %v972_v29, %v4048_v38 }
 0x325   :  { %v1006_v13 = vmul.f32 0.5, %v1002_v40  ;;  %v1007_v12 = vmul.f32 0.5, %v1003_v6  ;;  %v987_v2 = vpop.f32.mrf.mxu0  ;;  %v1000_v52 = vpop.f32.mrf.mxu1 }
 0x326   :  { %v4899_v52 = vld [vmem:[#allocation13_spill] sm:$0xff] }
 0x327   :  { %3495 = vtanh.f32 %v1006_v13  ;;  %v521_v47 = vadd.f32 %v4899_v52, %v4043_v31 }
 0x328   :  { %3497 = vtanh.f32 %v1007_v12  ;;  %v4898_v12 = vld [vmem:[#allocation11_spill] sm:$0xff] }
 0x329   :  { %3499 = vtanh.f32 %v1005_v8  ;;  %v492_v2 = vadd.f32 %v4898_v12, %v4031_v15 }
 0x32a   :  { %v961_v55 = vpop.f32.mrf.mxu2  ;;  %v974_v17 = vpop.f32.mrf.mxu3  ;;  %3501 = vtanh.f32 %v1008_v43 }
 0x32d   :  { %v3496_v4 = vpop.eup %3495 }
 0x32e   :  { %v3498_v20 = vpop.eup %3497  ;;  %v1012_v48 = vmul.f32 0.5, %v3496_v4  ;;  %v4900_v4 = vld [vmem:[#allocation12_spill] sm:$0xff] }
 0x32f   :  { %v1013_v22 = vmul.f32 0.5, %v3498_v20  ;;  %v3500_v45 = vpop.eup %3499  ;;  %v579_v20 = vadd.f32 %v4900_v4, %v4035_v18 }
 0x330   :  { %v1015_v38 = vadd.f32 0.5, %v1012_v48  ;;  %v3502_v19 = vpop.eup %3501  ;;  %v4901_v48 = vld [vmem:[#allocation14_spill] sm:$0xff] }
 0x331   :  { %v1016_v36 = vadd.f32 0.5, %v1013_v22  ;;  %v1014_v30 = vmul.f32 0.5, %v3502_v19  ;;  %v550_v22 = vadd.f32 %v4901_v48, %v4045_v32 }
 0x332   :  { %v1020_v0 = vmul.f32 %v3500_v45, %v1015_v38 }
 0x333   :  { %v1019_v41 = vmul.f32 %v1016_v36, %v4156_v53  ;;  %v1017_v62 = vadd.f32 0.5, %v1014_v30 }
 0x335   :  { %v4200_v59 = vadd.f32 %v1020_v0, %v1019_v41 }
 0x337   :  { %3503 = vtanh.f32 %v4200_v59 }
 0x33d   :  { %v3504_v29 = vpop.eup %3503 }
 0x33e   :  { %v4203_v40 = vmul.f32 %v3504_v29, %v1017_v62 }
 0x340   :  { %v1029_v6 = vpack.c.bf16 %v4203_v40, %v4203_v40 }
 0x342   :  { %1038 = vmatmul.bf16.vlgmr.msra.gmra.mxu2 %v1029_v6  ;;  %1051 = vmatmul.bf16.vlgmr.msra.gmra.mxu3 %v1029_v6 }
 0x343   :  { %1064 = vmatmul.bf16.vlgmr.msra.gmra.mxu0 %v1029_v6  ;;  %1077 = vmatmul.bf16.vlgmr.msrb.gmra.mxu1 %v1029_v6 }
 0x344   :  { %1190 = vmatpush.bf16.msra.mxu2 %v3859_v63  ;;  %1203 = vmatpush.bf16.msra.mxu3 %v3861_v1 }
 0x345   :  { %1216 = vmatpush.bf16.msra.mxu0 %v3871_v10  ;;  %1229 = vmatpush.bf16.msrb.mxu1 %v3918_v61 }
 0x348   :  { %1191 = vmatpush.bf16.msra.mxu2 %v3865_v5  ;;  %1204 = vmatpush.bf16.msra.mxu3 %v3867_v7 }
 0x349   :  { %1217 = vmatpush.bf16.msra.mxu0 %v3881_v23  ;;  %1230 = vmatpush.bf16.msrb.mxu1 %v3927_v11 }
 0x34c   :  { %1192 = vmatpush.bf16.msra.mxu2 %v3875_v14  ;;  %1205 = vmatpush.bf16.msra.mxu3 %v3877_v16 }
 0x34d   :  { %1218 = vmatpush.bf16.msra.mxu0 %v3891_v33  ;;  %1231 = vmatpush.bf16.msrb.mxu1 %v3937_v24 }
 0x350   :  { %1193 = vmatpush.bf16.msra.mxu2 %v3883_v27  ;;  %1206 = vmatpush.bf16.msra.mxu3 %v3885_v28 }
 0x351   :  { %1219 = vmatpush.bf16.msra.mxu0 %v3901_v42  ;;  %1232 = vmatpush.bf16.msrb.mxu1 %v3946_v35 }
 0x354   :  { %1194 = vmatpush.bf16.msra.mxu2 %v3894_v37  ;;  %1207 = vmatpush.bf16.msra.mxu3 %v3897_v39 }
 0x355   :  { %1220 = vmatpush.bf16.msra.mxu0 %v3914_v56  ;;  %1233 = vmatpush.bf16.msrb.mxu1 %v3953_v21 }
 0x358   :  { %1195 = vmatpush.bf16.msra.mxu2 %v3903_v46  ;;  %1208 = vmatpush.bf16.msra.mxu3 %v3906_v49 }
 0x359   :  { %1221 = vmatpush.bf16.msra.mxu0 %v3925_v9  ;;  %1234 = vmatpush.bf16.msrb.mxu1 %v3958_v44 }
 0x35c   :  { %1196 = vmatpush.bf16.msra.mxu2 %v3910_v50  ;;  %1209 = vmatpush.bf16.msra.mxu3 %v3922_v3 }
 0x35d   :  { %1222 = vmatpush.bf16.msra.mxu0 %v3934_v26  ;;  %1235 = vmatpush.bf16.msrb.mxu1 %v3964_v51 }
 0x360   :  { %1197 = vmatpush.bf16.msra.mxu2 %v3916_v60  ;;  %1210 = vmatpush.bf16.msra.mxu3 %v3931_v25 }
 0x361   :  { %1223 = vmatpush.bf16.msra.mxu0 %v3943_v34  ;;  %1236 = vmatpush.bf16.msrb.mxu1 %v3970_v54 }
 0x3c0   :  { %v1065_v53 = vpop.f32.mrf.mxu0  ;;  %v1078_v13 = vpop.f32.mrf.mxu1 }
 0x3c1   :  { %v1084_v41 = vadd.f32 %v1065_v53, %v550_v22  ;;  %v1085_v19 = vadd.f32 %v1078_v13, %v579_v20 }
 0x3c3   :  { %v1088_v29 = vmul.f32 0.5, %v1084_v41  ;;  %v4902_v41 = vld [vmem:[#allocation15_spill] sm:$0xff] }
 0x3c5   :  { %v1039_v8 = vpop.f32.mrf.mxu2  ;;  %v1052_v55 = vpop.f32.mrf.mxu3 }
 0x3c6   :  { %v1082_v17 = vadd.f32 %v1039_v8, %v492_v2  ;;  %v1083_v43 = vadd.f32 %v1052_v55, %v521_v47 }
 0x3c8   :  { %v1086_v38 = vmul.f32 0.5, %v1082_v17  ;;  %v1087_v45 = vmul.f32 0.5, %v1083_v43  ;;  %v1067_v36 = vpop.f32.mrf.mxu0  ;;  %v1080_v0 = vpop.f32.mrf.mxu1 }
 0x3ca   :  { %3505 = vtanh.f32 %v1086_v38 }
 0x3cb   :  { %3507 = vtanh.f32 %v1087_v45 }
 0x3cc   :  { %3509 = vtanh.f32 %v1085_v19 }
 0x3cd   :  { %v1041_v30 = vpop.f32.mrf.mxu2  ;;  %v1054_v62 = vpop.f32.mrf.mxu3  ;;  %3511 = vtanh.f32 %v1088_v29 }
 0x3ce   :  { %v4903_v30 = vld [vmem:[#allocation17_spill] sm:$0xff] }
 0x3d0   :  { %v3506_v6 = vpop.eup %3505 }
 0x3d1   :  { %v3508_v12 = vpop.eup %3507  ;;  %v1092_v2 = vmul.f32 0.5, %v3506_v6 }
 0x3d2   :  { %v1093_v52 = vmul.f32 0.5, %v3508_v12  ;;  %v3510_v8 = vpop.eup %3509 }
 0x3d3   :  { %v1095_v47 = vadd.f32 0.5, %v1092_v2  ;;  %v3512_v4 = vpop.eup %3511 }
 0x3d4   :  { %v1096_v55 = vadd.f32 0.5, %v1093_v52  ;;  %v1094_v13 = vmul.f32 0.5, %v3512_v4  ;;  %v4904_v52 = vld [vmem:[#allocation18_spill] sm:$0xff] }
 0x3d5   :  { %v1100_v17 = vmul.f32 %v3510_v8, %v1095_v47  ;;  %v4905_v8 = vld [vmem:[#allocation16_spill] sm:$0xff] }
 0x3d6   :  { %v1099_v43 = vmul.f32 %v1096_v55, %v4200_v59  ;;  %v1097_v20 = vadd.f32 0.5, %v1094_v13 }
 0x3d8   :  { %v4248_v53 = vadd.f32 %v1100_v17, %v1099_v43 }
 0x3da   :  { %3513 = vtanh.f32 %v4248_v53 }
 0x3e0   :  { %v3514_v48 = vpop.eup %3513 }
 0x3e1   :  { %v4251_v22 = vmul.f32 %v3514_v48, %v1097_v20 }
 0x3e3   :  { %v1109_v38 = vpack.c.bf16 %v4251_v22, %v4251_v22 }
 0x3e5   :  { %1118 = vmatmul.bf16.vlgmr.msrb.gmra.mxu2 %v1109_v38  ;;  %1131 = vmatmul.bf16.vlgmr.msrb.gmra.mxu3 %v1109_v38 }
 0x3e6   :  { %1144 = vmatmul.bf16.vlgmr.msrb.gmra.mxu0 %v1109_v38  ;;  %1157 = vmatmul.bf16.vlgmr.msra.gmra.mxu1 %v1109_v38 }
 0x3e7   :  { %1270 = vmatpush.bf16.msrb.mxu2 %v3859_v63  ;;  %1283 = vmatpush.bf16.msrb.mxu3 %v3861_v1 }
 0x3e8   :  { %1296 = vmatpush.bf16.msrb.mxu0 %v3871_v10  ;;  %1309 = vmatpush.bf16.msra.mxu1 %v3918_v61 }
 0x3eb   :  { %1271 = vmatpush.bf16.msrb.mxu2 %v3865_v5  ;;  %1284 = vmatpush.bf16.msrb.mxu3 %v3867_v7 }
 0x3ec   :  { %1297 = vmatpush.bf16.msrb.mxu0 %v3881_v23  ;;  %1310 = vmatpush.bf16.msra.mxu1 %v3927_v11 }
 0x3ef   :  { %1272 = vmatpush.bf16.msrb.mxu2 %v3875_v14  ;;  %1285 = vmatpush.bf16.msrb.mxu3 %v3877_v16 }
 0x3f0   :  { %1298 = vmatpush.bf16.msrb.mxu0 %v3891_v33  ;;  %1311 = vmatpush.bf16.msra.mxu1 %v3937_v24 }
 0x3f3   :  { %1273 = vmatpush.bf16.msrb.mxu2 %v3883_v27  ;;  %1286 = vmatpush.bf16.msrb.mxu3 %v3885_v28 }
 0x3f4   :  { %1299 = vmatpush.bf16.msrb.mxu0 %v3901_v42  ;;  %1312 = vmatpush.bf16.msra.mxu1 %v3946_v35 }
 0x3f7   :  { %1274 = vmatpush.bf16.msrb.mxu2 %v3894_v37  ;;  %1287 = vmatpush.bf16.msrb.mxu3 %v3897_v39 }
 0x3f8   :  { %1300 = vmatpush.bf16.msrb.mxu0 %v3914_v56  ;;  %1313 = vmatpush.bf16.msra.mxu1 %v3953_v21 }
 0x3fb   :  { %1275 = vmatpush.bf16.msrb.mxu2 %v3903_v46  ;;  %1288 = vmatpush.bf16.msrb.mxu3 %v3906_v49 }
 0x3fc   :  { %1301 = vmatpush.bf16.msrb.mxu0 %v3925_v9  ;;  %1314 = vmatpush.bf16.msra.mxu1 %v3958_v44 }
 0x3ff   :  { %1276 = vmatpush.bf16.msrb.mxu2 %v3910_v50  ;;  %1289 = vmatpush.bf16.msrb.mxu3 %v3922_v3 }
 0x400   :  { %1302 = vmatpush.bf16.msrb.mxu0 %v3934_v26  ;;  %1315 = vmatpush.bf16.msra.mxu1 %v3964_v51 }
 0x403   :  { %1277 = vmatpush.bf16.msrb.mxu2 %v3916_v60  ;;  %1290 = vmatpush.bf16.msrb.mxu3 %v3931_v25 }
 0x404   :  { %1303 = vmatpush.bf16.msrb.mxu0 %v3943_v34  ;;  %1316 = vmatpush.bf16.msra.mxu1 %v3970_v54 }
 0x463   :  { %v1145_v59 = vpop.f32.mrf.mxu0  ;;  %v1158_v45 = vpop.f32.mrf.mxu1 }
 0x464   :  { %v1164_v47 = vadd.f32 %v1145_v59, %v4904_v52  ;;  %v1165_v55 = vadd.f32 %v1158_v45, %v4905_v8 }
 0x466   :  { %v1168_v4 = vmul.f32 0.5, %v1164_v47 }
 0x468   :  { %v1119_v36 = vpop.f32.mrf.mxu2  ;;  %v1132_v0 = vpop.f32.mrf.mxu3 }
 0x469   :  { %v1162_v19 = vadd.f32 %v1119_v36, %v4902_v41  ;;  %v1163_v62 = vadd.f32 %v1132_v0, %v4903_v30 }
 0x46b   :  { %v1166_v29 = vmul.f32 0.5, %v1162_v19  ;;  %v1167_v6 = vmul.f32 0.5, %v1163_v62  ;;  %v1147_v12 = vpop.f32.mrf.mxu0  ;;  %v1160_v2 = vpop.f32.mrf.mxu1 }
 0x46d   :  { %3515 = vtanh.f32 %v1166_v29 }
 0x46e   :  { %3517 = vtanh.f32 %v1167_v6 }
 0x46f   :  { %3519 = vtanh.f32 %v1165_v55 }
 0x470   :  { %v1121_v17 = vpop.f32.mrf.mxu2  ;;  %v1134_v43 = vpop.f32.mrf.mxu3  ;;  %3521 = vtanh.f32 %v1168_v4  ;;  %v3140_v4 = vld [vmem:[#allocation4 + $0x1e0] sm:$0xf] }
 0x473   :  { %v3516_v13 = vpop.eup %3515 }
 0x474   :  { %v3518_v20 = vpop.eup %3517  ;;  %v1172_v48 = vmul.f32 0.5, %v3516_v13  ;;  %v3452_v13 = vld [vmem:[#allocation4 + $0x1ec] sm:$0xf0] }
 0x475   :  { %v1173_v38 = vmul.f32 0.5, %v3518_v20  ;;  %v3520_v0 = vpop.eup %3519  ;;  %v3450_v20 = vld [vmem:[#allocation4 + $0x1e4] sm:$0xf] }
 0x476   :  { %v1175_v36 = vadd.f32 0.5, %v1172_v48  ;;  %v3522_v59 = vpop.eup %3521  ;;  %v3141_v48 = vor.u32 %v3452_v13, %v3140_v4 }
 0x477   :  { %v1176_v41 = vadd.f32 0.5, %v1173_v38  ;;  %v1174_v45 = vmul.f32 0.5, %v3522_v59  ;;  %v3142_v38 = vld [vmem:[#allocation4 + $0x1f0] sm:$0xf0]  ;;  %v3150_v59 = vld [vmem:[#allocation4 + $0x1f8] sm:$0xf0] }
 0x478   :  { %v1180_v19 = vmul.f32 %v3520_v0, %v1175_v36  ;;  %v3148_v36 = vld [vmem:[#allocation4 + $0x1e8] sm:$0xf]  ;;  %v3453_v0 = vld [vmem:[#allocation4 + $0x1f4] sm:$0xf0] }
 0x479   :  { %v1179_v30 = vmul.f32 %v1176_v41, %v4248_v53  ;;  %v1177_v29 = vadd.f32 0.5, %v1174_v45  ;;  %v3145_v41 = vor.u32 %v3450_v20, %v3142_v38  ;;  %v3124_v45 = vld [vmem:[#allocation4 + $0x1c0] sm:$0xf]  ;;  %v3084_v38 = vld [vmem:[#allocation4 + $0x168] sm:$0xf] }
 0x47b   :  { %v4292_v62 = vadd.f32 %v1180_v19, %v1179_v30  ;;  %v3149_v19 = vor.u32 %v3453_v0, %v3148_v36  ;;  %v3451_v30 = vld [vmem:[#allocation4 + $0x1ec] sm:$0xf]  ;;  %v3437_v36 = vld [vmem:[#allocation4 + $0x174] sm:$0xf0]  ;;  %v4910_v0 = vld [vmem:[#allocation23_spill] sm:$0xff] }
 0x47d   :  { %3523 = vtanh.f32 %v4292_v62 }
 0x483   :  { %v3524_v6 = vpop.eup %3523 }
 0x484   :  { %v4295_v12 = vmul.f32 %v3524_v6, %v1177_v29  ;;  %v3448_v29 = vld [vmem:[#allocation4 + $0x1cc] sm:$0xf0]  ;;  %v3446_v6 = vld [vmem:[#allocation4 + $0x1c4] sm:$0xf] }
 0x486   :  { %v1189_v2 = vpack.c.bf16 %v4295_v12, %v4295_v12 }
 0x488   :  { %1198 = vmatmul.bf16.vlgmr.msra.gmra.mxu2 %v1189_v2  ;;  %1211 = vmatmul.bf16.vlgmr.msra.gmra.mxu3 %v1189_v2 }
 0x489   :  { %1224 = vmatmul.bf16.vlgmr.msra.gmra.mxu0 %v1189_v2  ;;  %1237 = vmatmul.bf16.vlgmr.msrb.gmra.mxu1 %v1189_v2  ;;  %v3125_v2 = vor.u32 %v3448_v29, %v3124_v45  ;;  %v3435_v45 = vld [vmem:[#allocation4 + $0x16c] sm:$0xf]  ;;  %v3086_v29 = vld [vmem:[#allocation4 + $0x178] sm:$0xf0] }
 0x48a   :  { %1350 = vmatpush.bf16.msra.mxu2 %v3859_v63  ;;  %1363 = vmatpush.bf16.msra.mxu3 %v3861_v1 }
 0x48b   :  { %1376 = vmatpush.bf16.msra.mxu0 %v3871_v10  ;;  %1389 = vmatpush.bf16.msrb.mxu1 %v3918_v61  ;;  %v4907_v10 = vld [vmem:[#allocation21_spill] sm:$0xff] }
 0x48e   :  { %1351 = vmatpush.bf16.msra.mxu2 %v3865_v5  ;;  %1364 = vmatpush.bf16.msra.mxu3 %v3867_v7  ;;  %v4906_v5 = vld [vmem:[#allocation19_spill] sm:$0xff] }
 0x48f   :  { %1377 = vmatpush.bf16.msra.mxu0 %v3881_v23  ;;  %1390 = vmatpush.bf16.msrb.mxu1 %v3927_v11  ;;  %v497_v7 = vadd.f32 %v4906_v5, %v4031_v15  ;;  %v3449_v5 = vld [vmem:[#allocation4 + $0x1d4] sm:$0xf0] }
 0x492   :  { %1352 = vmatpush.bf16.msra.mxu2 %v3875_v14  ;;  %1365 = vmatpush.bf16.msra.mxu3 %v3877_v16  ;;  %v526_v14 = vadd.f32 %v4907_v10, %v4043_v31 }
 0x493   :  { %1378 = vmatpush.bf16.msra.mxu0 %v3891_v33  ;;  %1391 = vmatpush.bf16.msrb.mxu1 %v3937_v24  ;;  %v4908_v33 = vld [vmem:[#allocation20_spill] sm:$0xff] }
 0x496   :  { %1353 = vmatpush.bf16.msra.mxu2 %v3883_v27  ;;  %1366 = vmatpush.bf16.msra.mxu3 %v3885_v28 }
 0x497   :  { %1379 = vmatpush.bf16.msra.mxu0 %v3901_v42  ;;  %1392 = vmatpush.bf16.msrb.mxu1 %v3946_v35 }
 0x49a   :  { %1354 = vmatpush.bf16.msra.mxu2 %v3894_v37  ;;  %1367 = vmatpush.bf16.msra.mxu3 %v3897_v39  ;;  %v584_v37 = vadd.f32 %v4908_v33, %v4035_v18  ;;  %v4909_v39 = vld [vmem:[#allocation22_spill] sm:$0xff]  ;;  %v3442_v33 = vld [vmem:[#allocation4 + $0x1a4] sm:$0xf] }
 0x49b   :  { %1380 = vmatpush.bf16.msra.mxu0 %v3914_v56  ;;  %1393 = vmatpush.bf16.msrb.mxu1 %v3953_v21  ;;  %v555_v42 = vadd.f32 %v4909_v39, %v4045_v32  ;;  %v3110_v39 = vld [vmem:[#allocation4 + $0x1b0] sm:$0xf0] }
 0x49e   :  { %1355 = vmatpush.bf16.msra.mxu2 %v3903_v46  ;;  %1368 = vmatpush.bf16.msra.mxu3 %v3906_v49 }
 0x49f   :  { %1381 = vmatpush.bf16.msra.mxu0 %v3925_v9  ;;  %1394 = vmatpush.bf16.msrb.mxu1 %v3958_v44 }
 0x4a2   :  { %1356 = vmatpush.bf16.msra.mxu2 %v3910_v50  ;;  %1369 = vmatpush.bf16.msra.mxu3 %v3922_v3 }
 0x4a3   :  { %1382 = vmatpush.bf16.msra.mxu0 %v3934_v26  ;;  %1395 = vmatpush.bf16.msrb.mxu1 %v3964_v51 }
 0x4a6   :  { %1357 = vmatpush.bf16.msra.mxu2 %v3916_v60  ;;  %1370 = vmatpush.bf16.msra.mxu3 %v3931_v25 }
 0x4a7   :  { %1383 = vmatpush.bf16.msra.mxu0 %v3943_v34  ;;  %1396 = vmatpush.bf16.msrb.mxu1 %v3970_v54 }
 0x506   :  { %v1225_v63 = vpop.f32.mrf.mxu0  ;;  %v1238_v1 = vpop.f32.mrf.mxu1 }
 0x507   :  { %v1244_v60 = vadd.f32 %v1225_v63, %v555_v42  ;;  %v1245_v61 = vadd.f32 %v1238_v1, %v584_v37  ;;  %v3126_v63 = vld [vmem:[#allocation4 + $0x1d0] sm:$0xf0]  ;;  %v3132_v1 = vld [vmem:[#allocation4 + $0x1c8] sm:$0xf] }
 0x508   :  { %v3133_v10 = vor.u32 %v3449_v5, %v3132_v1  ;;  %v3116_v42 = vld [vmem:[#allocation4 + $0x1a8] sm:$0xf]  ;;  %v3430_v1 = vld [vmem:[#allocation4 + $0x144] sm:$0xf]  ;;  %v3062_v5 = vld [vmem:[#allocation4 + $0x150] sm:$0xf0] }
 0x509   :  { %v1248_v11 = vmul.f32 0.5, %v1244_v60  ;;  %v3118_v60 = vld [vmem:[#allocation4 + $0x1b8] sm:$0xf0] }
 0x50b   :  { %v1199_v16 = vpop.f32.mrf.mxu2  ;;  %v1212_v23 = vpop.f32.mrf.mxu3 }
 0x50c   :  { %v1242_v27 = vadd.f32 %v1199_v16, %v497_v7  ;;  %v1243_v28 = vadd.f32 %v1212_v23, %v526_v14  ;;  %v3129_v7 = vor.u32 %v3446_v6, %v3126_v63  ;;  %v3447_v14 = vld [vmem:[#allocation4 + $0x1cc] sm:$0xf]  ;;  %v3134_v16 = vld [vmem:[#allocation4 + $0x1d8] sm:$0xf0]  ;;  %v3060_v6 = vld [vmem:[#allocation4 + $0x140] sm:$0xf] }
 0x50d   :  { %v3137_v23 = vor.u32 %v3447_v14, %v3134_v16  ;;  %v3432_v63 = vld [vmem:[#allocation4 + $0x14c] sm:$0xf0] }
 0x50e   :  { %v1246_v46 = vmul.f32 0.5, %v1242_v27  ;;  %v1247_v49 = vmul.f32 0.5, %v1243_v28  ;;  %v1227_v50 = vpop.f32.mrf.mxu0  ;;  %v1240_v56 = vpop.f32.mrf.mxu1  ;;  %v3108_v27 = vld [vmem:[#allocation4 + $0x1a0] sm:$0xf]  ;;  %v3444_v28 = vld [vmem:[#allocation4 + $0x1ac] sm:$0xf0] }
 0x50f   :  { %v3109_v37 = vor.u32 %v3444_v28, %v3108_v27  ;;  %v3443_v56 = vld [vmem:[#allocation4 + $0x1ac] sm:$0xf]  ;;  %v3065_v27 = vor.u32 %v3430_v1, %v3062_v5  ;;  %v3068_v28 = vld [vmem:[#allocation4 + $0x148] sm:$0xf] }
 0x510   :  { %3525 = vtanh.f32 %v1246_v46  ;;  %v3445_v46 = vld [vmem:[#allocation4 + $0x1b4] sm:$0xf0] }
 0x511   :  { %3527 = vtanh.f32 %v1247_v49  ;;  %v3113_v49 = vor.u32 %v3442_v33, %v3110_v39  ;;  %v3117_v50 = vor.u32 %v3445_v46, %v3116_v42  ;;  %v3433_v33 = vld [vmem:[#allocation4 + $0x154] sm:$0xf0]  ;;  %v3431_v39 = vld [vmem:[#allocation4 + $0x14c] sm:$0xf]  ;;  %v3070_v42 = vld [vmem:[#allocation4 + $0x158] sm:$0xf0] }
 0x512   :  { %3529 = vtanh.f32 %v1245_v61  ;;  %v3092_v61 = vld [vmem:[#allocation4 + $0x180] sm:$0xf] }
 0x513   :  { %v1201_v3 = vpop.f32.mrf.mxu2  ;;  %v1214_v9 = vpop.f32.mrf.mxu3  ;;  %3531 = vtanh.f32 %v1248_v11  ;;  %v3438_v11 = vld [vmem:[#allocation4 + $0x184] sm:$0xf]  ;;  %v3044_v46 = vld [vmem:[#allocation4 + $0x120] sm:$0xf] }
 0x514   :  { %v3121_v3 = vor.u32 %v3443_v56, %v3118_v60  ;;  %v3440_v9 = vld [vmem:[#allocation4 + $0x18c] sm:$0xf0]  ;;  %v4913_v56 = vld [vmem:[#allocation24_spill] sm:$0xff] }
 0x516   :  { %v3526_v25 = vpop.eup %3525 }
 0x517   :  { %v3528_v26 = vpop.eup %3527  ;;  %v1252_v24 = vmul.f32 0.5, %v3526_v25  ;;  %v3094_v25 = vld [vmem:[#allocation4 + $0x190] sm:$0xf0] }
 0x518   :  { %v1253_v34 = vmul.f32 0.5, %v3528_v26  ;;  %v3530_v21 = vpop.eup %3529  ;;  %v3093_v26 = vor.u32 %v3440_v9, %v3092_v61  ;;  %v3073_v61 = vor.u32 %v3431_v39, %v3070_v42  ;;  %v3426_v9 = vld [vmem:[#allocation4 + $0x124] sm:$0xf]  ;;  %v3272_v42 = vld [vmem:[#allocation6 + $0x1f0] sm:$0xf0] }
 0x519   :  { %v1255_v35 = vadd.f32 0.5, %v1252_v24  ;;  %v3532_v53 = vpop.eup %3531  ;;  %v3100_v24 = vld [vmem:[#allocation4 + $0x188] sm:$0xf] }
 0x51a   :  { %v1256_v44 = vadd.f32 0.5, %v1253_v34  ;;  %v1254_v47 = vmul.f32 0.5, %v3532_v53  ;;  %v3441_v34 = vld [vmem:[#allocation4 + $0x194] sm:$0xf0] }
 0x51b   :  { %v1260_v51 = vmul.f32 %v3530_v21, %v1255_v35  ;;  %v3439_v35 = vld [vmem:[#allocation4 + $0x18c] sm:$0xf]  ;;  %v3097_v21 = vor.u32 %v3438_v11, %v3094_v25  ;;  %v3046_v11 = vld [vmem:[#allocation4 + $0x130] sm:$0xf0] }
 0x51c   :  { %v1259_v54 = vmul.f32 %v1256_v44, %v4292_v62  ;;  %v1257_v8 = vadd.f32 0.5, %v1254_v47  ;;  %v3153_v62 = vor.u32 %v3451_v30, %v3150_v59  ;;  %v3101_v44 = vor.u32 %v3441_v34, %v3100_v24  ;;  %v3429_v24 = vld [vmem:[#allocation4 + $0x134] sm:$0xf0]  ;;  %v3427_v34 = vld [vmem:[#allocation4 + $0x12c] sm:$0xf] }
 0x51e   :  { %v4340_v52 = vadd.f32 %v1260_v51, %v1259_v54  ;;  %v3102_v51 = vld [vmem:[#allocation4 + $0x198] sm:$0xf0] }
 0x51f   :  { %v3105_v47 = vor.u32 %v3439_v35, %v3102_v51  ;;  %v3049_v35 = vor.u32 %v3426_v9, %v3046_v11  ;;  %v3028_v51 = vld [vmem:[#allocation4 + $0x100] sm:$0xf]  ;;  %v3419_v9 = vld [vmem:[#allocation6 + $0x1ec] sm:$0xf]  ;;  %v3280_v11 = vld [vmem:[#allocation6 + $0x1f8] sm:$0xf0] }
 0x520   :  { %3533 = vtanh.f32 %v4340_v52 }
 0x526   :  { %v3534_v55 = vpop.eup %3533 }
 0x527   :  { %v4343_v17 = vmul.f32 %v3534_v55, %v1257_v8  ;;  %v3076_v8 = vld [vmem:[#allocation4 + $0x160] sm:$0xf]  ;;  %v3436_v55 = vld [vmem:[#allocation4 + $0x16c] sm:$0xf0] }
 0x528   :  { %v3077_v20 = vor.u32 %v3436_v55, %v3076_v8  ;;  %v3424_v8 = vld [vmem:[#allocation4 + $0x10c] sm:$0xf0]  ;;  %v3422_v55 = vld [vmem:[#allocation4 + $0x104] sm:$0xf] }
 0x529   :  { %v1269_v43 = vpack.c.bf16 %v4343_v17, %v4343_v17 }
 0x52b   :  { %1278 = vmatmul.bf16.vlgmr.msrb.gmra.mxu2 %v1269_v43  ;;  %1291 = vmatmul.bf16.vlgmr.msrb.gmra.mxu3 %v1269_v43 }
 0x52c   :  { %1304 = vmatmul.bf16.vlgmr.msrb.gmra.mxu0 %v1269_v43  ;;  %1317 = vmatmul.bf16.vlgmr.msra.gmra.mxu1 %v1269_v43  ;;  %v3434_v43 = vld [vmem:[#allocation4 + $0x164] sm:$0xf] }
 0x52d   :  { %1676 = vmatpush.bf16.msrb.mxu2 %v3141_v48  ;;  %1705 = vmatpush.bf16.msrb.mxu3 %v3145_v41  ;;  %v3078_v48 = vld [vmem:[#allocation4 + $0x170] sm:$0xf0] }
 0x52e   :  { %1734 = vmatpush.bf16.msrb.mxu0 %v3149_v19  ;;  %1763 = vmatpush.bf16.msra.mxu1 %v3153_v62  ;;  %v4911_v19 = vld [vmem:[#allocation25_spill] sm:$0xff]  ;;  %v3081_v59 = vor.u32 %v3434_v43, %v3078_v48  ;;  %v3085_v62 = vor.u32 %v3437_v36, %v3084_v38  ;;  %v3029_v48 = vor.u32 %v3424_v8, %v3028_v51  ;;  %v3423_v38 = vld [vmem:[#allocation4 + $0x10c] sm:$0xf]  ;;  %v3038_v36 = vld [vmem:[#allocation4 + $0x118] sm:$0xf0] }
 0x52f   :  { %v3030_v43 = vld [vmem:[#allocation4 + $0x110] sm:$0xf0]  ;;  %v3264_v51 = vld [vmem:[#allocation6 + $0x1d8] sm:$0xf0] }
 0x531   :  { %1677 = vmatpush.bf16.msrb.mxu2 %v3125_v2  ;;  %1706 = vmatpush.bf16.msrb.mxu3 %v3129_v7  ;;  %v3089_v2 = vor.u32 %v3435_v45, %v3086_v29 }
 0x532   :  { %1735 = vmatpush.bf16.msrb.mxu0 %v3133_v10  ;;  %1764 = vmatpush.bf16.msra.mxu1 %v3137_v23  ;;  %v3061_v23 = vor.u32 %v3432_v63, %v3060_v6 }
 0x535   :  { %1678 = vmatpush.bf16.msrb.mxu2 %v3109_v37  ;;  %1707 = vmatpush.bf16.msrb.mxu3 %v3113_v49  ;;  %v3069_v37 = vor.u32 %v3433_v33, %v3068_v28  ;;  %v4912_v49 = vld [vmem:[#allocation26_spill] sm:$0xff]  ;;  %v3270_v28 = vld [vmem:[#allocation6 + $0x1e0] sm:$0xf]  ;;  %v3420_v33 = vld [vmem:[#allocation6 + $0x1ec] sm:$0xf0] }
 0x536   :  { %1736 = vmatpush.bf16.msrb.mxu0 %v3117_v50  ;;  %1765 = vmatpush.bf16.msra.mxu1 %v3121_v3  ;;  %v3428_v3 = vld [vmem:[#allocation4 + $0x12c] sm:$0xf0]  ;;  %v4361_v39 = vor.u32 %v3420_v33, %v3270_v28  ;;  %v3230_v33 = vld [vmem:[#allocation6 + $0x188] sm:$0xf] }
 0x537   :  { %v3045_v25 = vor.u32 %v3428_v3, %v3044_v46  ;;  %v3254_v46 = vld [vmem:[#allocation6 + $0x1c0] sm:$0xf]  ;;  %v1470_v3 = vpack.c.bf16 %v4343_v17, %v4295_v12  ;;  %v3278_v12 = vld [vmem:[#allocation6 + $0x1e8] sm:$0xf]  ;;  %v3421_v17 = vld [vmem:[#allocation6 + $0x1f4] sm:$0xf0] }
 0x539   :  { %1679 = vmatpush.bf16.msrb.mxu2 %v3093_v26  ;;  %1708 = vmatpush.bf16.msrb.mxu3 %v3097_v21  ;;  %v3052_v26 = vld [vmem:[#allocation4 + $0x128] sm:$0xf] }
 0x53a   :  { %1737 = vmatpush.bf16.msrb.mxu0 %v3101_v44  ;;  %1766 = vmatpush.bf16.msra.mxu1 %v3105_v47  ;;  %v3053_v21 = vor.u32 %v3429_v24, %v3052_v26  ;;  %v3054_v44 = vld [vmem:[#allocation4 + $0x138] sm:$0xf0]  ;;  %v4377_v26 = vor.u32 %v3419_v9, %v3280_v11  ;;  %v3412_v24 = vld [vmem:[#allocation6 + $0x1ac] sm:$0xf0]  ;;  %v4915_v11 = vld [vmem:[#allocation28_spill] sm:$0xff] }
 0x53d   :  { %1680 = vmatpush.bf16.msrb.mxu2 %v3077_v20  ;;  %1709 = vmatpush.bf16.msrb.mxu3 %v3081_v59  ;;  %v3425_v20 = vld [vmem:[#allocation4 + $0x114] sm:$0xf0] }
 0x53e   :  { %1738 = vmatpush.bf16.msrb.mxu0 %v3085_v62  ;;  %1767 = vmatpush.bf16.msra.mxu1 %v3089_v2  ;;  %v3041_v62 = vor.u32 %v3423_v38, %v3038_v36  ;;  %v3248_v38 = vld [vmem:[#allocation6 + $0x1b8] sm:$0xf0] }
 0x541   :  { %1681 = vmatpush.bf16.msrb.mxu2 %v3061_v23  ;;  %1710 = vmatpush.bf16.msrb.mxu3 %v3065_v27 }
 0x542   :  { %1739 = vmatpush.bf16.msrb.mxu0 %v3069_v37  ;;  %1768 = vmatpush.bf16.msra.mxu1 %v3073_v61  ;;  %v3418_v37 = vld [vmem:[#allocation6 + $0x1e4] sm:$0xf] }
 0x545   :  { %1682 = vmatpush.bf16.msrb.mxu2 %v3045_v25  ;;  %1711 = vmatpush.bf16.msrb.mxu3 %v3049_v35  ;;  %v3238_v25 = vld [vmem:[#allocation6 + $0x1a0] sm:$0xf]  ;;  %v3240_v35 = vld [vmem:[#allocation6 + $0x1b0] sm:$0xf0] }
 0x546   :  { %1740 = vmatpush.bf16.msrb.mxu0 %v3053_v21  ;;  %v4386_v21 = vor.u32 %v3421_v17, %v3278_v12 }
 0x549   :  { %1683 = vmatpush.bf16.msrb.mxu2 %v3029_v48  ;;  %v3411_v48 = vld [vmem:[#allocation6 + $0x1ac] sm:$0xf] }
 0x5a9   :  { %v1305_v54 = vpop.f32.mrf.mxu0  ;;  %v1318_v53 = vpop.f32.mrf.mxu1 }
 0x5aa   :  { %v1324_v50 = vadd.f32 %v1305_v54, %v4912_v49  ;;  %v1325_v60 = vadd.f32 %v1318_v53, %v4913_v56  ;;  %v3057_v53 = vor.u32 %v3427_v34, %v3054_v44  ;;  %v3416_v49 = vld [vmem:[#allocation6 + $0x1cc] sm:$0xf0]  ;;  %v3414_v56 = vld [vmem:[#allocation6 + $0x1c4] sm:$0xf]  ;;  %v3415_v44 = vld [vmem:[#allocation6 + $0x1cc] sm:$0xf] }
 0x5ab   :  { %v4366_v61 = vor.u32 %v3416_v49, %v3254_v46  ;;  %v3410_v34 = vld [vmem:[#allocation6 + $0x1a4] sm:$0xf]  ;;  %v3403_v49 = vld [vmem:[#allocation6 + $0x16c] sm:$0xf] }
 0x5ac   :  { %1769 = vmatpush.bf16.msra.mxu1 %v3057_v53  ;;  %v3417_v53 = vld [vmem:[#allocation6 + $0x1d4] sm:$0xf0] }
 0x5ae   :  { %v1279_v4 = vpop.f32.mrf.mxu2  ;;  %v1292_v13 = vpop.f32.mrf.mxu3 }
 0x5af   :  { %v1322_v41 = vadd.f32 %v1279_v4, %v4910_v0  ;;  %v1323_v30 = vadd.f32 %v1292_v13, %v4911_v19  ;;  %v1328_v4 = vmul.f32 0.5, %v1324_v50  ;;  %v3036_v13 = vld [vmem:[#allocation4 + $0x108] sm:$0xf]  ;;  %v4363_v50 = vor.u32 %v3418_v37, %v3272_v42  ;;  %v3409_v37 = vld [vmem:[#allocation6 + $0x194] sm:$0xf0] }
 0x5b0   :  { %v3037_v19 = vor.u32 %v3425_v20, %v3036_v13  ;;  %1770 = vmatpush.bf16.msra.mxu1 %v3041_v62  ;;  %v3224_v20 = vld [vmem:[#allocation6 + $0x190] sm:$0xf0]  ;;  %v4416_v46 = vor.u32 %v3409_v37, %v3230_v33  ;;  %v3390_v33 = vld [vmem:[#allocation6 + $0x104] sm:$0xf] }
 0x5b1   :  { %v1326_v7 = vmul.f32 0.5, %v1322_v41  ;;  %v1327_v10 = vmul.f32 0.5, %v1323_v30  ;;  %v1307_v14 = vpop.f32.mrf.mxu0  ;;  %v1320_v16 = vpop.f32.mrf.mxu1  ;;  %v3033_v41 = vor.u32 %v3422_v55, %v3030_v43  ;;  %v3222_v55 = vld [vmem:[#allocation6 + $0x180] sm:$0xf]  ;;  %v3408_v43 = vld [vmem:[#allocation6 + $0x18c] sm:$0xf0] }
 0x5b2   :  { %1741 = vmatpush.bf16.msrb.mxu0 %v3037_v19  ;;  %v4394_v13 = vor.u32 %v3408_v43, %v3222_v55  ;;  %v3404_v19 = vld [vmem:[#allocation6 + $0x16c] sm:$0xf0]  ;;  %v3208_v62 = vld [vmem:[#allocation6 + $0x170] sm:$0xf0] }
 0x5b3   :  { %3535 = vtanh.f32 %v1326_v7  ;;  %1712 = vmatpush.bf16.msrb.mxu3 %v3033_v41  ;;  %v3206_v41 = vld [vmem:[#allocation6 + $0x160] sm:$0xf]  ;;  %v3160_v37 = vld [vmem:[#allocation6 + $0x110] sm:$0xf0] }
 0x5b4   :  { %3537 = vtanh.f32 %v1327_v10 }
 0x5b5   :  { %3539 = vtanh.f32 %v1325_v60  ;;  %v3256_v60 = vld [vmem:[#allocation6 + $0x1d0] sm:$0xf0] }
 0x5b6   :  { %v1281_v54 = vpop.f32.mrf.mxu2  ;;  %v1294_v47 = vpop.f32.mrf.mxu3  ;;  %3541 = vtanh.f32 %v1328_v4  ;;  %v3406_v4 = vld [vmem:[#allocation6 + $0x184] sm:$0xf] }
 0x5b7   :  { %v3262_v54 = vld [vmem:[#allocation6 + $0x1c8] sm:$0xf]  ;;  %v4389_v47 = vor.u32 %v3415_v44, %v3264_v51  ;;  %v4397_v36 = vor.u32 %v3406_v4, %v3224_v20  ;;  %v3176_v4 = vld [vmem:[#allocation6 + $0x130] sm:$0xf0] }
 0x5b8   :  { %v4391_v8 = vor.u32 %v3417_v53, %v3262_v54  ;;  %v3396_v54 = vld [vmem:[#allocation6 + $0x12c] sm:$0xf0]  ;;  %v3394_v53 = vld [vmem:[#allocation6 + $0x124] sm:$0xf] }
 0x5b9   :  { %v3536_v0 = vpop.eup %3535  ;;  %v4917_v20 = vld [vmem:[#allocation29_spill] sm:$0xff] }
 0x5ba   :  { %v3538_v30 = vpop.eup %3537  ;;  %v1332_v59 = vmul.f32 0.5, %v3536_v0  ;;  %v4399_v0 = vor.u32 %v3411_v48, %v3248_v38  ;;  %v560_v48 = vadd.f32 %v4917_v20, %v4045_v32 }
 0x5bb   :  { %v1333_v45 = vmul.f32 0.5, %v3538_v30  ;;  %v3540_v6 = vpop.eup %3539  ;;  %v3402_v30 = vld [vmem:[#allocation6 + $0x164] sm:$0xf] }
 0x5bc   :  { %v1335_v29 = vadd.f32 0.5, %v1332_v59  ;;  %v3542_v5 = vpop.eup %3541  ;;  %v4402_v59 = vor.u32 %v3404_v19, %v3206_v41 }
 0x5bd   :  { %v1336_v2 = vadd.f32 0.5, %v1333_v45  ;;  %v1334_v10 = vmul.f32 0.5, %v3542_v5  ;;  %v3246_v45 = vld [vmem:[#allocation6 + $0x1a8] sm:$0xf]  ;;  %v3190_v5 = vld [vmem:[#allocation6 + $0x140] sm:$0xf] }
 0x5be   :  { %v1340_v63 = vmul.f32 %v3540_v6, %v1335_v29  ;;  %v3413_v29 = vld [vmem:[#allocation6 + $0x1b4] sm:$0xf0]  ;;  %v4406_v6 = vor.u32 %v3402_v30, %v3208_v62  ;;  %v4440_v62 = vor.u32 %v3394_v53, %v3176_v4 }
 0x5bf   :  { %v1339_v1 = vmul.f32 %v1336_v2, %v4340_v52  ;;  %v1337_v14 = vadd.f32 0.5, %v1334_v10  ;;  %v1468_v52 = vpack.c.bf16 %v4159_v57, %v4109_v58  ;;  %v4369_v58 = vor.u32 %v3414_v56, %v3256_v60  ;;  %v3216_v56 = vld [vmem:[#allocation6 + $0x178] sm:$0xf0] }
 0x5c0   :  { %v1469_v57 = vpack.c.bf16 %v4251_v22, %v4203_v40  ;;  %v4379_v40 = vor.u32 %v3412_v24, %v3238_v25  ;;  %v4381_v22 = vor.u32 %v3410_v34, %v3240_v35  ;;  %v4408_v2 = vor.u32 %v3413_v29, %v3246_v45  ;;  %v3214_v24 = vld [vmem:[#allocation6 + $0x168] sm:$0xf]  ;;  %v3405_v34 = vld [vmem:[#allocation6 + $0x174] sm:$0xf0]  ;;  %v3399_v45 = vld [vmem:[#allocation6 + $0x14c] sm:$0xf] }
 0x5c1   :  { %v4352_v7 = vadd.f32 %v1340_v63, %v1339_v1  ;;  %v3407_v63 = vld [vmem:[#allocation6 + $0x18c] sm:$0xf]  ;;  %v3232_v1 = vld [vmem:[#allocation6 + $0x198] sm:$0xf0]  ;;  %v531_v25 = vadd.f32 %v4915_v11, %v4043_v31  ;;  %v4430_v17 = vor.u32 %v3405_v34, %v3214_v24 }
 0x5c2   :  { %v4410_v10 = vor.u32 %v3407_v63, %v3232_v1  ;;  %v4916_v31 = vld [vmem:[#allocation30_spill] sm:$0xff] }
 0x5c3   :  { %3543 = vtanh.f32 %v4352_v7  ;;  %v589_v55 = vadd.f32 %v4916_v31, %v4035_v18  ;;  %v3200_v29 = vld [vmem:[#allocation6 + $0x158] sm:$0xf0]  ;;  %v3198_v18 = vld [vmem:[#allocation6 + $0x148] sm:$0xf]  ;;  %v3401_v1 = vld [vmem:[#allocation6 + $0x154] sm:$0xf0] }
 0x5c4   :  { %v4444_v63 = vor.u32 %v3399_v45, %v3200_v29  ;;  %v4447_v32 = vor.u32 %v3401_v1, %v3198_v18  ;;  %v3184_v24 = vld [vmem:[#allocation6 + $0x138] sm:$0xf0] }
 0x5c9   :  { %v3544_v16 = vpop.eup %3543 }
 0x5ca   :  { %v4355_v23 = vmul.f32 %v3544_v16, %v1337_v14  ;;  %v3400_v14 = vld [vmem:[#allocation6 + $0x14c] sm:$0xf0]  ;;  %v3398_v16 = vld [vmem:[#allocation6 + $0x144] sm:$0xf] }
 0x5cb   :  { %v4414_v42 = vor.u32 %v3400_v14, %v3190_v5  ;;  %v3158_v5 = vld [vmem:[#allocation6 + $0x100] sm:$0xf] }
 0x5cc   :  { %v1349_v27 = vpack.c.bf16 %v4355_v23, %v4355_v23 }
 0x5ce   :  { %1358 = vmatmul.bf16.vlgmr.msra.gmra.mxu2 %v1349_v27  ;;  %1371 = vmatmul.bf16.vlgmr.msra.gmra.mxu3 %v1349_v27 }
 0x5cf   :  { %1384 = vmatmul.bf16.vlgmr.msra.gmra.mxu0 %v1349_v27  ;;  %1397 = vmatmul.bf16.vlgmr.msrb.gmra.mxu1 %v1349_v27  ;;  %v3192_v27 = vld [vmem:[#allocation6 + $0x150] sm:$0xf0] }
 0x5d0   :  { %1993 = vmatpush.bf16.msra.mxu2 %v4361_v39  ;;  %2006 = vmatpush.bf16.msra.mxu3 %v4363_v50  ;;  %v4420_v60 = vor.u32 %v3398_v16, %v3192_v27  ;;  %v3392_v27 = vld [vmem:[#allocation6 + $0x10c] sm:$0xf0] }
 0x5d1   :  { %2032 = vmatpush.bf16.msrb.mxu1 %v4377_v26  ;;  %2019 = vmatpush.bf16.msra.mxu0 %v4386_v21 }
 0x5d4   :  { %1994 = vmatpush.bf16.msra.mxu2 %v4366_v61  ;;  %2007 = vmatpush.bf16.msra.mxu3 %v4369_v58 }
 0x5d5   :  { %2033 = vmatpush.bf16.msrb.mxu1 %v4389_v47  ;;  %2020 = vmatpush.bf16.msra.mxu0 %v4391_v8 }
 0x5d8   :  { %1995 = vmatpush.bf16.msra.mxu2 %v4379_v40  ;;  %2008 = vmatpush.bf16.msra.mxu3 %v4381_v22 }
 0x5d9   :  { %2034 = vmatpush.bf16.msrb.mxu1 %v4399_v0  ;;  %2021 = vmatpush.bf16.msra.mxu0 %v4408_v2 }
 0x5dc   :  { %1996 = vmatpush.bf16.msra.mxu2 %v4394_v13  ;;  %2009 = vmatpush.bf16.msra.mxu3 %v4397_v36 }
 0x5dd   :  { %2035 = vmatpush.bf16.msrb.mxu1 %v4410_v10  ;;  %2022 = vmatpush.bf16.msra.mxu0 %v4416_v46 }
 0x5de   :  { %1684 = vmatmul.bf16.vlgmr.msrb.gmra.mxu2 %v1468_v52  ;;  %1713 = vmatmul.bf16.vlgmr.msrb.gmra.mxu3 %v1468_v52 }
 0x5df   :  { %1742 = vmatmul.bf16.vlgmr.msrb.gmra.mxu0 %v1468_v52  ;;  %1771 = vmatmul.bf16.vlgmr.msra.gmra.mxu1 %v1468_v52 }
 0x5e0   :  { %1997 = vmatpush.bf16.msra.mxu2 %v4402_v59  ;;  %2010 = vmatpush.bf16.msra.mxu3 %v4406_v6 }
 0x5e1   :  { %2023 = vmatpush.bf16.msra.mxu0 %v4430_v17 }
 0x5e4   :  { %1998 = vmatpush.bf16.msra.mxu2 %v4414_v42  ;;  %2011 = vmatpush.bf16.msra.mxu3 %v4420_v60 }
 0x5e5   :  { %2024 = vmatpush.bf16.msra.mxu0 %v4447_v32 }
 0x5e8   :  { %2012 = vmatpush.bf16.msra.mxu3 %v4440_v62 }
 0x5ee   :  { %1689 = vmatmul.bf16.gmra.mxu2 %v1469_v57  ;;  %1718 = vmatmul.bf16.gmra.mxu3 %v1469_v57 }
 0x5ef   :  { %1747 = vmatmul.bf16.gmra.mxu0 %v1469_v57  ;;  %1776 = vmatmul.bf16.gmra.mxu1 %v1469_v57  ;;  %v4422_v57 = vor.u32 %v3403_v49, %v3216_v56  ;;  %v4450_v49 = vor.u32 %v3392_v27, %v3158_v5  ;;  %v4452_v56 = vor.u32 %v3390_v33, %v3160_v37 }
 0x5f1   :  { %2036 = vmatpush.bf16.msrb.mxu1 %v4422_v57  ;;  %2013 = vmatpush.bf16.msra.mxu3 %v4452_v56 }
 0x5f5   :  { %2037 = vmatpush.bf16.msrb.mxu1 %v4444_v63  ;;  %2085 = vmatpush.bf16.msrb.mxu3 %v4363_v50 }
 0x5f9   :  { %2086 = vmatpush.bf16.msrb.mxu3 %v4369_v58 }
 0x5fd   :  { %2087 = vmatpush.bf16.msrb.mxu3 %v4381_v22 }
 0x5fe   :  { %1694 = vmatmul.bf16.gmra.mxu2 %v1470_v3  ;;  %1723 = vmatmul.bf16.gmra.mxu3 %v1470_v3 }
 0x5ff   :  { %1752 = vmatmul.bf16.gmra.mxu0 %v1470_v3  ;;  %1781 = vmatmul.bf16.gmra.mxu1 %v1470_v3  ;;  %v4914_v3 = vld [vmem:[#allocation27_spill] sm:$0xff] }
 0x600   :  { %v502_v9 = vadd.f32 %v4914_v3, %v4031_v15  ;;  %v3174_v15 = vld [vmem:[#allocation6 + $0x120] sm:$0xf]  ;;  %v3182_v3 = vld [vmem:[#allocation6 + $0x128] sm:$0xf] }
 0x601   :  { %v4436_v43 = vor.u32 %v3396_v54, %v3174_v15  ;;  %v3391_v15 = vld [vmem:[#allocation6 + $0x10c] sm:$0xf]  ;;  %2088 = vmatpush.bf16.msrb.mxu3 %v4397_v36 }
 0x603   :  { %1999 = vmatpush.bf16.msra.mxu2 %v4436_v43 }
 0x605   :  { %2089 = vmatpush.bf16.msrb.mxu3 %v4406_v6 }
 0x607   :  { %2000 = vmatpush.bf16.msra.mxu2 %v4450_v49 }
 0x609   :  { %2090 = vmatpush.bf16.msrb.mxu3 %v4420_v60 }
 0x60b   :  { %2072 = vmatpush.bf16.msrb.mxu2 %v4361_v39 }
 0x60d   :  { %2091 = vmatpush.bf16.msrb.mxu3 %v4440_v62 }
 0x60f   :  { %2073 = vmatpush.bf16.msrb.mxu2 %v4366_v61 }
 0x611   :  { %2092 = vmatpush.bf16.msrb.mxu3 %v4452_v56 }
 0x613   :  { %2074 = vmatpush.bf16.msrb.mxu2 %v4379_v40 }
 0x617   :  { %2075 = vmatpush.bf16.msrb.mxu2 %v4394_v13 }
 0x61b   :  { %2076 = vmatpush.bf16.msrb.mxu2 %v4402_v59 }
 0x61f   :  { %2077 = vmatpush.bf16.msrb.mxu2 %v4414_v42 }
 0x623   :  { %2078 = vmatpush.bf16.msrb.mxu2 %v4436_v43 }
 0x627   :  { %2079 = vmatpush.bf16.msrb.mxu2 %v4450_v49 }
 0x64c   :  { %v1385_v52 = vpop.f32.mrf.mxu0  ;;  %v1398_v28 = vpop.f32.mrf.mxu1 }
 0x64d   :  { %v1404_v14 = vadd.f32 %v1385_v52, %v560_v48  ;;  %v1405_v16 = vadd.f32 %v1398_v28, %v589_v55  ;;  %v3397_v52 = vld [vmem:[#allocation6 + $0x134] sm:$0xf0]  ;;  %v3168_v55 = vld [vmem:[#allocation6 + $0x118] sm:$0xf0] }
 0x64e   :  { %v4456_v11 = vor.u32 %v3397_v52, %v3182_v3  ;;  %v4467_v20 = vor.u32 %v3391_v15, %v3168_v55 }
 0x64f   :  { %v1408_v34 = vmul.f32 0.5, %v1404_v14 }
 0x650   :  { %2025 = vmatpush.bf16.msra.mxu0 %v4456_v11 }
 0x651   :  { %v1359_v35 = vpop.f32.mrf.mxu2  ;;  %v1372_v12 = vpop.f32.mrf.mxu3 }
 0x652   :  { %v1402_v44 = vadd.f32 %v1359_v35, %v502_v9  ;;  %v1403_v51 = vadd.f32 %v1372_v12, %v531_v25  ;;  %v3395_v25 = vld [vmem:[#allocation6 + $0x12c] sm:$0xf] }
 0x653   :  { %v4459_v35 = vor.u32 %v3395_v25, %v3184_v24 }
 0x654   :  { %v1406_v38 = vmul.f32 0.5, %v1402_v44  ;;  %v1407_v41 = vmul.f32 0.5, %v1403_v51  ;;  %v1387_v19 = vpop.f32.mrf.mxu0  ;;  %v1400_v30 = vpop.f32.mrf.mxu1  ;;  %v3166_v44 = vld [vmem:[#allocation6 + $0x108] sm:$0xf]  ;;  %v3393_v51 = vld [vmem:[#allocation6 + $0x114] sm:$0xf0] }
 0x655   :  { %2038 = vmatpush.bf16.msrb.mxu1 %v4459_v35  ;;  %v4465_v31 = vor.u32 %v3393_v51, %v3166_v44 }
 0x656   :  { %3545 = vtanh.f32 %v1406_v38 }
 0x657   :  { %3547 = vtanh.f32 %v1407_v41  ;;  %2026 = vmatpush.bf16.msra.mxu0 %v4465_v31 }
 0x658   :  { %3549 = vtanh.f32 %v1405_v16 }
 0x659   :  { %v1361_v28 = vpop.f32.mrf.mxu2  ;;  %v1374_v9 = vpop.f32.mrf.mxu3  ;;  %3551 = vtanh.f32 %v1408_v34  ;;  %2039 = vmatpush.bf16.msrb.mxu1 %v4467_v20 }
 0x65b   :  { %2098 = vmatpush.bf16.msrb.mxu0 %v4386_v21 }
 0x65c   :  { %v3546_v12 = vpop.eup %3545  ;;  %v1743_v27 = vpop.f32.mrf.mxu0 }
 0x65d   :  { %v3548_v54 = vpop.eup %3547  ;;  %v1412_v53 = vmul.f32 0.5, %v3546_v12  ;;  %2111 = vmatpush.bf16.msra.mxu1 %v4377_v26  ;;  %v1772_v33 = vpop.f32.mrf.mxu1 }
 0x65e   :  { %v1413_v4 = vmul.f32 0.5, %v3548_v54  ;;  %v3550_v38 = vpop.eup %3549 }
 0x65f   :  { %v1415_v48 = vadd.f32 0.5, %v1412_v53  ;;  %v3552_v45 = vpop.eup %3551  ;;  %2099 = vmatpush.bf16.msrb.mxu0 %v4391_v8 }
 0x660   :  { %v1416_v41 = vadd.f32 0.5, %v1413_v4  ;;  %v1414_v18 = vmul.f32 0.5, %v3552_v45 }
 0x661   :  { %v1420_v19 = vmul.f32 %v3550_v38, %v1415_v48  ;;  %2112 = vmatpush.bf16.msra.mxu1 %v4389_v47  ;;  %v1685_v37 = vpop.f32.mrf.mxu2  ;;  %v1714_v3 = vpop.f32.mrf.mxu3 }
 0x662   :  { %v1419_v30 = vmul.f32 %v1416_v41, %v4352_v7  ;;  %v1417_v7 = vadd.f32 0.5, %v1414_v18 }
 0x663   :  { %2100 = vmatpush.bf16.msrb.mxu0 %v4408_v2 }
 0x664   :  { %v1421_v29 = vadd.f32 %v1420_v19, %v1419_v30  ;;  %v4544_v52 = vpop.f32.mrf.mxu0 }
 0x665   :  { %2113 = vmatpush.bf16.msra.mxu1 %v4399_v0  ;;  %v4546_v28 = vpop.f32.mrf.mxu1 }
 0x666   :  { %3553 = vtanh.f32 %v1421_v29  ;;  %1426 = vst [vmem:[%s4877_s11] sm:$0xff] %v1421_v29 }
 0x667   :  { %2101 = vmatpush.bf16.msrb.mxu0 %v4416_v46 }
 0x669   :  { %2114 = vmatpush.bf16.msra.mxu1 %v4410_v10  ;;  %v4548_v9 = vpop.f32.mrf.mxu2  ;;  %v4550_v25 = vpop.f32.mrf.mxu3 }
 0x66b   :  { %2102 = vmatpush.bf16.msrb.mxu0 %v4430_v17 }
 0x66c   :  { %v3554_v1 = vpop.eup %3553  ;;  %v4552_v24 = vpop.f32.mrf.mxu0 }
 0x66d   :  { %v1423_v5 = vmul.f32 %v3554_v1, %v1417_v7  ;;  %2115 = vmatpush.bf16.msra.mxu1 %v4422_v57  ;;  %4918 = vst [vmem:[#allocation11_spill] sm:$0xff] %v4552_v24  ;;  %v4554_v34 = vpop.f32.mrf.mxu1 }
 0x66e   :  { %4919 = vst [vmem:[#allocation13_spill] sm:$0xff] %v4554_v34 }
 0x66f   :  { %1425 = vst [vmem:[%s4876_s10] sm:$0xff] %v1423_v5  ;;  %v1471_v14 = vpack.c.bf16 %v1423_v5, %v4355_v23  ;;  %2103 = vmatpush.bf16.msrb.mxu0 %v4447_v32  ;;  %v3154_v23 = vld [vmem:[%s4868_s2 + $0x8] sm:$0xff] }
 0x670   :  { %v1832_v16 = vpack.c.bf16 %v3154_v23, %v3154_v23 }
 0x671   :  { %1699 = vmatmul.bf16.gmra.mxu2 %v1471_v14  ;;  %1728 = vmatmul.bf16.gmra.mxu3 %v1471_v14  ;;  %v4556_v12 = vpop.f32.mrf.mxu2  ;;  %v4558_v44 = vpop.f32.mrf.mxu3 }
 0x672   :  { %1757 = vmatmul.bf16.gmra.mxu0 %v1471_v14  ;;  %1786 = vmatmul.bf16.gmra.mxu1 %v1471_v14  ;;  %4920 = vst [vmem:[#allocation12_spill] sm:$0xff] %v4558_v44 }
 0x673   :  { %2116 = vmatpush.bf16.msra.mxu1 %v4444_v63  ;;  %2104 = vmatpush.bf16.msrb.mxu0 %v4456_v11 }
 0x674   :  { %v4560_v51 = vpop.f32.mrf.mxu0 }
 0x675   :  { %4921 = vst [vmem:[#allocation14_spill] sm:$0xff] %v4560_v51  ;;  %v4562_v15 = vpop.f32.mrf.mxu1 }
 0x676   :  { %4922 = vst [vmem:[#allocation15_spill] sm:$0xff] %v4562_v15 }
 0x677   :  { %2117 = vmatpush.bf16.msra.mxu1 %v4459_v35  ;;  %2105 = vmatpush.bf16.msrb.mxu0 %v4465_v31 }
 0x679   :  { %v4564_v54 = vpop.f32.mrf.mxu2  ;;  %v4566_v53 = vpop.f32.mrf.mxu3 }
 0x67a   :  { %4923 = vst [vmem:[#allocation17_spill] sm:$0xff] %v4564_v54 }
 0x67b   :  { %2118 = vmatpush.bf16.msra.mxu1 %v4467_v20  ;;  %4924 = vst [vmem:[#allocation18_spill] sm:$0xff] %v4566_v53 }
 0x67c   :  { %v4568_v55 = vpop.f32.mrf.mxu0 }
 0x67d   :  { %4925 = vst [vmem:[#allocation16_spill] sm:$0xff] %v4568_v55  ;;  %v4570_v4 = vpop.f32.mrf.mxu1 }
 0x67e   :  { %4926 = vst [vmem:[#allocation19_spill] sm:$0xff] %v4570_v4 }
 0x681   :  { %2001 = vmatmul.bf16.vlgmr.msra.gmra.mxu2 %v1832_v16  ;;  %2014 = vmatmul.bf16.vlgmr.msra.gmra.mxu3 %v1832_v16  ;;  %v4572_v48 = vpop.f32.mrf.mxu2  ;;  %v4574_v38 = vpop.f32.mrf.mxu3 }
 0x682   :  { %2027 = vmatmul.bf16.vlgmr.msra.gmra.mxu0 %v1832_v16  ;;  %2040 = vmatmul.bf16.vlgmr.msrb.gmra.mxu1 %v1832_v16  ;;  %4927 = vst [vmem:[#allocation21_spill] sm:$0xff] %v4572_v48 }
 0x683   :  { %2151 = vmatpush.bf16.msra.mxu2 %v4361_v39  ;;  %2164 = vmatpush.bf16.msra.mxu3 %v4363_v50  ;;  %4928 = vst [vmem:[#allocation20_spill] sm:$0xff] %v4574_v38 }
 0x684   :  { %2177 = vmatpush.bf16.msra.mxu0 %v4386_v21  ;;  %2190 = vmatpush.bf16.msrb.mxu1 %v4377_v26  ;;  %v4576_v41 = vpop.f32.mrf.mxu0 }
 0x685   :  { %4929 = vst [vmem:[#allocation22_spill] sm:$0xff] %v4576_v41  ;;  %v4578_v19 = vpop.f32.mrf.mxu1 }
 0x686   :  { %4930 = vst [vmem:[#allocation23_spill] sm:$0xff] %v4578_v19  ;;  %v3025_v19 = vld [vmem:[%s4872_s6 + $0x4] sm:$0xf] }
 0x687   :  { %2152 = vmatpush.bf16.msra.mxu2 %v4366_v61  ;;  %2165 = vmatpush.bf16.msra.mxu3 %v4369_v58  ;;  %v4603_v41 = vperm.slane %v3025_v19, 0 }
 0x688   :  { %2178 = vmatpush.bf16.msra.mxu0 %v4391_v8  ;;  %2191 = vmatpush.bf16.msrb.mxu1 %v4389_v47 }
 0x689   :  { %v4580_v30 = vpop.f32.mrf.mxu2  ;;  %v4582_v45 = vpop.f32.mrf.mxu3 }
 0x68a   :  { %4931 = vst [vmem:[#allocation25_spill] sm:$0xff] %v4580_v30 }
 0x68b   :  { %2153 = vmatpush.bf16.msra.mxu2 %v4379_v40  ;;  %2166 = vmatpush.bf16.msra.mxu3 %v4381_v22  ;;  %4932 = vst [vmem:[#allocation26_spill] sm:$0xff] %v4582_v45  ;;  %v4607_v45 = vperm.slane %v3025_v19, 2 }
 0x68c   :  { %2179 = vmatpush.bf16.msra.mxu0 %v4408_v2  ;;  %2192 = vmatpush.bf16.msrb.mxu1 %v4399_v0 }
 0x68d   :  { %v1744_v55 = vadd.f32 %v1743_v27, %v4607_v45 }
 0x68f   :  { %2154 = vmatpush.bf16.msra.mxu2 %v4394_v13  ;;  %2167 = vmatpush.bf16.msra.mxu3 %v4397_v36 }
 0x690   :  { %2180 = vmatpush.bf16.msra.mxu0 %v4416_v46  ;;  %2193 = vmatpush.bf16.msrb.mxu1 %v4410_v10 }
 0x693   :  { %2155 = vmatpush.bf16.msra.mxu2 %v4402_v59  ;;  %2168 = vmatpush.bf16.msra.mxu3 %v4406_v6 }
 0x694   :  { %2181 = vmatpush.bf16.msra.mxu0 %v4430_v17  ;;  %2194 = vmatpush.bf16.msrb.mxu1 %v4422_v57 }
 0x697   :  { %2156 = vmatpush.bf16.msra.mxu2 %v4414_v42  ;;  %2169 = vmatpush.bf16.msra.mxu3 %v4420_v60 }
 0x698   :  { %2182 = vmatpush.bf16.msra.mxu0 %v4447_v32  ;;  %2195 = vmatpush.bf16.msrb.mxu1 %v4444_v63 }
 0x69b   :  { %2157 = vmatpush.bf16.msra.mxu2 %v4436_v43  ;;  %2170 = vmatpush.bf16.msra.mxu3 %v4440_v62 }
 0x69c   :  { %2183 = vmatpush.bf16.msra.mxu0 %v4456_v11  ;;  %2196 = vmatpush.bf16.msrb.mxu1 %v4459_v35 }
 0x69f   :  { %2158 = vmatpush.bf16.msra.mxu2 %v4450_v49  ;;  %2171 = vmatpush.bf16.msra.mxu3 %v4452_v56 }
 0x6a0   :  { %2184 = vmatpush.bf16.msra.mxu0 %v4465_v31  ;;  %2197 = vmatpush.bf16.msrb.mxu1 %v4467_v20 }
 0x6ef   :  { %v4584_v29 = vpop.f32.mrf.mxu0  ;;  %v4586_v18 = vpop.f32.mrf.mxu1 }
 0x6f0   :  { %4933 = vst [vmem:[#allocation24_spill] sm:$0xff] %v4584_v29  ;;  %v4605_v29 = vperm.slane %v3025_v19, 1 }
 0x6f1   :  { %4934 = vst [vmem:[#allocation27_spill] sm:$0xff] %v4586_v18 }
 0x6f4   :  { %v4588_v7 = vpop.f32.mrf.mxu2  ;;  %v4590_v1 = vpop.f32.mrf.mxu3 }
 0x6f5   :  { %4935 = vst [vmem:[#allocation28_spill] sm:$0xff] %v4588_v7 }
 0x6f6   :  { %4936 = vst [vmem:[#allocation30_spill] sm:$0xff] %v4590_v1  ;;  %v4609_v1 = vperm.slane %v3025_v19, 3 }
 0x6f7   :  { %v4592_v5 = vpop.f32.mrf.mxu0  ;;  %v4594_v14 = vpop.f32.mrf.mxu1 }
 0x6f8   :  { %4937 = vst [vmem:[#allocation29_spill] sm:$0xff] %v4592_v5  ;;  %v1715_v5 = vadd.f32 %v1714_v3, %v4605_v29  ;;  %v1773_v38 = vadd.f32 %v1772_v33, %v4609_v1  ;;  %v3155_v33 = vld [vmem:[%s4869_s3 + $0x8] sm:$0xff] }
 0x6f9   :  { %4938 = vst [vmem:[#allocation31_spill] sm:$0xff] %v4594_v14  ;;  %v1686_v14 = vadd.f32 %v1685_v37, %v4603_v41 }
 0x6fc   :  { %v4596_v23 = vpop.f32.mrf.mxu2  ;;  %v4598_v16 = vpop.f32.mrf.mxu3 }
 0x6fd   :  { %4939 = vst [vmem:[#allocation32_spill] sm:$0xff] %v4596_v23 }
 0x6fe   :  { %4940 = vst [vmem:[#allocation33_spill] sm:$0xff] %v4598_v16 }
 0x6ff   :  { %v2028_v18 = vpop.f32.mrf.mxu0  ;;  %v2041_v7 = vpop.f32.mrf.mxu1 }
 0x700   :  { %v2047_v54 = vadd.f32 %v2028_v18, %v1744_v55  ;;  %v2048_v34 = vadd.f32 %v2041_v7, %v1773_v38  ;;  %v1688_v7 = vadd.f32 %v4548_v9, %v4603_v41 }
 0x702   :  { %v2051_v24 = vmul.f32 0.5, %v2047_v54 }
 0x704   :  { %v2002_v23 = vpop.f32.mrf.mxu2  ;;  %v2015_v16 = vpop.f32.mrf.mxu3 }
 0x705   :  { %v2045_v30 = vadd.f32 %v2002_v23, %v1686_v14  ;;  %v2046_v4 = vadd.f32 %v2015_v16, %v1715_v5  ;;  %v1717_v23 = vadd.f32 %v4550_v25, %v4605_v29 }
 0x707   :  { %v2049_v48 = vmul.f32 0.5, %v2045_v30  ;;  %v2050_v15 = vmul.f32 0.5, %v2046_v4  ;;  %v2043_v51 = vpop.f32.mrf.mxu1  ;;  %v2030_v53 = vpop.f32.mrf.mxu0 }
 0x709   :  { %3555 = vtanh.f32 %v2049_v48 }
 0x70a   :  { %3557 = vtanh.f32 %v2050_v15 }
 0x70b   :  { %3559 = vtanh.f32 %v2048_v34 }
 0x70c   :  { %v2004_v19 = vpop.f32.mrf.mxu2  ;;  %v2017_v37 = vpop.f32.mrf.mxu3  ;;  %3561 = vtanh.f32 %v2051_v24 }
 0x70f   :  { %v3556_v3 = vpop.eup %3555 }
 0x710   :  { %v3558_v44 = vpop.eup %3557  ;;  %v2055_v14 = vmul.f32 0.5, %v3556_v3 }
 0x711   :  { %v2056_v5 = vmul.f32 0.5, %v3558_v44  ;;  %v3560_v51 = vpop.eup %3559 }
 0x712   :  { %v2058_v27 = vadd.f32 0.5, %v2055_v14  ;;  %v3562_v48 = vpop.eup %3561  ;;  %v1746_v14 = vadd.f32 %v4544_v52, %v4607_v45 }
 0x713   :  { %v2059_v53 = vadd.f32 0.5, %v2056_v5  ;;  %v2057_v34 = vmul.f32 0.5, %v3562_v48  ;;  %v1775_v5 = vadd.f32 %v4546_v28, %v4609_v1 }
 0x714   :  { %v2063_v55 = vmul.f32 %v3560_v51, %v2058_v27 }
 0x715   :  { %v2062_v4 = vmul.f32 %v3155_v33, %v2059_v53  ;;  %v2060_v54 = vadd.f32 0.5, %v2057_v34 }
 0x717   :  { %v4618_v15 = vadd.f32 %v2063_v55, %v2062_v4 }
 0x719   :  { %3563 = vtanh.f32 %v4618_v15 }
 0x71f   :  { %v3564_v38 = vpop.eup %3563 }
 0x720   :  { %v2066_v30 = vmul.f32 %v3564_v38, %v2060_v54 }
 0x722   :  { %v2071_v24 = vpack.c.bf16 %v2066_v30, %v2066_v30 }
 0x724   :  { %2080 = vmatmul.bf16.vlgmr.msrb.gmra.mxu2 %v2071_v24  ;;  %2093 = vmatmul.bf16.vlgmr.msrb.gmra.mxu3 %v2071_v24 }
 0x725   :  { %2106 = vmatmul.bf16.vlgmr.msrb.gmra.mxu0 %v2071_v24  ;;  %2119 = vmatmul.bf16.vlgmr.msra.gmra.mxu1 %v2071_v24 }
 0x726   :  { %2230 = vmatpush.bf16.msrb.mxu2 %v4361_v39  ;;  %2243 = vmatpush.bf16.msrb.mxu3 %v4363_v50 }
 0x727   :  { %2256 = vmatpush.bf16.msrb.mxu0 %v4386_v21  ;;  %2269 = vmatpush.bf16.msra.mxu1 %v4377_v26 }
 0x72a   :  { %2231 = vmatpush.bf16.msrb.mxu2 %v4366_v61  ;;  %2244 = vmatpush.bf16.msrb.mxu3 %v4369_v58 }
 0x72b   :  { %2257 = vmatpush.bf16.msrb.mxu0 %v4391_v8  ;;  %2270 = vmatpush.bf16.msra.mxu1 %v4389_v47 }
 0x72e   :  { %2232 = vmatpush.bf16.msrb.mxu2 %v4379_v40  ;;  %2245 = vmatpush.bf16.msrb.mxu3 %v4381_v22 }
 0x72f   :  { %2258 = vmatpush.bf16.msrb.mxu0 %v4408_v2  ;;  %2271 = vmatpush.bf16.msra.mxu1 %v4399_v0 }
 0x732   :  { %2233 = vmatpush.bf16.msrb.mxu2 %v4394_v13  ;;  %2246 = vmatpush.bf16.msrb.mxu3 %v4397_v36 }
 0x733   :  { %2259 = vmatpush.bf16.msrb.mxu0 %v4416_v46  ;;  %2272 = vmatpush.bf16.msra.mxu1 %v4410_v10 }
 0x736   :  { %2234 = vmatpush.bf16.msrb.mxu2 %v4402_v59  ;;  %2247 = vmatpush.bf16.msrb.mxu3 %v4406_v6 }
 0x737   :  { %2260 = vmatpush.bf16.msrb.mxu0 %v4430_v17  ;;  %2273 = vmatpush.bf16.msra.mxu1 %v4422_v57 }
 0x73a   :  { %2235 = vmatpush.bf16.msrb.mxu2 %v4414_v42  ;;  %2248 = vmatpush.bf16.msrb.mxu3 %v4420_v60 }
 0x73b   :  { %2261 = vmatpush.bf16.msrb.mxu0 %v4447_v32  ;;  %2274 = vmatpush.bf16.msra.mxu1 %v4444_v63 }
 0x73e   :  { %2236 = vmatpush.bf16.msrb.mxu2 %v4436_v43  ;;  %2249 = vmatpush.bf16.msrb.mxu3 %v4440_v62 }
 0x73f   :  { %2262 = vmatpush.bf16.msrb.mxu0 %v4456_v11  ;;  %2275 = vmatpush.bf16.msra.mxu1 %v4459_v35 }
 0x742   :  { %2237 = vmatpush.bf16.msrb.mxu2 %v4450_v49  ;;  %2250 = vmatpush.bf16.msrb.mxu3 %v4452_v56 }
 0x743   :  { %2263 = vmatpush.bf16.msrb.mxu0 %v4465_v31  ;;  %2276 = vmatpush.bf16.msra.mxu1 %v4467_v20 }
 0x7a2   :  { %v2107_v44 = vpop.f32.mrf.mxu0  ;;  %v2120_v18 = vpop.f32.mrf.mxu1 }
 0x7a3   :  { %v2126_v55 = vadd.f32 %v2107_v44, %v1746_v14  ;;  %v2127_v4 = vadd.f32 %v2120_v18, %v1775_v5 }
 0x7a5   :  { %v2130_v48 = vmul.f32 0.5, %v2126_v55 }
 0x7a7   :  { %v2081_v16 = vpop.f32.mrf.mxu2  ;;  %v2094_v19 = vpop.f32.mrf.mxu3 }
 0x7a8   :  { %v2124_v37 = vadd.f32 %v2081_v16, %v1688_v7  ;;  %v2125_v3 = vadd.f32 %v2094_v19, %v1717_v23 }
 0x7aa   :  { %v2128_v27 = vmul.f32 0.5, %v2124_v37  ;;  %v2129_v33 = vmul.f32 0.5, %v2125_v3  ;;  %v2109_v51 = vpop.f32.mrf.mxu0  ;;  %v2122_v53 = vpop.f32.mrf.mxu1 }
 0x7ac   :  { %3565 = vtanh.f32 %v2128_v27  ;;  %v1691_v27 = vadd.f32 %v4556_v12, %v4603_v41 }
 0x7ad   :  { %3567 = vtanh.f32 %v2129_v33  ;;  %v4941_v33 = vld [vmem:[#allocation12_spill] sm:$0xff] }
 0x7ae   :  { %3569 = vtanh.f32 %v2127_v4  ;;  %v1720_v51 = vadd.f32 %v4941_v33, %v4605_v29 }
 0x7af   :  { %v2083_v9 = vpop.f32.mrf.mxu2  ;;  %v2096_v25 = vpop.f32.mrf.mxu3  ;;  %3571 = vtanh.f32 %v2130_v48 }
 0x7b0   :  { %v4942_v25 = vld [vmem:[#allocation11_spill] sm:$0xff] }
 0x7b1   :  { %v1749_v48 = vadd.f32 %v4942_v25, %v4607_v45 }
 0x7b2   :  { %v3566_v34 = vpop.eup %3565 }
 0x7b3   :  { %v3568_v54 = vpop.eup %3567  ;;  %v2134_v38 = vmul.f32 0.5, %v3566_v34  ;;  %v4943_v34 = vld [vmem:[#allocation13_spill] sm:$0xff] }
 0x7b4   :  { %v2135_v52 = vmul.f32 0.5, %v3568_v54  ;;  %v3570_v24 = vpop.eup %3569  ;;  %v1778_v54 = vadd.f32 %v4943_v34, %v4609_v1 }
 0x7b5   :  { %v2137_v30 = vadd.f32 0.5, %v2134_v38  ;;  %v3572_v16 = vpop.eup %3571 }
 0x7b6   :  { %v2138_v28 = vadd.f32 0.5, %v2135_v52  ;;  %v2136_v18 = vmul.f32 0.5, %v3572_v16 }
 0x7b7   :  { %v2142_v7 = vmul.f32 %v3570_v24, %v2137_v30 }
 0x7b8   :  { %v2141_v23 = vmul.f32 %v2138_v28, %v4618_v15  ;;  %v2139_v19 = vadd.f32 0.5, %v2136_v18 }
 0x7ba   :  { %v4662_v44 = vadd.f32 %v2142_v7, %v2141_v23 }
 0x7bc   :  { %3573 = vtanh.f32 %v4662_v44 }
 0x7c2   :  { %v3574_v37 = vpop.eup %3573 }
 0x7c3   :  { %v2145_v3 = vmul.f32 %v3574_v37, %v2139_v19 }
 0x7c5   :  { %v2150_v14 = vpack.c.bf16 %v2145_v3, %v2145_v3 }
 0x7c7   :  { %2159 = vmatmul.bf16.vlgmr.msra.gmra.mxu2 %v2150_v14  ;;  %2172 = vmatmul.bf16.vlgmr.msra.gmra.mxu3 %v2150_v14 }
 0x7c8   :  { %2185 = vmatmul.bf16.vlgmr.msra.gmra.mxu0 %v2150_v14  ;;  %2198 = vmatmul.bf16.vlgmr.msrb.gmra.mxu1 %v2150_v14 }
 0x7c9   :  { %2309 = vmatpush.bf16.msra.mxu2 %v4361_v39  ;;  %2322 = vmatpush.bf16.msra.mxu3 %v4363_v50 }
 0x7ca   :  { %2335 = vmatpush.bf16.msra.mxu0 %v4386_v21  ;;  %2348 = vmatpush.bf16.msrb.mxu1 %v4377_v26 }
 0x7cd   :  { %2310 = vmatpush.bf16.msra.mxu2 %v4366_v61  ;;  %2323 = vmatpush.bf16.msra.mxu3 %v4369_v58 }
 0x7ce   :  { %2336 = vmatpush.bf16.msra.mxu0 %v4391_v8  ;;  %2349 = vmatpush.bf16.msrb.mxu1 %v4389_v47 }
 0x7d1   :  { %2311 = vmatpush.bf16.msra.mxu2 %v4379_v40  ;;  %2324 = vmatpush.bf16.msra.mxu3 %v4381_v22 }
 0x7d2   :  { %2337 = vmatpush.bf16.msra.mxu0 %v4408_v2  ;;  %2350 = vmatpush.bf16.msrb.mxu1 %v4399_v0 }
 0x7d5   :  { %2312 = vmatpush.bf16.msra.mxu2 %v4394_v13  ;;  %2325 = vmatpush.bf16.msra.mxu3 %v4397_v36 }
 0x7d6   :  { %2338 = vmatpush.bf16.msra.mxu0 %v4416_v46  ;;  %2351 = vmatpush.bf16.msrb.mxu1 %v4410_v10 }
 0x7d9   :  { %2313 = vmatpush.bf16.msra.mxu2 %v4402_v59  ;;  %2326 = vmatpush.bf16.msra.mxu3 %v4406_v6 }
 0x7da   :  { %2339 = vmatpush.bf16.msra.mxu0 %v4430_v17  ;;  %2352 = vmatpush.bf16.msrb.mxu1 %v4422_v57 }
 0x7dd   :  { %2314 = vmatpush.bf16.msra.mxu2 %v4414_v42  ;;  %2327 = vmatpush.bf16.msra.mxu3 %v4420_v60 }
 0x7de   :  { %2340 = vmatpush.bf16.msra.mxu0 %v4447_v32  ;;  %2353 = vmatpush.bf16.msrb.mxu1 %v4444_v63 }
 0x7e1   :  { %2315 = vmatpush.bf16.msra.mxu2 %v4436_v43  ;;  %2328 = vmatpush.bf16.msra.mxu3 %v4440_v62 }
 0x7e2   :  { %2341 = vmatpush.bf16.msra.mxu0 %v4456_v11  ;;  %2354 = vmatpush.bf16.msrb.mxu1 %v4459_v35 }
 0x7e5   :  { %2316 = vmatpush.bf16.msra.mxu2 %v4450_v49  ;;  %2329 = vmatpush.bf16.msra.mxu3 %v4452_v56 }
 0x7e6   :  { %2342 = vmatpush.bf16.msra.mxu0 %v4465_v31  ;;  %2355 = vmatpush.bf16.msrb.mxu1 %v4467_v20 }
 0x845   :  { %v2186_v15 = vpop.f32.mrf.mxu0  ;;  %v2199_v5 = vpop.f32.mrf.mxu1 }
 0x846   :  { %v2205_v28 = vadd.f32 %v2186_v15, %v1749_v48  ;;  %v2206_v7 = vadd.f32 %v2199_v5, %v1778_v54  ;;  %v4944_v54 = vld [vmem:[#allocation17_spill] sm:$0xff] }
 0x848   :  { %v2209_v16 = vmul.f32 0.5, %v2205_v28 }
 0x84a   :  { %v2160_v53 = vpop.f32.mrf.mxu2  ;;  %v2173_v55 = vpop.f32.mrf.mxu3 }
 0x84b   :  { %v2203_v4 = vadd.f32 %v2160_v53, %v1691_v27  ;;  %v2204_v9 = vadd.f32 %v2173_v55, %v1720_v51 }
 0x84d   :  { %v2207_v38 = vmul.f32 0.5, %v2203_v4  ;;  %v2208_v52 = vmul.f32 0.5, %v2204_v9  ;;  %v2188_v30 = vpop.f32.mrf.mxu0  ;;  %v2201_v24 = vpop.f32.mrf.mxu1 }
 0x84f   :  { %3575 = vtanh.f32 %v2207_v38  ;;  %v1693_v38 = vadd.f32 %v4944_v54, %v4603_v41 }
 0x850   :  { %3577 = vtanh.f32 %v2208_v52  ;;  %v4945_v52 = vld [vmem:[#allocation18_spill] sm:$0xff] }
 0x851   :  { %3579 = vtanh.f32 %v2206_v7  ;;  %v1722_v30 = vadd.f32 %v4945_v52, %v4605_v29 }
 0x852   :  { %v2162_v12 = vpop.f32.mrf.mxu2  ;;  %v2175_v23 = vpop.f32.mrf.mxu3  ;;  %3581 = vtanh.f32 %v2209_v16 }
 0x853   :  { %v4946_v23 = vld [vmem:[#allocation14_spill] sm:$0xff] }
 0x854   :  { %v1751_v16 = vadd.f32 %v4946_v23, %v4607_v45 }
 0x855   :  { %v3576_v18 = vpop.eup %3575 }
 0x856   :  { %v3578_v19 = vpop.eup %3577  ;;  %v2213_v37 = vmul.f32 0.5, %v3576_v18  ;;  %v4947_v18 = vld [vmem:[#allocation15_spill] sm:$0xff] }
 0x857   :  { %v2214_v3 = vmul.f32 0.5, %v3578_v19  ;;  %v3580_v27 = vpop.eup %3579  ;;  %v1780_v19 = vadd.f32 %v4947_v18, %v4609_v1 }
 0x858   :  { %v2216_v14 = vadd.f32 0.5, %v2213_v37  ;;  %v3582_v55 = vpop.eup %3581 }
 0x859   :  { %v2217_v33 = vadd.f32 0.5, %v2214_v3  ;;  %v2215_v5 = vmul.f32 0.5, %v3582_v55 }
 0x85a   :  { %v2221_v51 = vmul.f32 %v3580_v27, %v2216_v14 }
 0x85b   :  { %v2220_v53 = vmul.f32 %v2217_v33, %v4662_v44  ;;  %v2218_v4 = vadd.f32 0.5, %v2215_v5 }
 0x85d   :  { %v4706_v15 = vadd.f32 %v2221_v51, %v2220_v53 }
 0x85f   :  { %3583 = vtanh.f32 %v4706_v15 }
 0x865   :  { %v3584_v9 = vpop.eup %3583 }
 0x866   :  { %v2224_v25 = vmul.f32 %v3584_v9, %v2218_v4 }
 0x868   :  { %v2229_v48 = vpack.c.bf16 %v2224_v25, %v2224_v25 }
 0x86a   :  { %2238 = vmatmul.bf16.vlgmr.msrb.gmra.mxu2 %v2229_v48  ;;  %2251 = vmatmul.bf16.vlgmr.msrb.gmra.mxu3 %v2229_v48 }
 0x86b   :  { %2264 = vmatmul.bf16.vlgmr.msrb.gmra.mxu0 %v2229_v48  ;;  %2277 = vmatmul.bf16.vlgmr.msra.gmra.mxu1 %v2229_v48 }
 0x86c   :  { %2388 = vmatpush.bf16.msrb.mxu2 %v4361_v39  ;;  %2401 = vmatpush.bf16.msrb.mxu3 %v4363_v50 }
 0x86d   :  { %2414 = vmatpush.bf16.msrb.mxu0 %v4386_v21  ;;  %2427 = vmatpush.bf16.msra.mxu1 %v4377_v26 }
 0x870   :  { %2389 = vmatpush.bf16.msrb.mxu2 %v4366_v61  ;;  %2402 = vmatpush.bf16.msrb.mxu3 %v4369_v58 }
 0x871   :  { %2415 = vmatpush.bf16.msrb.mxu0 %v4391_v8  ;;  %2428 = vmatpush.bf16.msra.mxu1 %v4389_v47 }
 0x874   :  { %2390 = vmatpush.bf16.msrb.mxu2 %v4379_v40  ;;  %2403 = vmatpush.bf16.msrb.mxu3 %v4381_v22 }
 0x875   :  { %2416 = vmatpush.bf16.msrb.mxu0 %v4408_v2  ;;  %2429 = vmatpush.bf16.msra.mxu1 %v4399_v0 }
 0x878   :  { %2391 = vmatpush.bf16.msrb.mxu2 %v4394_v13  ;;  %2404 = vmatpush.bf16.msrb.mxu3 %v4397_v36 }
 0x879   :  { %2417 = vmatpush.bf16.msrb.mxu0 %v4416_v46  ;;  %2430 = vmatpush.bf16.msra.mxu1 %v4410_v10 }
 0x87c   :  { %2392 = vmatpush.bf16.msrb.mxu2 %v4402_v59  ;;  %2405 = vmatpush.bf16.msrb.mxu3 %v4406_v6 }
 0x87d   :  { %2418 = vmatpush.bf16.msrb.mxu0 %v4430_v17  ;;  %2431 = vmatpush.bf16.msra.mxu1 %v4422_v57 }
 0x880   :  { %2393 = vmatpush.bf16.msrb.mxu2 %v4414_v42  ;;  %2406 = vmatpush.bf16.msrb.mxu3 %v4420_v60 }
 0x881   :  { %2419 = vmatpush.bf16.msrb.mxu0 %v4447_v32  ;;  %2432 = vmatpush.bf16.msra.mxu1 %v4444_v63 }
 0x884   :  { %2394 = vmatpush.bf16.msrb.mxu2 %v4436_v43  ;;  %2407 = vmatpush.bf16.msrb.mxu3 %v4440_v62 }
 0x885   :  { %2420 = vmatpush.bf16.msrb.mxu0 %v4456_v11  ;;  %2433 = vmatpush.bf16.msra.mxu1 %v4459_v35 }
 0x888   :  { %2395 = vmatpush.bf16.msrb.mxu2 %v4450_v49  ;;  %2408 = vmatpush.bf16.msrb.mxu3 %v4452_v56 }
 0x889   :  { %2421 = vmatpush.bf16.msrb.mxu0 %v4465_v31  ;;  %2434 = vmatpush.bf16.msra.mxu1 %v4467_v20 }
 0x8e8   :  { %v2265_v44 = vpop.f32.mrf.mxu0  ;;  %v2278_v34 = vpop.f32.mrf.mxu1 }
 0x8e9   :  { %v2284_v33 = vadd.f32 %v2265_v44, %v1751_v16  ;;  %v2285_v51 = vadd.f32 %v2278_v34, %v1780_v19  ;;  %v4948_v19 = vld [vmem:[#allocation21_spill] sm:$0xff] }
 0x8eb   :  { %v2288_v5 = vmul.f32 0.5, %v2284_v33 }
 0x8ed   :  { %v2239_v24 = vpop.f32.mrf.mxu2  ;;  %v2252_v28 = vpop.f32.mrf.mxu3 }
 0x8ee   :  { %v2282_v7 = vadd.f32 %v2239_v24, %v1693_v38  ;;  %v2283_v12 = vadd.f32 %v2252_v28, %v1722_v30 }
 0x8f0   :  { %v2286_v37 = vmul.f32 0.5, %v2282_v7  ;;  %v2287_v3 = vmul.f32 0.5, %v2283_v12  ;;  %v2267_v14 = vpop.f32.mrf.mxu0  ;;  %v2280_v27 = vpop.f32.mrf.mxu1 }
 0x8f2   :  { %3585 = vtanh.f32 %v2286_v37  ;;  %v1696_v37 = vadd.f32 %v4948_v19, %v4603_v41 }
 0x8f3   :  { %3587 = vtanh.f32 %v2287_v3  ;;  %v4949_v3 = vld [vmem:[#allocation20_spill] sm:$0xff] }
 0x8f4   :  { %3589 = vtanh.f32 %v2285_v51  ;;  %v1725_v14 = vadd.f32 %v4949_v3, %v4605_v29 }
 0x8f5   :  { %v2241_v53 = vpop.f32.mrf.mxu2  ;;  %v2254_v55 = vpop.f32.mrf.mxu3  ;;  %3591 = vtanh.f32 %v2288_v5 }
 0x8f6   :  { %v4950_v55 = vld [vmem:[#allocation16_spill] sm:$0xff] }
 0x8f7   :  { %v1754_v5 = vadd.f32 %v4950_v55, %v4607_v45 }
 0x8f8   :  { %v3586_v4 = vpop.eup %3585 }
 0x8f9   :  { %v3588_v9 = vpop.eup %3587  ;;  %v2292_v25 = vmul.f32 0.5, %v3586_v4  ;;  %v4951_v4 = vld [vmem:[#allocation19_spill] sm:$0xff] }
 0x8fa   :  { %v2293_v48 = vmul.f32 0.5, %v3588_v9  ;;  %v3590_v38 = vpop.eup %3589  ;;  %v1783_v9 = vadd.f32 %v4951_v4, %v4609_v1 }
 0x8fb   :  { %v2295_v54 = vadd.f32 0.5, %v2292_v25  ;;  %v3592_v28 = vpop.eup %3591 }
 0x8fc   :  { %v2296_v52 = vadd.f32 0.5, %v2293_v48  ;;  %v2294_v34 = vmul.f32 0.5, %v3592_v28 }
 0x8fd   :  { %v2300_v30 = vmul.f32 %v3590_v38, %v2295_v54 }
 0x8fe   :  { %v2299_v24 = vmul.f32 %v2296_v52, %v4706_v15  ;;  %v2297_v7 = vadd.f32 0.5, %v2294_v34 }
 0x900   :  { %v4750_v44 = vadd.f32 %v2300_v30, %v2299_v24 }
 0x902   :  { %3593 = vtanh.f32 %v4750_v44 }
 0x908   :  { %v3594_v12 = vpop.eup %3593 }
 0x909   :  { %v2303_v23 = vmul.f32 %v3594_v12, %v2297_v7 }
 0x90b   :  { %v2308_v16 = vpack.c.bf16 %v2303_v23, %v2303_v23 }
 0x90d   :  { %2317 = vmatmul.bf16.vlgmr.msra.gmra.mxu2 %v2308_v16  ;;  %2330 = vmatmul.bf16.vlgmr.msra.gmra.mxu3 %v2308_v16 }
 0x90e   :  { %2343 = vmatmul.bf16.vlgmr.msra.gmra.mxu0 %v2308_v16  ;;  %2356 = vmatmul.bf16.vlgmr.msrb.gmra.mxu1 %v2308_v16 }
 0x90f   :  { %2467 = vmatpush.bf16.msra.mxu2 %v4361_v39  ;;  %2480 = vmatpush.bf16.msra.mxu3 %v4363_v50 }
 0x910   :  { %2493 = vmatpush.bf16.msra.mxu0 %v4386_v21  ;;  %2506 = vmatpush.bf16.msrb.mxu1 %v4377_v26 }
 0x913   :  { %2468 = vmatpush.bf16.msra.mxu2 %v4366_v61  ;;  %2481 = vmatpush.bf16.msra.mxu3 %v4369_v58 }
 0x914   :  { %2494 = vmatpush.bf16.msra.mxu0 %v4391_v8  ;;  %2507 = vmatpush.bf16.msrb.mxu1 %v4389_v47 }
 0x917   :  { %2469 = vmatpush.bf16.msra.mxu2 %v4379_v40  ;;  %2482 = vmatpush.bf16.msra.mxu3 %v4381_v22 }
 0x918   :  { %2495 = vmatpush.bf16.msra.mxu0 %v4408_v2  ;;  %2508 = vmatpush.bf16.msrb.mxu1 %v4399_v0 }
 0x91b   :  { %2470 = vmatpush.bf16.msra.mxu2 %v4394_v13  ;;  %2483 = vmatpush.bf16.msra.mxu3 %v4397_v36 }
 0x91c   :  { %2496 = vmatpush.bf16.msra.mxu0 %v4416_v46  ;;  %2509 = vmatpush.bf16.msrb.mxu1 %v4410_v10 }
 0x91f   :  { %2471 = vmatpush.bf16.msra.mxu2 %v4402_v59  ;;  %2484 = vmatpush.bf16.msra.mxu3 %v4406_v6 }
 0x920   :  { %2497 = vmatpush.bf16.msra.mxu0 %v4430_v17  ;;  %2510 = vmatpush.bf16.msrb.mxu1 %v4422_v57 }
 0x923   :  { %2472 = vmatpush.bf16.msra.mxu2 %v4414_v42  ;;  %2485 = vmatpush.bf16.msra.mxu3 %v4420_v60 }
 0x924   :  { %2498 = vmatpush.bf16.msra.mxu0 %v4447_v32  ;;  %2511 = vmatpush.bf16.msrb.mxu1 %v4444_v63 }
 0x927   :  { %2473 = vmatpush.bf16.msra.mxu2 %v4436_v43  ;;  %2486 = vmatpush.bf16.msra.mxu3 %v4440_v62 }
 0x928   :  { %2499 = vmatpush.bf16.msra.mxu0 %v4456_v11  ;;  %2512 = vmatpush.bf16.msrb.mxu1 %v4459_v35 }
 0x92b   :  { %2474 = vmatpush.bf16.msra.mxu2 %v4450_v49  ;;  %2487 = vmatpush.bf16.msra.mxu3 %v4452_v56 }
 0x92c   :  { %2500 = vmatpush.bf16.msra.mxu0 %v4465_v31  ;;  %2513 = vmatpush.bf16.msrb.mxu1 %v4467_v20 }
 0x98b   :  { %v2344_v15 = vpop.f32.mrf.mxu0  ;;  %v2357_v18 = vpop.f32.mrf.mxu1 }
 0x98c   :  { %v2363_v52 = vadd.f32 %v2344_v15, %v1754_v5  ;;  %v2364_v30 = vadd.f32 %v2357_v18, %v1783_v9 }
 0x98e   :  { %v2367_v34 = vmul.f32 0.5, %v2363_v52 }
 0x990   :  { %v2318_v27 = vpop.f32.mrf.mxu2  ;;  %v2331_v33 = vpop.f32.mrf.mxu3 }
 0x991   :  { %v2361_v51 = vadd.f32 %v2318_v27, %v1696_v37  ;;  %v2362_v53 = vadd.f32 %v2331_v33, %v1725_v14 }
 0x993   :  { %v2365_v25 = vmul.f32 0.5, %v2361_v51  ;;  %v2366_v48 = vmul.f32 0.5, %v2362_v53  ;;  %v2346_v54 = vpop.f32.mrf.mxu0  ;;  %v2359_v38 = vpop.f32.mrf.mxu1 }
 0x995   :  { %3595 = vtanh.f32 %v2365_v25 }
 0x996   :  { %3597 = vtanh.f32 %v2366_v48 }
 0x997   :  { %3599 = vtanh.f32 %v2364_v30 }
 0x998   :  { %v2320_v24 = vpop.f32.mrf.mxu2  ;;  %v2333_v28 = vpop.f32.mrf.mxu3  ;;  %3601 = vtanh.f32 %v2367_v34  ;;  %v4957_v34 = vld [vmem:[#allocation30_spill] sm:$0xff] }
 0x999   :  { %v4956_v24 = vld [vmem:[#allocation28_spill] sm:$0xff] }
 0x99a   :  { %v1701_v28 = vadd.f32 %v4956_v24, %v4603_v41 }
 0x99b   :  { %v3596_v7 = vpop.eup %3595 }
 0x99c   :  { %v3598_v12 = vpop.eup %3597  ;;  %v2371_v23 = vmul.f32 0.5, %v3596_v7  ;;  %v1730_v7 = vadd.f32 %v4957_v34, %v4605_v29 }
 0x99d   :  { %v2372_v16 = vmul.f32 0.5, %v3598_v12  ;;  %v3600_v37 = vpop.eup %3599 }
 0x99e   :  { %v2374_v19 = vadd.f32 0.5, %v2371_v23  ;;  %v3602_v33 = vpop.eup %3601 }
 0x99f   :  { %v2375_v3 = vadd.f32 0.5, %v2372_v16  ;;  %v2373_v18 = vmul.f32 0.5, %v3602_v33 }
 0x9a0   :  { %v2379_v14 = vmul.f32 %v3600_v37, %v2374_v19  ;;  %v4958_v37 = vld [vmem:[#allocation24_spill] sm:$0xff] }
 0x9a1   :  { %v2378_v27 = vmul.f32 %v2375_v3, %v4750_v44  ;;  %v2376_v51 = vadd.f32 0.5, %v2373_v18  ;;  %v1759_v3 = vadd.f32 %v4958_v37, %v4607_v45 }
 0x9a3   :  { %v4794_v15 = vadd.f32 %v2379_v14, %v2378_v27  ;;  %v4959_v14 = vld [vmem:[#allocation27_spill] sm:$0xff] }
 0x9a4   :  { %v1788_v27 = vadd.f32 %v4959_v14, %v4609_v1 }
 0x9a5   :  { %3603 = vtanh.f32 %v4794_v15 }
 0x9ab   :  { %v3604_v53 = vpop.eup %3603 }
 0x9ac   :  { %v2382_v55 = vmul.f32 %v3604_v53, %v2376_v51 }
 0x9ae   :  { %v2387_v5 = vpack.c.bf16 %v2382_v55, %v2382_v55 }
 0x9b0   :  { %2396 = vmatmul.bf16.vlgmr.msrb.gmra.mxu2 %v2387_v5  ;;  %2409 = vmatmul.bf16.vlgmr.msrb.gmra.mxu3 %v2387_v5 }
 0x9b1   :  { %2422 = vmatmul.bf16.vlgmr.msrb.gmra.mxu0 %v2387_v5  ;;  %2435 = vmatmul.bf16.vlgmr.msra.gmra.mxu1 %v2387_v5 }
 0x9b2   :  { %2546 = vmatpush.bf16.msrb.mxu2 %v4361_v39  ;;  %2559 = vmatpush.bf16.msrb.mxu3 %v4363_v50 }
 0x9b3   :  { %2572 = vmatpush.bf16.msrb.mxu0 %v4386_v21  ;;  %2585 = vmatpush.bf16.msra.mxu1 %v4377_v26  ;;  %v4953_v26 = vld [vmem:[#allocation26_spill] sm:$0xff] }
 0x9b6   :  { %2547 = vmatpush.bf16.msrb.mxu2 %v4366_v61  ;;  %2560 = vmatpush.bf16.msrb.mxu3 %v4369_v58  ;;  %v4952_v61 = vld [vmem:[#allocation25_spill] sm:$0xff] }
 0x9b7   :  { %2573 = vmatpush.bf16.msrb.mxu0 %v4391_v8  ;;  %2586 = vmatpush.bf16.msra.mxu1 %v4389_v47  ;;  %v1698_v58 = vadd.f32 %v4952_v61, %v4603_v41 }
 0x9ba   :  { %2548 = vmatpush.bf16.msrb.mxu2 %v4379_v40  ;;  %2561 = vmatpush.bf16.msrb.mxu3 %v4381_v22  ;;  %v1727_v40 = vadd.f32 %v4953_v26, %v4605_v29 }
 0x9bb   :  { %2574 = vmatpush.bf16.msrb.mxu0 %v4408_v2  ;;  %2587 = vmatpush.bf16.msra.mxu1 %v4399_v0  ;;  %v4955_v0 = vld [vmem:[#allocation23_spill] sm:$0xff] }
 0x9be   :  { %2549 = vmatpush.bf16.msrb.mxu2 %v4394_v13  ;;  %2562 = vmatpush.bf16.msrb.mxu3 %v4397_v36  ;;  %v4954_v13 = vld [vmem:[#allocation22_spill] sm:$0xff] }
 0x9bf   :  { %2575 = vmatpush.bf16.msrb.mxu0 %v4416_v46  ;;  %2588 = vmatpush.bf16.msra.mxu1 %v4410_v10  ;;  %v1756_v36 = vadd.f32 %v4954_v13, %v4607_v45 }
 0x9c2   :  { %2550 = vmatpush.bf16.msrb.mxu2 %v4402_v59  ;;  %2563 = vmatpush.bf16.msrb.mxu3 %v4406_v6  ;;  %v1785_v59 = vadd.f32 %v4955_v0, %v4609_v1 }
 0x9c3   :  { %2576 = vmatpush.bf16.msrb.mxu0 %v4430_v17  ;;  %2589 = vmatpush.bf16.msra.mxu1 %v4422_v57 }
 0x9c6   :  { %2551 = vmatpush.bf16.msrb.mxu2 %v4414_v42  ;;  %2564 = vmatpush.bf16.msrb.mxu3 %v4420_v60 }
 0x9c7   :  { %2577 = vmatpush.bf16.msrb.mxu0 %v4447_v32  ;;  %2590 = vmatpush.bf16.msra.mxu1 %v4444_v63 }
 0x9ca   :  { %2552 = vmatpush.bf16.msrb.mxu2 %v4436_v43  ;;  %2565 = vmatpush.bf16.msrb.mxu3 %v4440_v62 }
 0x9cb   :  { %2578 = vmatpush.bf16.msrb.mxu0 %v4456_v11  ;;  %2591 = vmatpush.bf16.msra.mxu1 %v4459_v35 }
 0x9ce   :  { %2553 = vmatpush.bf16.msrb.mxu2 %v4450_v49  ;;  %2566 = vmatpush.bf16.msrb.mxu3 %v4452_v56 }
 0x9cf   :  { %2579 = vmatpush.bf16.msrb.mxu0 %v4465_v31  ;;  %2592 = vmatpush.bf16.msra.mxu1 %v4467_v20 }
 0xa2e   :  { %v2423_v39 = vpop.f32.mrf.mxu0  ;;  %v2436_v50 = vpop.f32.mrf.mxu1 }
 0xa2f   :  { %v2442_v46 = vadd.f32 %v2423_v39, %v1756_v36  ;;  %v2443_v60 = vadd.f32 %v2436_v50, %v1785_v59 }
 0xa31   :  { %v2446_v43 = vmul.f32 0.5, %v2442_v46  ;;  %v3461_v46 = vld [vmem:[#allocation8 + $0x38] sm:$0xff] }
 0xa33   :  { %v2397_v22 = vpop.f32.mrf.mxu2  ;;  %v2410_v21 = vpop.f32.mrf.mxu3 }
 0xa34   :  { %v2440_v47 = vadd.f32 %v2397_v22, %v1698_v58  ;;  %v2441_v8 = vadd.f32 %v2410_v21, %v1727_v40 }
 0xa36   :  { %v2444_v6 = vmul.f32 0.5, %v2440_v47  ;;  %v2445_v2 = vmul.f32 0.5, %v2441_v8  ;;  %v2425_v10 = vpop.f32.mrf.mxu0  ;;  %v2438_v42 = vpop.f32.mrf.mxu1 }
 0xa38   :  { %3605 = vtanh.f32 %v2444_v6 }
 0xa39   :  { %3607 = vtanh.f32 %v2445_v2 }
 0xa3a   :  { %3609 = vtanh.f32 %v2443_v60  ;;  %v3460_v60 = vld [vmem:[#allocation8 + $0x30] sm:$0xff] }
 0xa3b   :  { %v2399_v57 = vpop.f32.mrf.mxu2  ;;  %v2412_v17 = vpop.f32.mrf.mxu3  ;;  %3611 = vtanh.f32 %v2446_v43  ;;  %v3457_v43 = vld [vmem:[#allocation8 + $0x18] sm:$0xff] }
 0xa3c   :  { %v3459_v57 = vld [vmem:[#allocation8 + $0x28] sm:$0xff]  ;;  %v3458_v17 = vld [vmem:[#allocation8 + $0x20] sm:$0xff] }
 0xa3e   :  { %v3606_v62 = vpop.eup %3605 }
 0xa3f   :  { %v3608_v63 = vpop.eup %3607  ;;  %v2450_v32 = vmul.f32 0.5, %v3606_v62  ;;  %v3456_v62 = vld [vmem:[#allocation8 + $0x10] sm:$0xff] }
 0xa40   :  { %v2451_v49 = vmul.f32 0.5, %v3608_v63  ;;  %v3610_v11 = vpop.eup %3609  ;;  %v3455_v63 = vld [vmem:[#allocation8 + $0x8] sm:$0xff] }
 0xa41   :  { %v2453_v56 = vadd.f32 0.5, %v2450_v32  ;;  %v3612_v44 = vpop.eup %3611  ;;  %v3454_v32 = vld [vmem:[#allocation8] sm:$0xff] }
 0xa42   :  { %v2454_v35 = vadd.f32 0.5, %v2451_v49  ;;  %v2452_v9 = vmul.f32 0.5, %v3612_v44 }
 0xa43   :  { %v2458_v31 = vmul.f32 %v3610_v11, %v2453_v56  ;;  %v4960_v11 = vld [vmem:[#allocation32_spill] sm:$0xff] }
 0xa44   :  { %v2457_v20 = vmul.f32 %v2454_v35, %v4794_v15  ;;  %v2455_v25 = vadd.f32 0.5, %v2452_v9  ;;  %v1703_v35 = vadd.f32 %v4960_v11, %v4603_v41 }
 0xa46   :  { %v2459_v4 = vadd.f32 %v2458_v31, %v2457_v20  ;;  %v4961_v31 = vld [vmem:[#allocation33_spill] sm:$0xff] }
 0xa47   :  { %v1732_v20 = vadd.f32 %v4961_v31, %v4605_v29 }
 0xa48   :  { %3613 = vtanh.f32 %v2459_v4 }
 0xa4e   :  { %v3614_v48 = vpop.eup %3613 }
 0xa4f   :  { %v2461_v54 = vmul.f32 %v3614_v48, %v2455_v25  ;;  %v4962_v48 = vld [vmem:[#allocation29_spill] sm:$0xff] }
 0xa51   :  { %v2466_v38 = vpack.c.bf16 %v2461_v54, %v2461_v54  ;;  %v1761_v54 = vadd.f32 %v4962_v48, %v4607_v45 }
 0xa53   :  { %2475 = vmatmul.bf16.vlgmr.msra.gmra.mxu2 %v2466_v38  ;;  %2488 = vmatmul.bf16.vlgmr.msra.gmra.mxu3 %v2466_v38 }
 0xa54   :  { %2501 = vmatmul.bf16.vlgmr.msra.gmra.mxu0 %v2466_v38  ;;  %2514 = vmatmul.bf16.vlgmr.msrb.gmra.mxu1 %v2466_v38  ;;  %v4963_v38 = vld [vmem:[#allocation31_spill] sm:$0xff] }
 0xa55   :  { %2693 = vmatpush.bf16.msra.mxu2 %v3461_v46 }
 0xa59   :  { %2694 = vmatpush.bf16.msra.mxu2 %v3460_v60 }
 0xa5d   :  { %2695 = vmatpush.bf16.msra.mxu2 %v3459_v57 }
 0xa61   :  { %2696 = vmatpush.bf16.msra.mxu2 %v3458_v17 }
 0xa65   :  { %2697 = vmatpush.bf16.msra.mxu2 %v3457_v43 }
 0xa69   :  { %2698 = vmatpush.bf16.msra.mxu2 %v3456_v62 }
 0xa6d   :  { %2699 = vmatpush.bf16.msra.mxu2 %v3455_v63 }
 0xa71   :  { %2700 = vmatpush.bf16.msra.mxu2 %v3454_v32 }
 0xad1   :  { %v2502_v52 = vpop.f32.mrf.mxu0  ;;  %v2515_v30 = vpop.f32.mrf.mxu1 }
 0xad2   :  { %v2521_v53 = vadd.f32 %v2502_v52, %v1759_v3  ;;  %v2522_v55 = vadd.f32 %v2515_v30, %v1788_v27  ;;  %v1790_v52 = vadd.f32 %v4963_v38, %v4609_v1 }
 0xad4   :  { %v2525_v50 = vmul.f32 0.5, %v2521_v53 }
 0xad6   :  { %v2476_v12 = vpop.f32.mrf.mxu2  ;;  %v2489_v23 = vpop.f32.mrf.mxu3 }
 0xad7   :  { %v2519_v16 = vadd.f32 %v2476_v12, %v1701_v28  ;;  %v2520_v19 = vadd.f32 %v2489_v23, %v1730_v7 }
 0xad9   :  { %v2523_v33 = vmul.f32 0.5, %v2519_v16  ;;  %v2524_v15 = vmul.f32 0.5, %v2520_v19  ;;  %v2504_v18 = vpop.f32.mrf.mxu0  ;;  %v2517_v51 = vpop.f32.mrf.mxu1 }
 0xadb   :  { %3615 = vtanh.f32 %v2523_v33 }
 0xadc   :  { %3617 = vtanh.f32 %v2524_v15 }
 0xadd   :  { %3619 = vtanh.f32 %v2522_v55 }
 0xade   :  { %v2478_v5 = vpop.f32.mrf.mxu2  ;;  %v2491_v39 = vpop.f32.mrf.mxu3  ;;  %3621 = vtanh.f32 %v2525_v50  ;;  %v3474_v50 = vld [vmem:[%s4874_s8] ss:$0 sm:$0xff] }
 0xae1   :  { %v3616_v61 = vpop.eup %3615 }
 0xae2   :  { %v3618_v58 = vpop.eup %3617  ;;  %v2529_v26 = vmul.f32 0.5, %v3616_v61 }
 0xae3   :  { %v2530_v40 = vmul.f32 0.5, %v3618_v58  ;;  %v3620_v21 = vpop.eup %3619 }
 0xae4   :  { %v2532_v22 = vadd.f32 0.5, %v2529_v26  ;;  %v3622_v36 = vpop.eup %3621 }
 0xae5   :  { %v2533_v47 = vadd.f32 0.5, %v2530_v40  ;;  %v2531_v59 = vmul.f32 0.5, %v3622_v36 }
 0xae6   :  { %v2537_v8 = vmul.f32 %v3620_v21, %v2532_v22 }
 0xae7   :  { %v2536_v13 = vmul.f32 %v2533_v47, %v2459_v4  ;;  %v2534_v6 = vadd.f32 0.5, %v2531_v59 }
 0xae9   :  { %v2538_v0 = vadd.f32 %v2537_v8, %v2536_v13 }
 0xaeb   :  { %3623 = vtanh.f32 %v2538_v0 }
 0xaf1   :  { %v3624_v2 = vpop.eup %3623 }
 0xaf2   :  { %v2540_v10 = vmul.f32 %v3624_v2, %v2534_v6 }
 0xaf4   :  { %v2545_v42 = vpack.c.bf16 %v2540_v10, %v2540_v10 }
 0xaf6   :  { %2554 = vmatmul.bf16.vlgmr.msrb.gmra.mxu2 %v2545_v42  ;;  %2567 = vmatmul.bf16.vlgmr.msrb.gmra.mxu3 %v2545_v42 }
 0xaf7   :  { %2580 = vmatmul.bf16.vlgmr.msrb.gmra.mxu0 %v2545_v42  ;;  %2593 = vmatmul.bf16.vlgmr.msra.gmra.mxu1 %v2545_v42 }
 0xb74   :  { %v2581_v49 = vpop.f32.mrf.mxu0  ;;  %v2594_v56 = vpop.f32.mrf.mxu1 }
 0xb75   :  { %v2600_v7 = vadd.f32 %v2581_v49, %v1761_v54  ;;  %v2601_v12 = vadd.f32 %v2594_v56, %v1790_v52 }
 0xb77   :  { %v2604_v23 = vmul.f32 0.5, %v2600_v7 }
 0xb79   :  { %v2555_v44 = vpop.f32.mrf.mxu2  ;;  %v2568_v4 = vpop.f32.mrf.mxu3 }
 0xb7a   :  { %v2598_v9 = vadd.f32 %v2555_v44, %v1703_v35  ;;  %v2599_v25 = vadd.f32 %v2568_v4, %v1732_v20 }
 0xb7c   :  { %v2602_v30 = vmul.f32 0.5, %v2598_v9  ;;  %v2603_v24 = vmul.f32 0.5, %v2599_v25  ;;  %v2583_v28 = vpop.f32.mrf.mxu0  ;;  %v2596_v34 = vpop.f32.mrf.mxu1 }
 0xb7e   :  { %3625 = vtanh.f32 %v2602_v30 }
 0xb7f   :  { %3627 = vtanh.f32 %v2603_v24 }
 0xb80   :  { %3629 = vtanh.f32 %v2601_v12 }
 0xb81   :  { %v2557_v41 = vpop.f32.mrf.mxu2  ;;  %v2570_v29 = vpop.f32.mrf.mxu3  ;;  %3631 = vtanh.f32 %v2604_v23 }
 0xb84   :  { %v3626_v16 = vpop.eup %3625 }
 0xb85   :  { %v3628_v19 = vpop.eup %3627  ;;  %v2608_v37 = vmul.f32 0.5, %v3626_v16 }
 0xb86   :  { %v2609_v45 = vmul.f32 0.5, %v3628_v19  ;;  %v3630_v14 = vpop.eup %3629 }
 0xb87   :  { %v2611_v3 = vadd.f32 0.5, %v2608_v37  ;;  %v3632_v15 = vpop.eup %3631 }
 0xb88   :  { %v2612_v1 = vadd.f32 0.5, %v2609_v45  ;;  %v2610_v51 = vmul.f32 0.5, %v3632_v15 }
 0xb89   :  { %v2616_v27 = vmul.f32 %v3630_v14, %v2611_v3 }
 0xb8a   :  { %v2615_v33 = vmul.f32 %v2612_v1, %v2538_v0  ;;  %v2613_v53 = vadd.f32 0.5, %v2610_v51 }
 0xb8c   :  { %v2617_v18 = vadd.f32 %v2616_v27, %v2615_v33 }
 0xb8e   :  { %3633 = vtanh.f32 %v2617_v18  ;;  %3285 = vst [vmem:[%s4877_s11 + $0x8] sm:$0xff] %v2617_v18 }
 0xb94   :  { %v3634_v55 = vpop.eup %3633 }
 0xb95   :  { %v2619_v5 = vmul.f32 %v3634_v55, %v2613_v53 }
 0xb97   :  { %3284 = vst [vmem:[%s4876_s10 + $0x8] sm:$0xff] %v2619_v5  ;;  %v2624_v39 = vpack.c.bf16 %v2619_v5, %v2619_v5 }
 0xb99   :  { %2701 = vmatmul.bf16.vlgmr.msra.gmra.mxu2 %v2624_v39 }
 0xc1c   :  { %v2702_v61 = vpop.f32.mrf.mxu2 }
 0xc1d   :  { %v2703_v58 = vadd.f32 %v3474_v50, %v2702_v61 }
 0xc1f   :  { %2706 = vst [vmem:[%s4875_s9] sm:$0xff] %v2703_v58 }
 0xc24   :  { %v2704_v26 = vpop.f32.mrf.mxu2 }
 0xc25   :  { %2719 = vsyncpa [#allocation5], 1 }
 0xc26   :  { %2720 = vsyncpa [#allocation7], 1 }

</bundles_post_ra>
